<compile_context>
chip_gen: v7x
topology: tpu7x:2x2x1
jax: 0.10.0
libtpu: 0.0.40
codegen_flags: <defaults>
</compile_context>

<pallas_src>
import numpy as np
import jax
import jax.numpy as jnp
from jax.experimental import pallas as pl
from jax.experimental.pallas import tpu as pltpu

# ---- model hyper-parameters (small demo sizes consistent with the module) -------------------
BATCH = 2
MAX_SEQ_LEN = 8
INPUT_DIM = 16
HIDDEN_DIM = 32
OUTPUT_DIM = 8
TIME_EMB = 8
NUM_LAYERS = 2
NUM_TIMESTEPS = 10            # nn.Embedding(num_embeddings=10, ...)


# =============================== offline parameter preparation ===============================
# Joint gate-column layout (width 6H): [r_f | r_b | z_f | z_b | n_f | n_b].
# Gate g (0=r,1=z,2=n) of direction d (0=fwd,1=bwd) lives at columns [g*2H + d*H, g*2H + (d+1)*H).

def _place_joint(m, d):
    """m: (in, 3H) with columns stacked [r|z|n].  Returns (in, 6H) with the gate blocks at
    direction d's joint columns and zeros at the other direction's columns."""
    H = HIDDEN_DIM
    zeros = jnp.zeros((m.shape[0], H), m.dtype)
    blocks = []
    for g in range(3):
        mg = m[:, g * H:(g + 1) * H]
        blocks += [mg, zeros] if d == 0 else [zeros, mg]
    return jnp.concatenate(blocks, axis=1)


def prepare_params(params):
    """One-time weight repacking (transposes, joint-column placement, block-diagonal W_hh,
    folded time-embedding bias table).  Runs once; the per-call forward only does matmuls."""
    H, D = HIDDEN_DIM, INPUT_DIM
    f32 = jnp.float32
    p = {}

    # ---- layer 0 ----
    whh_rows, bhh, tb_table = [], 0.0, 0.0
    for d, sfx in enumerate(("", "_reverse")):
        w_ih = params[f"w_ih_l0{sfx}"].astype(f32)          # (3H, D+E), gates [r;z;n]
        b_ih = params[f"b_ih_l0{sfx}"].astype(f32)           # (3H,)
        w_hh = params[f"w_hh_l0{sfx}"].astype(f32)           # (3H, H)
        b_hh = params[f"b_hh_l0{sfx}"].astype(f32)           # (3H,)
        p["w0F" if d == 0 else "w0B"] = _place_joint(w_ih[:, :D].T, d)          # (D, 6H)
        w_time = _place_joint(w_ih[:, D:].T, d)                                  # (E, 6H)
        b_i = _place_joint(b_ih[None, :], d)                                     # (1, 6H)
        # time-embedding projection + b_ih folded into a per-timestep-index bias table
        tb_table = tb_table + params["time_emb"].astype(f32) @ w_time + b_i      # (10, 6H)
        whh_rows.append(_place_joint(w_hh.T, d))                                 # (H, 6H)
        bhh = bhh + _place_joint(b_hh[None, :], d)                               # (1, 6H)
    p["tb0_table"] = tb_table
    p["whh0"] = jnp.concatenate(whh_rows, axis=0)                                # (2H, 6H) block-diag
    p["bhh0"] = bhh

    # ---- layer 1 (input = [out_fwd | out_bwd]) ----
    whh_rows, bhh = [], 0.0
    for d, sfx in enumerate(("", "_reverse")):
        w_ih = params[f"w_ih_l1{sfx}"].astype(f32)            # (3H, 2H)
        b_ih = params[f"b_ih_l1{sfx}"].astype(f32)
        w_hh = params[f"w_hh_l1{sfx}"].astype(f32)
        b_hh = params[f"b_hh_l1{sfx}"].astype(f32)
        key = "F" if d == 0 else "B"
        p[f"w1{key}a"] = _place_joint(w_ih[:, :H].T, d)       # acts on fwd half  (H, 6H)
        p[f"w1{key}b"] = _place_joint(w_ih[:, H:].T, d)       # acts on bwd half  (H, 6H)
        p[f"b1{key}"] = _place_joint(b_ih[None, :], d)        # (1, 6H)
        whh_rows.append(_place_joint(w_hh.T, d))
        bhh = bhh + _place_joint(b_hh[None, :], d)
    p["whh1"] = jnp.concatenate(whh_rows, axis=0)             # (2H, 6H)
    p["bhh1"] = bhh

    # ---- final FC on [fwd | bwd] ----
    w_fc = params["w_fc"].astype(f32)                          # (O, 2H)
    p["wfca"] = w_fc[:, :H].T                                  # (H, O)
    p["wfcb"] = w_fc[:, H:].T                                  # (H, O)
    p["bfc"] = params["b_fc"].astype(f32)[None, :]             # (1, O)
    return p


# ====================================== fused kernel =========================================

def _fused_bigru_kernel(x_ref, tb0_ref,
                        w0F_ref, w0B_ref, whh0_ref, bhh0_ref,
                        w1Fa_ref, w1Fb_ref, b1F_ref, w1Ba_ref, w1Bb_ref, b1B_ref,
                        whh1_ref, bhh1_ref,
                        wfca_ref, wfcb_ref, bfc_ref,
                        o_ref,
                        gxF_sc, gxB_sc, of0_sc, ob0_sc, of1_sc, ob1_sc):
    B, T, H = BATCH, MAX_SEQ_LEN, HIDDEN_DIM
    H2 = 2 * H

    def run_layer(whh, bhh, gi_bias, of_sc, ob_sc):
        """Bidirectional GRU recurrence.  gxF_sc holds the forward direction's input-gate
        pre-activations (joint columns, bwd columns zero) in natural time order; gxB_sc the
        backward direction's.  Both directions advance together: forward consumes time t,
        backward consumes time T-1-t; h = [h_f | h_b] (B, 2H)."""
        h = jnp.zeros((B, H2), jnp.float32)
        for t in range(T):                      # T=8: fully unrolled, all indices static
            gi = (gxF_sc[t * B:(t + 1) * B, :]
                  + gxB_sc[(T - 1 - t) * B:(T - t) * B, :])
            if gi_bias is not None:
                gi = gi + gi_bias
            # one block-diagonal matmul for both directions x all three gates
            gh = jnp.dot(h, whh, preferred_element_type=jnp.float32) + bhh
            r = jax.nn.sigmoid(gi[:, :H2] + gh[:, :H2])
            z = jax.nn.sigmoid(gi[:, H2:2 * H2] + gh[:, H2:2 * H2])
            n = jnp.tanh(gi[:, 2 * H2:] + r * gh[:, 2 * H2:])
            h = (1.0 - z) * n + z * h
            of_sc[t * B:(t + 1) * B, :] = h[:, :H]                # fwd output at time t
            ob_sc[(T - 1 - t) * B:(T - t) * B, :] = h[:, H:]      # bwd output at time T-1-t

    x = x_ref[...]                                                # (T*B, D), time-major

    # ---- layer 0: whole-sequence input projections (one matmul per direction) ----
    gxF_sc[...] = jnp.dot(x, w0F_ref[...], preferred_element_type=jnp.float32)
    gxB_sc[...] = jnp.dot(x, w0B_ref[...], preferred_element_type=jnp.float32)
    run_layer(whh0_ref[...], bhh0_ref[...], tb0_ref[...], of0_sc, ob0_sc)

    # ---- layer 1: [fwd | bwd] concat folded into split matmuls (never materialized) ----
    of0, ob0 = of0_sc[...], ob0_sc[...]
    gxF_sc[...] = (jnp.dot(of0, w1Fa_ref[...], preferred_element_type=jnp.float32)
                   + jnp.dot(ob0, w1Fb_ref[...], preferred_element_type=jnp.float32)
                   + b1F_ref[...])
    gxB_sc[...] = (jnp.dot(of0, w1Ba_ref[...], preferred_element_type=jnp.float32)
                   + jnp.dot(ob0, w1Bb_ref[...], preferred_element_type=jnp.float32)
                   + b1B_ref[...])
    run_layer(whh1_ref[...], bhh1_ref[...], None, of1_sc, ob1_sc)

    # ---- final FC on [fwd | bwd]; dropout is identity (eval forward) ----
    of1, ob1 = of1_sc[...], ob1_sc[...]
    o_ref[...] = (jnp.dot(of1, wfca_ref[...], preferred_element_type=jnp.float32)
                  + jnp.dot(ob1, wfcb_ref[...], preferred_element_type=jnp.float32)
                  + bfc_ref[...])


def bigru_forward(prepped, protein_input, time_input):
    B, T, D = protein_input.shape
    H, O, G = HIDDEN_DIM, OUTPUT_DIM, 6 * HIDDEN_DIM

    # Time-major flat layout: per-timestep rows are contiguous inside the kernel.
    x2d = jnp.transpose(protein_input.astype(jnp.float32), (1, 0, 2)).reshape(T * B, D)
    # Embedding gather from the precomputed (10, 6H) folded-bias table (tiny, per-call index).
    tb0 = prepped["tb0_table"][time_input[:, 0].astype(jnp.int32)]                # (B, 6H)

    vmem = pl.BlockSpec(memory_space=pltpu.MemorySpace.VMEM)
    args = (x2d, tb0,
            prepped["w0F"], prepped["w0B"], prepped["whh0"], prepped["bhh0"],
            prepped["w1Fa"], prepped["w1Fb"], prepped["b1F"],
            prepped["w1Ba"], prepped["w1Bb"], prepped["b1B"],
            prepped["whh1"], prepped["bhh1"],
            prepped["wfca"], prepped["wfcb"], prepped["bfc"])

    y2d = pl.pallas_call(
        _fused_bigru_kernel,
        out_shape=jax.ShapeDtypeStruct((T * B, O), jnp.float32),
        in_specs=[vmem] * len(args),
        out_specs=vmem,
        scratch_shapes=[
            pltpu.VMEM((T * B, G), jnp.float32),   # gxF (reused across layers)
            pltpu.VMEM((T * B, G), jnp.float32),   # gxB (reused across layers)
            pltpu.VMEM((T * B, H), jnp.float32),   # layer-0 fwd outputs
            pltpu.VMEM((T * B, H), jnp.float32),   # layer-0 bwd outputs
            pltpu.VMEM((T * B, H), jnp.float32),   # layer-1 fwd outputs
            pltpu.VMEM((T * B, H), jnp.float32),   # layer-1 bwd outputs
        ],
    )(*args)

    return jnp.transpose(y2d.reshape(T, B, O), (1, 0, 2))        # (B, T, O)


# ====================================== reference & setup ====================================

def init_params(key):
    keys = iter(jax.random.split(key, 32))

    def unif(shape, bound):
        return jax.random.uniform(next(keys), shape, jnp.float32, -bound, bound)

    p = {"time_emb": jax.random.normal(next(keys), (NUM_TIMESTEPS, TIME_EMB), jnp.float32)}
    bound = 1.0 / np.sqrt(HIDDEN_DIM)
    for l in range(NUM_LAYERS):
        in_size = (INPUT_DIM + TIME_EMB) if l == 0 else 2 * HIDDEN_DIM
        for suffix in ("", "_reverse"):
            p[f"w_ih_l{l}{suffix}"] = unif((3 * HIDDEN_DIM, in_size), bound)
            p[f"w_hh_l{l}{suffix}"] = unif((3 * HIDDEN_DIM, HIDDEN_DIM), bound)
            p[f"b_ih_l{l}{suffix}"] = unif((3 * HIDDEN_DIM,), bound)
            p[f"b_hh_l{l}{suffix}"] = unif((3 * HIDDEN_DIM,), bound)
    fc_bound = 1.0 / np.sqrt(2 * HIDDEN_DIM)
    p["w_fc"] = unif((OUTPUT_DIM, 2 * HIDDEN_DIM), fc_bound)
    p["b_fc"] = unif((OUTPUT_DIM,), fc_bound)
    return p


def reference_forward(params, protein_input, time_input):
    """Plain-JAX mirror of the PyTorch module (eval mode)."""
    B, T, D = protein_input.shape
    H, E = HIDDEN_DIM, TIME_EMB
    t_emb = params["time_emb"][time_input[:, 0].astype(jnp.int32)]
    t_rep = jnp.broadcast_to(t_emb[:, None, :], (B, T, E))
    x = jnp.concatenate([protein_input.astype(jnp.float32), t_rep], axis=-1)

    def run_dir(x, w_ih, w_hh, b_ih, b_hh, reverse):
        h = jnp.zeros((B, H), jnp.float32)
        order = range(T - 1, -1, -1) if reverse else range(T)
        outs = [None] * T
        for t in order:
            gi = x[:, t] @ w_ih.T + b_ih
            gh = h @ w_hh.T + b_hh
            r = jax.nn.sigmoid(gi[:, :H] + gh[:, :H])
            z = jax.nn.sigmoid(gi[:, H:2 * H] + gh[:, H:2 * H])
            n = jnp.tanh(gi[:, 2 * H:] + r * gh[:, 2 * H:])
            h = (1.0 - z) * n + z * h
            outs[t] = h
        return jnp.stack(outs, axis=1)

    for l in range(NUM_LAYERS):
        of = run_dir(x, params[f"w_ih_l{l}"], params[f"w_hh_l{l}"],
                     params[f"b_ih_l{l}"], params[f"b_hh_l{l}"], False)
        ob = run_dir(x, params[f"w_ih_l{l}_reverse"], params[f"w_hh_l{l}_reverse"],
                     params[f"b_ih_l{l}_reverse"], params[f"b_hh_l{l}_reverse"], True)
        x = jnp.concatenate([of, ob], axis=-1)
    return x @ params["w_fc"].T + params["b_fc"]


if __name__ == "__main__":
    key = jax.random.PRNGKey(0)
    kp, kx, kt = jax.random.split(key, 3)
    params = init_params(kp)
    protein_input = jax.random.normal(kx, (BATCH, MAX_SEQ_LEN, INPUT_DIM), jnp.float32)
    time_input = jax.random.randint(kt, (BATCH, 1), 0, NUM_TIMESTEPS)

    prepped = prepare_params(params)                      # one-time weight repacking
    out = jax.jit(bigru_forward)(prepped, protein_input, time_input)
    out = jax.block_until_ready(out)
    assert out.shape == (BATCH, MAX_SEQ_LEN, OUTPUT_DIM), out.shape

    ref = reference_forward(params, protein_input, time_input)
    np.testing.assert_allclose(np.asarray(out), np.asarray(ref), rtol=1e-3, atol=1e-3)

    print("KERNEL_OK")
</pallas_src>

<mosaic_0001>
module attributes {stable_mosaic.version = 11 : i64} {
  func.func @_fused_bigru_kernel(%arg0: memref<16x16xf32, #tpu.memory_space<vmem>>, %arg1: memref<2x192xf32, #tpu.memory_space<vmem>>, %arg2: memref<16x192xf32, #tpu.memory_space<vmem>>, %arg3: memref<16x192xf32, #tpu.memory_space<vmem>>, %arg4: memref<64x192xf32, #tpu.memory_space<vmem>>, %arg5: memref<1x192xf32, #tpu.memory_space<vmem>>, %arg6: memref<32x192xf32, #tpu.memory_space<vmem>>, %arg7: memref<32x192xf32, #tpu.memory_space<vmem>>, %arg8: memref<1x192xf32, #tpu.memory_space<vmem>>, %arg9: memref<32x192xf32, #tpu.memory_space<vmem>>, %arg10: memref<32x192xf32, #tpu.memory_space<vmem>>, %arg11: memref<1x192xf32, #tpu.memory_space<vmem>>, %arg12: memref<64x192xf32, #tpu.memory_space<vmem>>, %arg13: memref<1x192xf32, #tpu.memory_space<vmem>>, %arg14: memref<32x8xf32, #tpu.memory_space<vmem>>, %arg15: memref<32x8xf32, #tpu.memory_space<vmem>>, %arg16: memref<1x8xf32, #tpu.memory_space<vmem>>, %arg17: memref<16x8xf32, #tpu.memory_space<vmem>>, %arg18: memref<16x192xf32, #tpu.memory_space<vmem>>, %arg19: memref<16x192xf32, #tpu.memory_space<vmem>>, %arg20: memref<16x32xf32, #tpu.memory_space<vmem>>, %arg21: memref<16x32xf32, #tpu.memory_space<vmem>>, %arg22: memref<16x32xf32, #tpu.memory_space<vmem>>, %arg23: memref<16x32xf32, #tpu.memory_space<vmem>>) attributes {dimension_semantics = [], scalar_prefetch = 0 : i64, scratch_operands = 6 : i64, tpu.core_type = #tpu.core_type<tc>} {
    %c0 = arith.constant 0 : index
    %c0_0 = arith.constant 0 : index
    %0 = vector.load %arg0[%c0, %c0_0] : memref<16x16xf32, #tpu.memory_space<vmem>>, vector<16x16xf32>
    %c0_1 = arith.constant 0 : index
    %c0_2 = arith.constant 0 : index
    %1 = vector.load %arg2[%c0_1, %c0_2] : memref<16x192xf32, #tpu.memory_space<vmem>>, vector<16x192xf32>
    %cst = arith.constant dense<0.000000e+00> : vector<16x192xf32>
    %2 = tpu.matmul %0, %1, %cst {dimension_numbers = #tpu.dot_dimension_numbers<[1], [0], [0], [1], [0, 0, 1, 1], [], []>} : vector<16x16xf32>, vector<16x192xf32>, vector<16x192xf32> -> vector<16x192xf32>
    %c0_3 = arith.constant 0 : index
    %c0_4 = arith.constant 0 : index
    %3 = vector.load %arg18[%c0_3, %c0_4] : memref<16x192xf32, #tpu.memory_space<vmem>>, vector<16x192xf32>
    tpu.vector_store %arg18[%c0_3, %c0_4], %2 {strides = array<i32>} : memref<16x192xf32, #tpu.memory_space<vmem>>, vector<16x192xf32>,
    %c0_5 = arith.constant 0 : index
    %c0_6 = arith.constant 0 : index
    %4 = vector.load %arg3[%c0_5, %c0_6] : memref<16x192xf32, #tpu.memory_space<vmem>>, vector<16x192xf32>
    %cst_7 = arith.constant dense<0.000000e+00> : vector<16x192xf32>
    %5 = tpu.matmul %0, %4, %cst_7 {dimension_numbers = #tpu.dot_dimension_numbers<[1], [0], [0], [1], [0, 0, 1, 1], [], []>} : vector<16x16xf32>, vector<16x192xf32>, vector<16x192xf32> -> vector<16x192xf32>
    %c0_8 = arith.constant 0 : index
    %c0_9 = arith.constant 0 : index
    %6 = vector.load %arg19[%c0_8, %c0_9] : memref<16x192xf32, #tpu.memory_space<vmem>>, vector<16x192xf32>
    tpu.vector_store %arg19[%c0_8, %c0_9], %5 {strides = array<i32>} : memref<16x192xf32, #tpu.memory_space<vmem>>, vector<16x192xf32>,
    %c0_10 = arith.constant 0 : index
    %c0_11 = arith.constant 0 : index
    %7 = vector.load %arg4[%c0_10, %c0_11] : memref<64x192xf32, #tpu.memory_space<vmem>>, vector<64x192xf32>
    %c0_12 = arith.constant 0 : index
    %c0_13 = arith.constant 0 : index
    %8 = vector.load %arg5[%c0_12, %c0_13] : memref<1x192xf32, #tpu.memory_space<vmem>>, vector<1x192xf32>
    %c0_14 = arith.constant 0 : index
    %c0_15 = arith.constant 0 : index
    %9 = vector.load %arg1[%c0_14, %c0_15] : memref<2x192xf32, #tpu.memory_space<vmem>>, vector<2x192xf32>
    %cst_16 = arith.constant 0.000000e+00 : f32
    %10 = vector.broadcast %cst_16 : f32 to vector<2x64xf32>
    %c0_17 = arith.constant 0 : index
    %c0_18 = arith.constant 0 : index
    %11 = vector.load %arg18[%c0_17, %c0_18] : memref<16x192xf32, #tpu.memory_space<vmem>>, vector<2x192xf32>
    %c14 = arith.constant 14 : index
    %c0_19 = arith.constant 0 : index
    %12 = vector.load %arg19[%c14, %c0_19] : memref<16x192xf32, #tpu.memory_space<vmem>>, vector<2x192xf32>
    %13 = arith.addf %11, %12 : vector<2x192xf32>
    %14 = arith.addf %13, %9 : vector<2x192xf32>
    %cst_20 = arith.constant dense<0.000000e+00> : vector<2x192xf32>
    %15 = tpu.matmul %10, %7, %cst_20 {dimension_numbers = #tpu.dot_dimension_numbers<[1], [0], [0], [1], [0, 0, 1, 1], [], []>} : vector<2x64xf32>, vector<64x192xf32>, vector<2x192xf32> -> vector<2x192xf32>
    %16 = vector.broadcast %8 : vector<1x192xf32> to vector<2x192xf32>
    %17 = arith.addf %15, %16 : vector<2x192xf32>
    %18 = vector.extract_strided_slice %14 {offsets = [0, 0], sizes = [2, 64], strides = [1, 1]} : vector<2x192xf32> to vector<2x64xf32>
    %19 = vector.extract_strided_slice %17 {offsets = [0, 0], sizes = [2, 64], strides = [1, 1]} : vector<2x192xf32> to vector<2x64xf32>
    %20 = arith.addf %18, %19 : vector<2x64xf32>
    %21 = arith.negf %20 : vector<2x64xf32>
    %22 = math.exp %21 : vector<2x64xf32>
    %cst_21 = arith.constant 1.000000e+00 : f32
    %23 = vector.broadcast %cst_21 : f32 to vector<2x64xf32>
    %24 = arith.addf %23, %22 : vector<2x64xf32>
    %25 = arith.divf %23, %24 : vector<2x64xf32>
    %26 = vector.extract_strided_slice %14 {offsets = [0, 64], sizes = [2, 64], strides = [1, 1]} : vector<2x192xf32> to vector<2x64xf32>
    %27 = vector.extract_strided_slice %17 {offsets = [0, 64], sizes = [2, 64], strides = [1, 1]} : vector<2x192xf32> to vector<2x64xf32>
    %28 = arith.addf %26, %27 : vector<2x64xf32>
    %29 = arith.negf %28 : vector<2x64xf32>
    %30 = math.exp %29 : vector<2x64xf32>
    %cst_22 = arith.constant 1.000000e+00 : f32
    %31 = vector.broadcast %cst_22 : f32 to vector<2x64xf32>
    %32 = arith.addf %31, %30 : vector<2x64xf32>
    %33 = arith.divf %31, %32 : vector<2x64xf32>
    %34 = vector.extract_strided_slice %14 {offsets = [0, 128], sizes = [2, 64], strides = [1, 1]} : vector<2x192xf32> to vector<2x64xf32>
    %35 = vector.extract_strided_slice %17 {offsets = [0, 128], sizes = [2, 64], strides = [1, 1]} : vector<2x192xf32> to vector<2x64xf32>
    %36 = arith.mulf %25, %35 : vector<2x64xf32>
    %37 = arith.addf %34, %36 : vector<2x64xf32>
    %38 = math.tanh %37 : vector<2x64xf32>
    %cst_23 = arith.constant 1.000000e+00 : f32
    %39 = vector.broadcast %cst_23 : f32 to vector<2x64xf32>
    %40 = arith.subf %39, %33 : vector<2x64xf32>
    %41 = arith.mulf %40, %38 : vector<2x64xf32>
    %42 = arith.mulf %33, %10 : vector<2x64xf32>
    %43 = arith.addf %41, %42 : vector<2x64xf32>
    %44 = vector.extract_strided_slice %43 {offsets = [0, 0], sizes = [2, 32], strides = [1, 1]} : vector<2x64xf32> to vector<2x32xf32>
    %c0_24 = arith.constant 0 : index
    %c0_25 = arith.constant 0 : index
    %45 = vector.load %arg20[%c0_24, %c0_25] : memref<16x32xf32, #tpu.memory_space<vmem>>, vector<2x32xf32>
    tpu.vector_store %arg20[%c0_24, %c0_25], %44 {strides = array<i32>} : memref<16x32xf32, #tpu.memory_space<vmem>>, vector<2x32xf32>,
    %46 = vector.extract_strided_slice %43 {offsets = [0, 32], sizes = [2, 32], strides = [1, 1]} : vector<2x64xf32> to vector<2x32xf32>
    %c14_26 = arith.constant 14 : index
    %c0_27 = arith.constant 0 : index
    %47 = vector.load %arg21[%c14_26, %c0_27] : memref<16x32xf32, #tpu.memory_space<vmem>>, vector<2x32xf32>
    tpu.vector_store %arg21[%c14_26, %c0_27], %46 {strides = array<i32>} : memref<16x32xf32, #tpu.memory_space<vmem>>, vector<2x32xf32>,
    %c2 = arith.constant 2 : index
    %c0_28 = arith.constant 0 : index
    %48 = vector.load %arg18[%c2, %c0_28] : memref<16x192xf32, #tpu.memory_space<vmem>>, vector<2x192xf32>
    %c12 = arith.constant 12 : index
    %c0_29 = arith.constant 0 : index
    %49 = vector.load %arg19[%c12, %c0_29] : memref<16x192xf32, #tpu.memory_space<vmem>>, vector<2x192xf32>
    %50 = arith.addf %48, %49 : vector<2x192xf32>
    %51 = arith.addf %50, %9 : vector<2x192xf32>
    %cst_30 = arith.constant dense<0.000000e+00> : vector<2x192xf32>
    %52 = tpu.matmul %43, %7, %cst_30 {dimension_numbers = #tpu.dot_dimension_numbers<[1], [0], [0], [1], [0, 0, 1, 1], [], []>} : vector<2x64xf32>, vector<64x192xf32>, vector<2x192xf32> -> vector<2x192xf32>
    %53 = vector.broadcast %8 : vector<1x192xf32> to vector<2x192xf32>
    %54 = arith.addf %52, %53 : vector<2x192xf32>
    %55 = vector.extract_strided_slice %51 {offsets = [0, 0], sizes = [2, 64], strides = [1, 1]} : vector<2x192xf32> to vector<2x64xf32>
    %56 = vector.extract_strided_slice %54 {offsets = [0, 0], sizes = [2, 64], strides = [1, 1]} : vector<2x192xf32> to vector<2x64xf32>
    %57 = arith.addf %55, %56 : vector<2x64xf32>
    %58 = arith.negf %57 : vector<2x64xf32>
    %59 = math.exp %58 : vector<2x64xf32>
    %cst_31 = arith.constant 1.000000e+00 : f32
    %60 = vector.broadcast %cst_31 : f32 to vector<2x64xf32>
    %61 = arith.addf %60, %59 : vector<2x64xf32>
    %62 = arith.divf %60, %61 : vector<2x64xf32>
    %63 = vector.extract_strided_slice %51 {offsets = [0, 64], sizes = [2, 64], strides = [1, 1]} : vector<2x192xf32> to vector<2x64xf32>
    %64 = vector.extract_strided_slice %54 {offsets = [0, 64], sizes = [2, 64], strides = [1, 1]} : vector<2x192xf32> to vector<2x64xf32>
    %65 = arith.addf %63, %64 : vector<2x64xf32>
    %66 = arith.negf %65 : vector<2x64xf32>
    %67 = math.exp %66 : vector<2x64xf32>
    %cst_32 = arith.constant 1.000000e+00 : f32
    %68 = vector.broadcast %cst_32 : f32 to vector<2x64xf32>
    %69 = arith.addf %68, %67 : vector<2x64xf32>
    %70 = arith.divf %68, %69 : vector<2x64xf32>
    %71 = vector.extract_strided_slice %51 {offsets = [0, 128], sizes = [2, 64], strides = [1, 1]} : vector<2x192xf32> to vector<2x64xf32>
    %72 = vector.extract_strided_slice %54 {offsets = [0, 128], sizes = [2, 64], strides = [1, 1]} : vector<2x192xf32> to vector<2x64xf32>
    %73 = arith.mulf %62, %72 : vector<2x64xf32>
    %74 = arith.addf %71, %73 : vector<2x64xf32>
    %75 = math.tanh %74 : vector<2x64xf32>
    %cst_33 = arith.constant 1.000000e+00 : f32
    %76 = vector.broadcast %cst_33 : f32 to vector<2x64xf32>
    %77 = arith.subf %76, %70 : vector<2x64xf32>
    %78 = arith.mulf %77, %75 : vector<2x64xf32>
    %79 = arith.mulf %70, %43 : vector<2x64xf32>
    %80 = arith.addf %78, %79 : vector<2x64xf32>
    %81 = vector.extract_strided_slice %80 {offsets = [0, 0], sizes = [2, 32], strides = [1, 1]} : vector<2x64xf32> to vector<2x32xf32>
    %c2_34 = arith.constant 2 : index
    %c0_35 = arith.constant 0 : index
    %82 = vector.load %arg20[%c2_34, %c0_35] : memref<16x32xf32, #tpu.memory_space<vmem>>, vector<2x32xf32>
    tpu.vector_store %arg20[%c2_34, %c0_35], %81 {strides = array<i32>} : memref<16x32xf32, #tpu.memory_space<vmem>>, vector<2x32xf32>,
    %83 = vector.extract_strided_slice %80 {offsets = [0, 32], sizes = [2, 32], strides = [1, 1]} : vector<2x64xf32> to vector<2x32xf32>
    %c12_36 = arith.constant 12 : index
    %c0_37 = arith.constant 0 : index
    %84 = vector.load %arg21[%c12_36, %c0_37] : memref<16x32xf32, #tpu.memory_space<vmem>>, vector<2x32xf32>
    tpu.vector_store %arg21[%c12_36, %c0_37], %83 {strides = array<i32>} : memref<16x32xf32, #tpu.memory_space<vmem>>, vector<2x32xf32>,
    %c4 = arith.constant 4 : index
    %c0_38 = arith.constant 0 : index
    %85 = vector.load %arg18[%c4, %c0_38] : memref<16x192xf32, #tpu.memory_space<vmem>>, vector<2x192xf32>
    %c10 = arith.constant 10 : index
    %c0_39 = arith.constant 0 : index
    %86 = vector.load %arg19[%c10, %c0_39] : memref<16x192xf32, #tpu.memory_space<vmem>>, vector<2x192xf32>
    %87 = arith.addf %85, %86 : vector<2x192xf32>
    %88 = arith.addf %87, %9 : vector<2x192xf32>
    %cst_40 = arith.constant dense<0.000000e+00> : vector<2x192xf32>
    %89 = tpu.matmul %80, %7, %cst_40 {dimension_numbers = #tpu.dot_dimension_numbers<[1], [0], [0], [1], [0, 0, 1, 1], [], []>} : vector<2x64xf32>, vector<64x192xf32>, vector<2x192xf32> -> vector<2x192xf32>
    %90 = vector.broadcast %8 : vector<1x192xf32> to vector<2x192xf32>
    %91 = arith.addf %89, %90 : vector<2x192xf32>
    %92 = vector.extract_strided_slice %88 {offsets = [0, 0], sizes = [2, 64], strides = [1, 1]} : vector<2x192xf32> to vector<2x64xf32>
    %93 = vector.extract_strided_slice %91 {offsets = [0, 0], sizes = [2, 64], strides = [1, 1]} : vector<2x192xf32> to vector<2x64xf32>
    %94 = arith.addf %92, %93 : vector<2x64xf32>
    %95 = arith.negf %94 : vector<2x64xf32>
    %96 = math.exp %95 : vector<2x64xf32>
    %cst_41 = arith.constant 1.000000e+00 : f32
    %97 = vector.broadcast %cst_41 : f32 to vector<2x64xf32>
    %98 = arith.addf %97, %96 : vector<2x64xf32>
    %99 = arith.divf %97, %98 : vector<2x64xf32>
    %100 = vector.extract_strided_slice %88 {offsets = [0, 64], sizes = [2, 64], strides = [1, 1]} : vector<2x192xf32> to vector<2x64xf32>
    %101 = vector.extract_strided_slice %91 {offsets = [0, 64], sizes = [2, 64], strides = [1, 1]} : vector<2x192xf32> to vector<2x64xf32>
    %102 = arith.addf %100, %101 : vector<2x64xf32>
    %103 = arith.negf %102 : vector<2x64xf32>
    %104 = math.exp %103 : vector<2x64xf32>
    %cst_42 = arith.constant 1.000000e+00 : f32
    %105 = vector.broadcast %cst_42 : f32 to vector<2x64xf32>
    %106 = arith.addf %105, %104 : vector<2x64xf32>
    %107 = arith.divf %105, %106 : vector<2x64xf32>
    %108 = vector.extract_strided_slice %88 {offsets = [0, 128], sizes = [2, 64], strides = [1, 1]} : vector<2x192xf32> to vector<2x64xf32>
    %109 = vector.extract_strided_slice %91 {offsets = [0, 128], sizes = [2, 64], strides = [1, 1]} : vector<2x192xf32> to vector<2x64xf32>
    %110 = arith.mulf %99, %109 : vector<2x64xf32>
    %111 = arith.addf %108, %110 : vector<2x64xf32>
    %112 = math.tanh %111 : vector<2x64xf32>
    %cst_43 = arith.constant 1.000000e+00 : f32
    %113 = vector.broadcast %cst_43 : f32 to vector<2x64xf32>
    %114 = arith.subf %113, %107 : vector<2x64xf32>
    %115 = arith.mulf %114, %112 : vector<2x64xf32>
    %116 = arith.mulf %107, %80 : vector<2x64xf32>
    %117 = arith.addf %115, %116 : vector<2x64xf32>
    %118 = vector.extract_strided_slice %117 {offsets = [0, 0], sizes = [2, 32], strides = [1, 1]} : vector<2x64xf32> to vector<2x32xf32>
    %c4_44 = arith.constant 4 : index
    %c0_45 = arith.constant 0 : index
    %119 = vector.load %arg20[%c4_44, %c0_45] : memref<16x32xf32, #tpu.memory_space<vmem>>, vector<2x32xf32>
    tpu.vector_store %arg20[%c4_44, %c0_45], %118 {strides = array<i32>} : memref<16x32xf32, #tpu.memory_space<vmem>>, vector<2x32xf32>,
    %120 = vector.extract_strided_slice %117 {offsets = [0, 32], sizes = [2, 32], strides = [1, 1]} : vector<2x64xf32> to vector<2x32xf32>
    %c10_46 = arith.constant 10 : index
    %c0_47 = arith.constant 0 : index
    %121 = vector.load %arg21[%c10_46, %c0_47] : memref<16x32xf32, #tpu.memory_space<vmem>>, vector<2x32xf32>
    tpu.vector_store %arg21[%c10_46, %c0_47], %120 {strides = array<i32>} : memref<16x32xf32, #tpu.memory_space<vmem>>, vector<2x32xf32>,
    %c6 = arith.constant 6 : index
    %c0_48 = arith.constant 0 : index
    %122 = vector.load %arg18[%c6, %c0_48] : memref<16x192xf32, #tpu.memory_space<vmem>>, vector<2x192xf32>
    %c8 = arith.constant 8 : index
    %c0_49 = arith.constant 0 : index
    %123 = vector.load %arg19[%c8, %c0_49] : memref<16x192xf32, #tpu.memory_space<vmem>>, vector<2x192xf32>
    %124 = arith.addf %122, %123 : vector<2x192xf32>
    %125 = arith.addf %124, %9 : vector<2x192xf32>
    %cst_50 = arith.constant dense<0.000000e+00> : vector<2x192xf32>
    %126 = tpu.matmul %117, %7, %cst_50 {dimension_numbers = #tpu.dot_dimension_numbers<[1], [0], [0], [1], [0, 0, 1, 1], [], []>} : vector<2x64xf32>, vector<64x192xf32>, vector<2x192xf32> -> vector<2x192xf32>
    %127 = vector.broadcast %8 : vector<1x192xf32> to vector<2x192xf32>
    %128 = arith.addf %126, %127 : vector<2x192xf32>
    %129 = vector.extract_strided_slice %125 {offsets = [0, 0], sizes = [2, 64], strides = [1, 1]} : vector<2x192xf32> to vector<2x64xf32>
    %130 = vector.extract_strided_slice %128 {offsets = [0, 0], sizes = [2, 64], strides = [1, 1]} : vector<2x192xf32> to vector<2x64xf32>
    %131 = arith.addf %129, %130 : vector<2x64xf32>
    %132 = arith.negf %131 : vector<2x64xf32>
    %133 = math.exp %132 : vector<2x64xf32>
    %cst_51 = arith.constant 1.000000e+00 : f32
    %134 = vector.broadcast %cst_51 : f32 to vector<2x64xf32>
    %135 = arith.addf %134, %133 : vector<2x64xf32>
    %136 = arith.divf %134, %135 : vector<2x64xf32>
    %137 = vector.extract_strided_slice %125 {offsets = [0, 64], sizes = [2, 64], strides = [1, 1]} : vector<2x192xf32> to vector<2x64xf32>
    %138 = vector.extract_strided_slice %128 {offsets = [0, 64], sizes = [2, 64], strides = [1, 1]} : vector<2x192xf32> to vector<2x64xf32>
    %139 = arith.addf %137, %138 : vector<2x64xf32>
    %140 = arith.negf %139 : vector<2x64xf32>
    %141 = math.exp %140 : vector<2x64xf32>
    %cst_52 = arith.constant 1.000000e+00 : f32
    %142 = vector.broadcast %cst_52 : f32 to vector<2x64xf32>
    %143 = arith.addf %142, %141 : vector<2x64xf32>
    %144 = arith.divf %142, %143 : vector<2x64xf32>
    %145 = vector.extract_strided_slice %125 {offsets = [0, 128], sizes = [2, 64], strides = [1, 1]} : vector<2x192xf32> to vector<2x64xf32>
    %146 = vector.extract_strided_slice %128 {offsets = [0, 128], sizes = [2, 64], strides = [1, 1]} : vector<2x192xf32> to vector<2x64xf32>
    %147 = arith.mulf %136, %146 : vector<2x64xf32>
    %148 = arith.addf %145, %147 : vector<2x64xf32>
    %149 = math.tanh %148 : vector<2x64xf32>
    %cst_53 = arith.constant 1.000000e+00 : f32
    %150 = vector.broadcast %cst_53 : f32 to vector<2x64xf32>
    %151 = arith.subf %150, %144 : vector<2x64xf32>
    %152 = arith.mulf %151, %149 : vector<2x64xf32>
    %153 = arith.mulf %144, %117 : vector<2x64xf32>
    %154 = arith.addf %152, %153 : vector<2x64xf32>
    %155 = vector.extract_strided_slice %154 {offsets = [0, 0], sizes = [2, 32], strides = [1, 1]} : vector<2x64xf32> to vector<2x32xf32>
    %c6_54 = arith.constant 6 : index
    %c0_55 = arith.constant 0 : index
    %156 = vector.load %arg20[%c6_54, %c0_55] : memref<16x32xf32, #tpu.memory_space<vmem>>, vector<2x32xf32>
    tpu.vector_store %arg20[%c6_54, %c0_55], %155 {strides = array<i32>} : memref<16x32xf32, #tpu.memory_space<vmem>>, vector<2x32xf32>,
    %157 = vector.extract_strided_slice %154 {offsets = [0, 32], sizes = [2, 32], strides = [1, 1]} : vector<2x64xf32> to vector<2x32xf32>
    %c8_56 = arith.constant 8 : index
    %c0_57 = arith.constant 0 : index
    %158 = vector.load %arg21[%c8_56, %c0_57] : memref<16x32xf32, #tpu.memory_space<vmem>>, vector<2x32xf32>
    tpu.vector_store %arg21[%c8_56, %c0_57], %157 {strides = array<i32>} : memref<16x32xf32, #tpu.memory_space<vmem>>, vector<2x32xf32>,
    %c8_58 = arith.constant 8 : index
    %c0_59 = arith.constant 0 : index
    %159 = vector.load %arg18[%c8_58, %c0_59] : memref<16x192xf32, #tpu.memory_space<vmem>>, vector<2x192xf32>
    %c6_60 = arith.constant 6 : index
    %c0_61 = arith.constant 0 : index
    %160 = vector.load %arg19[%c6_60, %c0_61] : memref<16x192xf32, #tpu.memory_space<vmem>>, vector<2x192xf32>
    %161 = arith.addf %159, %160 : vector<2x192xf32>
    %162 = arith.addf %161, %9 : vector<2x192xf32>
    %cst_62 = arith.constant dense<0.000000e+00> : vector<2x192xf32>
    %163 = tpu.matmul %154, %7, %cst_62 {dimension_numbers = #tpu.dot_dimension_numbers<[1], [0], [0], [1], [0, 0, 1, 1], [], []>} : vector<2x64xf32>, vector<64x192xf32>, vector<2x192xf32> -> vector<2x192xf32>
    %164 = vector.broadcast %8 : vector<1x192xf32> to vector<2x192xf32>
    %165 = arith.addf %163, %164 : vector<2x192xf32>
    %166 = vector.extract_strided_slice %162 {offsets = [0, 0], sizes = [2, 64], strides = [1, 1]} : vector<2x192xf32> to vector<2x64xf32>
    %167 = vector.extract_strided_slice %165 {offsets = [0, 0], sizes = [2, 64], strides = [1, 1]} : vector<2x192xf32> to vector<2x64xf32>
    %168 = arith.addf %166, %167 : vector<2x64xf32>
    %169 = arith.negf %168 : vector<2x64xf32>
    %170 = math.exp %169 : vector<2x64xf32>
    %cst_63 = arith.constant 1.000000e+00 : f32
    %171 = vector.broadcast %cst_63 : f32 to vector<2x64xf32>
    %172 = arith.addf %171, %170 : vector<2x64xf32>
    %173 = arith.divf %171, %172 : vector<2x64xf32>
    %174 = vector.extract_strided_slice %162 {offsets = [0, 64], sizes = [2, 64], strides = [1, 1]} : vector<2x192xf32> to vector<2x64xf32>
    %175 = vector.extract_strided_slice %165 {offsets = [0, 64], sizes = [2, 64], strides = [1, 1]} : vector<2x192xf32> to vector<2x64xf32>
    %176 = arith.addf %174, %175 : vector<2x64xf32>
    %177 = arith.negf %176 : vector<2x64xf32>
    %178 = math.exp %177 : vector<2x64xf32>
    %cst_64 = arith.constant 1.000000e+00 : f32
    %179 = vector.broadcast %cst_64 : f32 to vector<2x64xf32>
    %180 = arith.addf %179, %178 : vector<2x64xf32>
    %181 = arith.divf %179, %180 : vector<2x64xf32>
    %182 = vector.extract_strided_slice %162 {offsets = [0, 128], sizes = [2, 64], strides = [1, 1]} : vector<2x192xf32> to vector<2x64xf32>
    %183 = vector.extract_strided_slice %165 {offsets = [0, 128], sizes = [2, 64], strides = [1, 1]} : vector<2x192xf32> to vector<2x64xf32>
    %184 = arith.mulf %173, %183 : vector<2x64xf32>
    %185 = arith.addf %182, %184 : vector<2x64xf32>
    %186 = math.tanh %185 : vector<2x64xf32>
    %cst_65 = arith.constant 1.000000e+00 : f32
    %187 = vector.broadcast %cst_65 : f32 to vector<2x64xf32>
    %188 = arith.subf %187, %181 : vector<2x64xf32>
    %189 = arith.mulf %188, %186 : vector<2x64xf32>
    %190 = arith.mulf %181, %154 : vector<2x64xf32>
    %191 = arith.addf %189, %190 : vector<2x64xf32>
    %192 = vector.extract_strided_slice %191 {offsets = [0, 0], sizes = [2, 32], strides = [1, 1]} : vector<2x64xf32> to vector<2x32xf32>
    %c8_66 = arith.constant 8 : index
    %c0_67 = arith.constant 0 : index
    %193 = vector.load %arg20[%c8_66, %c0_67] : memref<16x32xf32, #tpu.memory_space<vmem>>, vector<2x32xf32>
    tpu.vector_store %arg20[%c8_66, %c0_67], %192 {strides = array<i32>} : memref<16x32xf32, #tpu.memory_space<vmem>>, vector<2x32xf32>,
    %194 = vector.extract_strided_slice %191 {offsets = [0, 32], sizes = [2, 32], strides = [1, 1]} : vector<2x64xf32> to vector<2x32xf32>
    %c6_68 = arith.constant 6 : index
    %c0_69 = arith.constant 0 : index
    %195 = vector.load %arg21[%c6_68, %c0_69] : memref<16x32xf32, #tpu.memory_space<vmem>>, vector<2x32xf32>
    tpu.vector_store %arg21[%c6_68, %c0_69], %194 {strides = array<i32>} : memref<16x32xf32, #tpu.memory_space<vmem>>, vector<2x32xf32>,
    %c10_70 = arith.constant 10 : index
    %c0_71 = arith.constant 0 : index
    %196 = vector.load %arg18[%c10_70, %c0_71] : memref<16x192xf32, #tpu.memory_space<vmem>>, vector<2x192xf32>
    %c4_72 = arith.constant 4 : index
    %c0_73 = arith.constant 0 : index
    %197 = vector.load %arg19[%c4_72, %c0_73] : memref<16x192xf32, #tpu.memory_space<vmem>>, vector<2x192xf32>
    %198 = arith.addf %196, %197 : vector<2x192xf32>
    %199 = arith.addf %198, %9 : vector<2x192xf32>
    %cst_74 = arith.constant dense<0.000000e+00> : vector<2x192xf32>
    %200 = tpu.matmul %191, %7, %cst_74 {dimension_numbers = #tpu.dot_dimension_numbers<[1], [0], [0], [1], [0, 0, 1, 1], [], []>} : vector<2x64xf32>, vector<64x192xf32>, vector<2x192xf32> -> vector<2x192xf32>
    %201 = vector.broadcast %8 : vector<1x192xf32> to vector<2x192xf32>
    %202 = arith.addf %200, %201 : vector<2x192xf32>
    %203 = vector.extract_strided_slice %199 {offsets = [0, 0], sizes = [2, 64], strides = [1, 1]} : vector<2x192xf32> to vector<2x64xf32>
    %204 = vector.extract_strided_slice %202 {offsets = [0, 0], sizes = [2, 64], strides = [1, 1]} : vector<2x192xf32> to vector<2x64xf32>
    %205 = arith.addf %203, %204 : vector<2x64xf32>
    %206 = arith.negf %205 : vector<2x64xf32>
    %207 = math.exp %206 : vector<2x64xf32>
    %cst_75 = arith.constant 1.000000e+00 : f32
    %208 = vector.broadcast %cst_75 : f32 to vector<2x64xf32>
    %209 = arith.addf %208, %207 : vector<2x64xf32>
    %210 = arith.divf %208, %209 : vector<2x64xf32>
    %211 = vector.extract_strided_slice %199 {offsets = [0, 64], sizes = [2, 64], strides = [1, 1]} : vector<2x192xf32> to vector<2x64xf32>
    %212 = vector.extract_strided_slice %202 {offsets = [0, 64], sizes = [2, 64], strides = [1, 1]} : vector<2x192xf32> to vector<2x64xf32>
    %213 = arith.addf %211, %212 : vector<2x64xf32>
    %214 = arith.negf %213 : vector<2x64xf32>
    %215 = math.exp %214 : vector<2x64xf32>
    %cst_76 = arith.constant 1.000000e+00 : f32
    %216 = vector.broadcast %cst_76 : f32 to vector<2x64xf32>
    %217 = arith.addf %216, %215 : vector<2x64xf32>
    %218 = arith.divf %216, %217 : vector<2x64xf32>
    %219 = vector.extract_strided_slice %199 {offsets = [0, 128], sizes = [2, 64], strides = [1, 1]} : vector<2x192xf32> to vector<2x64xf32>
    %220 = vector.extract_strided_slice %202 {offsets = [0, 128], sizes = [2, 64], strides = [1, 1]} : vector<2x192xf32> to vector<2x64xf32>
    %221 = arith.mulf %210, %220 : vector<2x64xf32>
    %222 = arith.addf %219, %221 : vector<2x64xf32>
    %223 = math.tanh %222 : vector<2x64xf32>
    %cst_77 = arith.constant 1.000000e+00 : f32
    %224 = vector.broadcast %cst_77 : f32 to vector<2x64xf32>
    %225 = arith.subf %224, %218 : vector<2x64xf32>
    %226 = arith.mulf %225, %223 : vector<2x64xf32>
    %227 = arith.mulf %218, %191 : vector<2x64xf32>
    %228 = arith.addf %226, %227 : vector<2x64xf32>
    %229 = vector.extract_strided_slice %228 {offsets = [0, 0], sizes = [2, 32], strides = [1, 1]} : vector<2x64xf32> to vector<2x32xf32>
    %c10_78 = arith.constant 10 : index
    %c0_79 = arith.constant 0 : index
    %230 = vector.load %arg20[%c10_78, %c0_79] : memref<16x32xf32, #tpu.memory_space<vmem>>, vector<2x32xf32>
    tpu.vector_store %arg20[%c10_78, %c0_79], %229 {strides = array<i32>} : memref<16x32xf32, #tpu.memory_space<vmem>>, vector<2x32xf32>,
    %231 = vector.extract_strided_slice %228 {offsets = [0, 32], sizes = [2, 32], strides = [1, 1]} : vector<2x64xf32> to vector<2x32xf32>
    %c4_80 = arith.constant 4 : index
    %c0_81 = arith.constant 0 : index
    %232 = vector.load %arg21[%c4_80, %c0_81] : memref<16x32xf32, #tpu.memory_space<vmem>>, vector<2x32xf32>
    tpu.vector_store %arg21[%c4_80, %c0_81], %231 {strides = array<i32>} : memref<16x32xf32, #tpu.memory_space<vmem>>, vector<2x32xf32>,
    %c12_82 = arith.constant 12 : index
    %c0_83 = arith.constant 0 : index
    %233 = vector.load %arg18[%c12_82, %c0_83] : memref<16x192xf32, #tpu.memory_space<vmem>>, vector<2x192xf32>
    %c2_84 = arith.constant 2 : index
    %c0_85 = arith.constant 0 : index
    %234 = vector.load %arg19[%c2_84, %c0_85] : memref<16x192xf32, #tpu.memory_space<vmem>>, vector<2x192xf32>
    %235 = arith.addf %233, %234 : vector<2x192xf32>
    %236 = arith.addf %235, %9 : vector<2x192xf32>
    %cst_86 = arith.constant dense<0.000000e+00> : vector<2x192xf32>
    %237 = tpu.matmul %228, %7, %cst_86 {dimension_numbers = #tpu.dot_dimension_numbers<[1], [0], [0], [1], [0, 0, 1, 1], [], []>} : vector<2x64xf32>, vector<64x192xf32>, vector<2x192xf32> -> vector<2x192xf32>
    %238 = vector.broadcast %8 : vector<1x192xf32> to vector<2x192xf32>
    %239 = arith.addf %237, %238 : vector<2x192xf32>
    %240 = vector.extract_strided_slice %236 {offsets = [0, 0], sizes = [2, 64], strides = [1, 1]} : vector<2x192xf32> to vector<2x64xf32>
    %241 = vector.extract_strided_slice %239 {offsets = [0, 0], sizes = [2, 64], strides = [1, 1]} : vector<2x192xf32> to vector<2x64xf32>
    %242 = arith.addf %240, %241 : vector<2x64xf32>
    %243 = arith.negf %242 : vector<2x64xf32>
    %244 = math.exp %243 : vector<2x64xf32>
    %cst_87 = arith.constant 1.000000e+00 : f32
    %245 = vector.broadcast %cst_87 : f32 to vector<2x64xf32>
    %246 = arith.addf %245, %244 : vector<2x64xf32>
    %247 = arith.divf %245, %246 : vector<2x64xf32>
    %248 = vector.extract_strided_slice %236 {offsets = [0, 64], sizes = [2, 64], strides = [1, 1]} : vector<2x192xf32> to vector<2x64xf32>
    %249 = vector.extract_strided_slice %239 {offsets = [0, 64], sizes = [2, 64], strides = [1, 1]} : vector<2x192xf32> to vector<2x64xf32>
    %250 = arith.addf %248, %249 : vector<2x64xf32>
    %251 = arith.negf %250 : vector<2x64xf32>
    %252 = math.exp %251 : vector<2x64xf32>
    %cst_88 = arith.constant 1.000000e+00 : f32
    %253 = vector.broadcast %cst_88 : f32 to vector<2x64xf32>
    %254 = arith.addf %253, %252 : vector<2x64xf32>
    %255 = arith.divf %253, %254 : vector<2x64xf32>
    %256 = vector.extract_strided_slice %236 {offsets = [0, 128], sizes = [2, 64], strides = [1, 1]} : vector<2x192xf32> to vector<2x64xf32>
    %257 = vector.extract_strided_slice %239 {offsets = [0, 128], sizes = [2, 64], strides = [1, 1]} : vector<2x192xf32> to vector<2x64xf32>
    %258 = arith.mulf %247, %257 : vector<2x64xf32>
    %259 = arith.addf %256, %258 : vector<2x64xf32>
    %260 = math.tanh %259 : vector<2x64xf32>
    %cst_89 = arith.constant 1.000000e+00 : f32
    %261 = vector.broadcast %cst_89 : f32 to vector<2x64xf32>
    %262 = arith.subf %261, %255 : vector<2x64xf32>
    %263 = arith.mulf %262, %260 : vector<2x64xf32>
    %264 = arith.mulf %255, %228 : vector<2x64xf32>
    %265 = arith.addf %263, %264 : vector<2x64xf32>
    %266 = vector.extract_strided_slice %265 {offsets = [0, 0], sizes = [2, 32], strides = [1, 1]} : vector<2x64xf32> to vector<2x32xf32>
    %c12_90 = arith.constant 12 : index
    %c0_91 = arith.constant 0 : index
    %267 = vector.load %arg20[%c12_90, %c0_91] : memref<16x32xf32, #tpu.memory_space<vmem>>, vector<2x32xf32>
    tpu.vector_store %arg20[%c12_90, %c0_91], %266 {strides = array<i32>} : memref<16x32xf32, #tpu.memory_space<vmem>>, vector<2x32xf32>,
    %268 = vector.extract_strided_slice %265 {offsets = [0, 32], sizes = [2, 32], strides = [1, 1]} : vector<2x64xf32> to vector<2x32xf32>
    %c2_92 = arith.constant 2 : index
    %c0_93 = arith.constant 0 : index
    %269 = vector.load %arg21[%c2_92, %c0_93] : memref<16x32xf32, #tpu.memory_space<vmem>>, vector<2x32xf32>
    tpu.vector_store %arg21[%c2_92, %c0_93], %268 {strides = array<i32>} : memref<16x32xf32, #tpu.memory_space<vmem>>, vector<2x32xf32>,
    %c14_94 = arith.constant 14 : index
    %c0_95 = arith.constant 0 : index
    %270 = vector.load %arg18[%c14_94, %c0_95] : memref<16x192xf32, #tpu.memory_space<vmem>>, vector<2x192xf32>
    %c0_96 = arith.constant 0 : index
    %c0_97 = arith.constant 0 : index
    %271 = vector.load %arg19[%c0_96, %c0_97] : memref<16x192xf32, #tpu.memory_space<vmem>>, vector<2x192xf32>
    %272 = arith.addf %270, %271 : vector<2x192xf32>
    %273 = arith.addf %272, %9 : vector<2x192xf32>
    %cst_98 = arith.constant dense<0.000000e+00> : vector<2x192xf32>
    %274 = tpu.matmul %265, %7, %cst_98 {dimension_numbers = #tpu.dot_dimension_numbers<[1], [0], [0], [1], [0, 0, 1, 1], [], []>} : vector<2x64xf32>, vector<64x192xf32>, vector<2x192xf32> -> vector<2x192xf32>
    %275 = vector.broadcast %8 : vector<1x192xf32> to vector<2x192xf32>
    %276 = arith.addf %274, %275 : vector<2x192xf32>
    %277 = vector.extract_strided_slice %273 {offsets = [0, 0], sizes = [2, 64], strides = [1, 1]} : vector<2x192xf32> to vector<2x64xf32>
    %278 = vector.extract_strided_slice %276 {offsets = [0, 0], sizes = [2, 64], strides = [1, 1]} : vector<2x192xf32> to vector<2x64xf32>
    %279 = arith.addf %277, %278 : vector<2x64xf32>
    %280 = arith.negf %279 : vector<2x64xf32>
    %281 = math.exp %280 : vector<2x64xf32>
    %cst_99 = arith.constant 1.000000e+00 : f32
    %282 = vector.broadcast %cst_99 : f32 to vector<2x64xf32>
    %283 = arith.addf %282, %281 : vector<2x64xf32>
    %284 = arith.divf %282, %283 : vector<2x64xf32>
    %285 = vector.extract_strided_slice %273 {offsets = [0, 64], sizes = [2, 64], strides = [1, 1]} : vector<2x192xf32> to vector<2x64xf32>
    %286 = vector.extract_strided_slice %276 {offsets = [0, 64], sizes = [2, 64], strides = [1, 1]} : vector<2x192xf32> to vector<2x64xf32>
    %287 = arith.addf %285, %286 : vector<2x64xf32>
    %288 = arith.negf %287 : vector<2x64xf32>
    %289 = math.exp %288 : vector<2x64xf32>
    %cst_100 = arith.constant 1.000000e+00 : f32
    %290 = vector.broadcast %cst_100 : f32 to vector<2x64xf32>
    %291 = arith.addf %290, %289 : vector<2x64xf32>
    %292 = arith.divf %290, %291 : vector<2x64xf32>
    %293 = vector.extract_strided_slice %273 {offsets = [0, 128], sizes = [2, 64], strides = [1, 1]} : vector<2x192xf32> to vector<2x64xf32>
    %294 = vector.extract_strided_slice %276 {offsets = [0, 128], sizes = [2, 64], strides = [1, 1]} : vector<2x192xf32> to vector<2x64xf32>
    %295 = arith.mulf %284, %294 : vector<2x64xf32>
    %296 = arith.addf %293, %295 : vector<2x64xf32>
    %297 = math.tanh %296 : vector<2x64xf32>
    %cst_101 = arith.constant 1.000000e+00 : f32
    %298 = vector.broadcast %cst_101 : f32 to vector<2x64xf32>
    %299 = arith.subf %298, %292 : vector<2x64xf32>
    %300 = arith.mulf %299, %297 : vector<2x64xf32>
    %301 = arith.mulf %292, %265 : vector<2x64xf32>
    %302 = arith.addf %300, %301 : vector<2x64xf32>
    %303 = vector.extract_strided_slice %302 {offsets = [0, 0], sizes = [2, 32], strides = [1, 1]} : vector<2x64xf32> to vector<2x32xf32>
    %c14_102 = arith.constant 14 : index
    %c0_103 = arith.constant 0 : index
    %304 = vector.load %arg20[%c14_102, %c0_103] : memref<16x32xf32, #tpu.memory_space<vmem>>, vector<2x32xf32>
    tpu.vector_store %arg20[%c14_102, %c0_103], %303 {strides = array<i32>} : memref<16x32xf32, #tpu.memory_space<vmem>>, vector<2x32xf32>,
    %305 = vector.extract_strided_slice %302 {offsets = [0, 32], sizes = [2, 32], strides = [1, 1]} : vector<2x64xf32> to vector<2x32xf32>
    %c0_104 = arith.constant 0 : index
    %c0_105 = arith.constant 0 : index
    %306 = vector.load %arg21[%c0_104, %c0_105] : memref<16x32xf32, #tpu.memory_space<vmem>>, vector<2x32xf32>
    tpu.vector_store %arg21[%c0_104, %c0_105], %305 {strides = array<i32>} : memref<16x32xf32, #tpu.memory_space<vmem>>, vector<2x32xf32>,
    %c0_106 = arith.constant 0 : index
    %c0_107 = arith.constant 0 : index
    %307 = vector.load %arg20[%c0_106, %c0_107] : memref<16x32xf32, #tpu.memory_space<vmem>>, vector<16x32xf32>
    %c0_108 = arith.constant 0 : index
    %c0_109 = arith.constant 0 : index
    %308 = vector.load %arg21[%c0_108, %c0_109] : memref<16x32xf32, #tpu.memory_space<vmem>>, vector<16x32xf32>
    %c0_110 = arith.constant 0 : index
    %c0_111 = arith.constant 0 : index
    %309 = vector.load %arg6[%c0_110, %c0_111] : memref<32x192xf32, #tpu.memory_space<vmem>>, vector<32x192xf32>
    %cst_112 = arith.constant dense<0.000000e+00> : vector<16x192xf32>
    %310 = tpu.matmul %307, %309, %cst_112 {dimension_numbers = #tpu.dot_dimension_numbers<[1], [0], [0], [1], [0, 0, 1, 1], [], []>} : vector<16x32xf32>, vector<32x192xf32>, vector<16x192xf32> -> vector<16x192xf32>
    %c0_113 = arith.constant 0 : index
    %c0_114 = arith.constant 0 : index
    %311 = vector.load %arg7[%c0_113, %c0_114] : memref<32x192xf32, #tpu.memory_space<vmem>>, vector<32x192xf32>
    %cst_115 = arith.constant dense<0.000000e+00> : vector<16x192xf32>
    %312 = tpu.matmul %308, %311, %cst_115 {dimension_numbers = #tpu.dot_dimension_numbers<[1], [0], [0], [1], [0, 0, 1, 1], [], []>} : vector<16x32xf32>, vector<32x192xf32>, vector<16x192xf32> -> vector<16x192xf32>
    %313 = arith.addf %310, %312 : vector<16x192xf32>
    %c0_116 = arith.constant 0 : index
    %c0_117 = arith.constant 0 : index
    %314 = vector.load %arg8[%c0_116, %c0_117] : memref<1x192xf32, #tpu.memory_space<vmem>>, vector<1x192xf32>
    %315 = vector.broadcast %314 : vector<1x192xf32> to vector<16x192xf32>
    %316 = arith.addf %313, %315 : vector<16x192xf32>
    %c0_118 = arith.constant 0 : index
    %c0_119 = arith.constant 0 : index
    %317 = vector.load %arg18[%c0_118, %c0_119] : memref<16x192xf32, #tpu.memory_space<vmem>>, vector<16x192xf32>
    tpu.vector_store %arg18[%c0_118, %c0_119], %316 {strides = array<i32>} : memref<16x192xf32, #tpu.memory_space<vmem>>, vector<16x192xf32>,
    %c0_120 = arith.constant 0 : index
    %c0_121 = arith.constant 0 : index
    %318 = vector.load %arg9[%c0_120, %c0_121] : memref<32x192xf32, #tpu.memory_space<vmem>>, vector<32x192xf32>
    %cst_122 = arith.constant dense<0.000000e+00> : vector<16x192xf32>
    %319 = tpu.matmul %307, %318, %cst_122 {dimension_numbers = #tpu.dot_dimension_numbers<[1], [0], [0], [1], [0, 0, 1, 1], [], []>} : vector<16x32xf32>, vector<32x192xf32>, vector<16x192xf32> -> vector<16x192xf32>
    %c0_123 = arith.constant 0 : index
    %c0_124 = arith.constant 0 : index
    %320 = vector.load %arg10[%c0_123, %c0_124] : memref<32x192xf32, #tpu.memory_space<vmem>>, vector<32x192xf32>
    %cst_125 = arith.constant dense<0.000000e+00> : vector<16x192xf32>
    %321 = tpu.matmul %308, %320, %cst_125 {dimension_numbers = #tpu.dot_dimension_numbers<[1], [0], [0], [1], [0, 0, 1, 1], [], []>} : vector<16x32xf32>, vector<32x192xf32>, vector<16x192xf32> -> vector<16x192xf32>
    %322 = arith.addf %319, %321 : vector<16x192xf32>
    %c0_126 = arith.constant 0 : index
    %c0_127 = arith.constant 0 : index
    %323 = vector.load %arg11[%c0_126, %c0_127] : memref<1x192xf32, #tpu.memory_space<vmem>>, vector<1x192xf32>
    %324 = vector.broadcast %323 : vector<1x192xf32> to vector<16x192xf32>
    %325 = arith.addf %322, %324 : vector<16x192xf32>
    %c0_128 = arith.constant 0 : index
    %c0_129 = arith.constant 0 : index
    %326 = vector.load %arg19[%c0_128, %c0_129] : memref<16x192xf32, #tpu.memory_space<vmem>>, vector<16x192xf32>
    tpu.vector_store %arg19[%c0_128, %c0_129], %325 {strides = array<i32>} : memref<16x192xf32, #tpu.memory_space<vmem>>, vector<16x192xf32>,
    %c0_130 = arith.constant 0 : index
    %c0_131 = arith.constant 0 : index
    %327 = vector.load %arg12[%c0_130, %c0_131] : memref<64x192xf32, #tpu.memory_space<vmem>>, vector<64x192xf32>
    %c0_132 = arith.constant 0 : index
    %c0_133 = arith.constant 0 : index
    %328 = vector.load %arg13[%c0_132, %c0_133] : memref<1x192xf32, #tpu.memory_space<vmem>>, vector<1x192xf32>
    %cst_134 = arith.constant 0.000000e+00 : f32
    %329 = vector.broadcast %cst_134 : f32 to vector<2x64xf32>
    %c0_135 = arith.constant 0 : index
    %c0_136 = arith.constant 0 : index
    %330 = vector.load %arg18[%c0_135, %c0_136] : memref<16x192xf32, #tpu.memory_space<vmem>>, vector<2x192xf32>
    %c14_137 = arith.constant 14 : index
    %c0_138 = arith.constant 0 : index
    %331 = vector.load %arg19[%c14_137, %c0_138] : memref<16x192xf32, #tpu.memory_space<vmem>>, vector<2x192xf32>
    %332 = arith.addf %330, %331 : vector<2x192xf32>
    %cst_139 = arith.constant dense<0.000000e+00> : vector<2x192xf32>
    %333 = tpu.matmul %329, %327, %cst_139 {dimension_numbers = #tpu.dot_dimension_numbers<[1], [0], [0], [1], [0, 0, 1, 1], [], []>} : vector<2x64xf32>, vector<64x192xf32>, vector<2x192xf32> -> vector<2x192xf32>
    %334 = vector.broadcast %328 : vector<1x192xf32> to vector<2x192xf32>
    %335 = arith.addf %333, %334 : vector<2x192xf32>
    %336 = vector.extract_strided_slice %332 {offsets = [0, 0], sizes = [2, 64], strides = [1, 1]} : vector<2x192xf32> to vector<2x64xf32>
    %337 = vector.extract_strided_slice %335 {offsets = [0, 0], sizes = [2, 64], strides = [1, 1]} : vector<2x192xf32> to vector<2x64xf32>
    %338 = arith.addf %336, %337 : vector<2x64xf32>
    %339 = arith.negf %338 : vector<2x64xf32>
    %340 = math.exp %339 : vector<2x64xf32>
    %cst_140 = arith.constant 1.000000e+00 : f32
    %341 = vector.broadcast %cst_140 : f32 to vector<2x64xf32>
    %342 = arith.addf %341, %340 : vector<2x64xf32>
    %343 = arith.divf %341, %342 : vector<2x64xf32>
    %344 = vector.extract_strided_slice %332 {offsets = [0, 64], sizes = [2, 64], strides = [1, 1]} : vector<2x192xf32> to vector<2x64xf32>
    %345 = vector.extract_strided_slice %335 {offsets = [0, 64], sizes = [2, 64], strides = [1, 1]} : vector<2x192xf32> to vector<2x64xf32>
    %346 = arith.addf %344, %345 : vector<2x64xf32>
    %347 = arith.negf %346 : vector<2x64xf32>
    %348 = math.exp %347 : vector<2x64xf32>
    %cst_141 = arith.constant 1.000000e+00 : f32
    %349 = vector.broadcast %cst_141 : f32 to vector<2x64xf32>
    %350 = arith.addf %349, %348 : vector<2x64xf32>
    %351 = arith.divf %349, %350 : vector<2x64xf32>
    %352 = vector.extract_strided_slice %332 {offsets = [0, 128], sizes = [2, 64], strides = [1, 1]} : vector<2x192xf32> to vector<2x64xf32>
    %353 = vector.extract_strided_slice %335 {offsets = [0, 128], sizes = [2, 64], strides = [1, 1]} : vector<2x192xf32> to vector<2x64xf32>
    %354 = arith.mulf %343, %353 : vector<2x64xf32>
    %355 = arith.addf %352, %354 : vector<2x64xf32>
    %356 = math.tanh %355 : vector<2x64xf32>
    %cst_142 = arith.constant 1.000000e+00 : f32
    %357 = vector.broadcast %cst_142 : f32 to vector<2x64xf32>
    %358 = arith.subf %357, %351 : vector<2x64xf32>
    %359 = arith.mulf %358, %356 : vector<2x64xf32>
    %360 = arith.mulf %351, %329 : vector<2x64xf32>
    %361 = arith.addf %359, %360 : vector<2x64xf32>
    %362 = vector.extract_strided_slice %361 {offsets = [0, 0], sizes = [2, 32], strides = [1, 1]} : vector<2x64xf32> to vector<2x32xf32>
    %c0_143 = arith.constant 0 : index
    %c0_144 = arith.constant 0 : index
    %363 = vector.load %arg22[%c0_143, %c0_144] : memref<16x32xf32, #tpu.memory_space<vmem>>, vector<2x32xf32>
    tpu.vector_store %arg22[%c0_143, %c0_144], %362 {strides = array<i32>} : memref<16x32xf32, #tpu.memory_space<vmem>>, vector<2x32xf32>,
    %364 = vector.extract_strided_slice %361 {offsets = [0, 32], sizes = [2, 32], strides = [1, 1]} : vector<2x64xf32> to vector<2x32xf32>
    %c14_145 = arith.constant 14 : index
    %c0_146 = arith.constant 0 : index
    %365 = vector.load %arg23[%c14_145, %c0_146] : memref<16x32xf32, #tpu.memory_space<vmem>>, vector<2x32xf32>
    tpu.vector_store %arg23[%c14_145, %c0_146], %364 {strides = array<i32>} : memref<16x32xf32, #tpu.memory_space<vmem>>, vector<2x32xf32>,
    %c2_147 = arith.constant 2 : index
    %c0_148 = arith.constant 0 : index
    %366 = vector.load %arg18[%c2_147, %c0_148] : memref<16x192xf32, #tpu.memory_space<vmem>>, vector<2x192xf32>
    %c12_149 = arith.constant 12 : index
    %c0_150 = arith.constant 0 : index
    %367 = vector.load %arg19[%c12_149, %c0_150] : memref<16x192xf32, #tpu.memory_space<vmem>>, vector<2x192xf32>
    %368 = arith.addf %366, %367 : vector<2x192xf32>
    %cst_151 = arith.constant dense<0.000000e+00> : vector<2x192xf32>
    %369 = tpu.matmul %361, %327, %cst_151 {dimension_numbers = #tpu.dot_dimension_numbers<[1], [0], [0], [1], [0, 0, 1, 1], [], []>} : vector<2x64xf32>, vector<64x192xf32>, vector<2x192xf32> -> vector<2x192xf32>
    %370 = vector.broadcast %328 : vector<1x192xf32> to vector<2x192xf32>
    %371 = arith.addf %369, %370 : vector<2x192xf32>
    %372 = vector.extract_strided_slice %368 {offsets = [0, 0], sizes = [2, 64], strides = [1, 1]} : vector<2x192xf32> to vector<2x64xf32>
    %373 = vector.extract_strided_slice %371 {offsets = [0, 0], sizes = [2, 64], strides = [1, 1]} : vector<2x192xf32> to vector<2x64xf32>
    %374 = arith.addf %372, %373 : vector<2x64xf32>
    %375 = arith.negf %374 : vector<2x64xf32>
    %376 = math.exp %375 : vector<2x64xf32>
    %cst_152 = arith.constant 1.000000e+00 : f32
    %377 = vector.broadcast %cst_152 : f32 to vector<2x64xf32>
    %378 = arith.addf %377, %376 : vector<2x64xf32>
    %379 = arith.divf %377, %378 : vector<2x64xf32>
    %380 = vector.extract_strided_slice %368 {offsets = [0, 64], sizes = [2, 64], strides = [1, 1]} : vector<2x192xf32> to vector<2x64xf32>
    %381 = vector.extract_strided_slice %371 {offsets = [0, 64], sizes = [2, 64], strides = [1, 1]} : vector<2x192xf32> to vector<2x64xf32>
    %382 = arith.addf %380, %381 : vector<2x64xf32>
    %383 = arith.negf %382 : vector<2x64xf32>
    %384 = math.exp %383 : vector<2x64xf32>
    %cst_153 = arith.constant 1.000000e+00 : f32
    %385 = vector.broadcast %cst_153 : f32 to vector<2x64xf32>
    %386 = arith.addf %385, %384 : vector<2x64xf32>
    %387 = arith.divf %385, %386 : vector<2x64xf32>
    %388 = vector.extract_strided_slice %368 {offsets = [0, 128], sizes = [2, 64], strides = [1, 1]} : vector<2x192xf32> to vector<2x64xf32>
    %389 = vector.extract_strided_slice %371 {offsets = [0, 128], sizes = [2, 64], strides = [1, 1]} : vector<2x192xf32> to vector<2x64xf32>
    %390 = arith.mulf %379, %389 : vector<2x64xf32>
    %391 = arith.addf %388, %390 : vector<2x64xf32>
    %392 = math.tanh %391 : vector<2x64xf32>
    %cst_154 = arith.constant 1.000000e+00 : f32
    %393 = vector.broadcast %cst_154 : f32 to vector<2x64xf32>
    %394 = arith.subf %393, %387 : vector<2x64xf32>
    %395 = arith.mulf %394, %392 : vector<2x64xf32>
    %396 = arith.mulf %387, %361 : vector<2x64xf32>
    %397 = arith.addf %395, %396 : vector<2x64xf32>
    %398 = vector.extract_strided_slice %397 {offsets = [0, 0], sizes = [2, 32], strides = [1, 1]} : vector<2x64xf32> to vector<2x32xf32>
    %c2_155 = arith.constant 2 : index
    %c0_156 = arith.constant 0 : index
    %399 = vector.load %arg22[%c2_155, %c0_156] : memref<16x32xf32, #tpu.memory_space<vmem>>, vector<2x32xf32>
    tpu.vector_store %arg22[%c2_155, %c0_156], %398 {strides = array<i32>} : memref<16x32xf32, #tpu.memory_space<vmem>>, vector<2x32xf32>,
    %400 = vector.extract_strided_slice %397 {offsets = [0, 32], sizes = [2, 32], strides = [1, 1]} : vector<2x64xf32> to vector<2x32xf32>
    %c12_157 = arith.constant 12 : index
    %c0_158 = arith.constant 0 : index
    %401 = vector.load %arg23[%c12_157, %c0_158] : memref<16x32xf32, #tpu.memory_space<vmem>>, vector<2x32xf32>
    tpu.vector_store %arg23[%c12_157, %c0_158], %400 {strides = array<i32>} : memref<16x32xf32, #tpu.memory_space<vmem>>, vector<2x32xf32>,
    %c4_159 = arith.constant 4 : index
    %c0_160 = arith.constant 0 : index
    %402 = vector.load %arg18[%c4_159, %c0_160] : memref<16x192xf32, #tpu.memory_space<vmem>>, vector<2x192xf32>
    %c10_161 = arith.constant 10 : index
    %c0_162 = arith.constant 0 : index
    %403 = vector.load %arg19[%c10_161, %c0_162] : memref<16x192xf32, #tpu.memory_space<vmem>>, vector<2x192xf32>
    %404 = arith.addf %402, %403 : vector<2x192xf32>
    %cst_163 = arith.constant dense<0.000000e+00> : vector<2x192xf32>
    %405 = tpu.matmul %397, %327, %cst_163 {dimension_numbers = #tpu.dot_dimension_numbers<[1], [0], [0], [1], [0, 0, 1, 1], [], []>} : vector<2x64xf32>, vector<64x192xf32>, vector<2x192xf32> -> vector<2x192xf32>
    %406 = vector.broadcast %328 : vector<1x192xf32> to vector<2x192xf32>
    %407 = arith.addf %405, %406 : vector<2x192xf32>
    %408 = vector.extract_strided_slice %404 {offsets = [0, 0], sizes = [2, 64], strides = [1, 1]} : vector<2x192xf32> to vector<2x64xf32>
    %409 = vector.extract_strided_slice %407 {offsets = [0, 0], sizes = [2, 64], strides = [1, 1]} : vector<2x192xf32> to vector<2x64xf32>
    %410 = arith.addf %408, %409 : vector<2x64xf32>
    %411 = arith.negf %410 : vector<2x64xf32>
    %412 = math.exp %411 : vector<2x64xf32>
    %cst_164 = arith.constant 1.000000e+00 : f32
    %413 = vector.broadcast %cst_164 : f32 to vector<2x64xf32>
    %414 = arith.addf %413, %412 : vector<2x64xf32>
    %415 = arith.divf %413, %414 : vector<2x64xf32>
    %416 = vector.extract_strided_slice %404 {offsets = [0, 64], sizes = [2, 64], strides = [1, 1]} : vector<2x192xf32> to vector<2x64xf32>
    %417 = vector.extract_strided_slice %407 {offsets = [0, 64], sizes = [2, 64], strides = [1, 1]} : vector<2x192xf32> to vector<2x64xf32>
    %418 = arith.addf %416, %417 : vector<2x64xf32>
    %419 = arith.negf %418 : vector<2x64xf32>
    %420 = math.exp %419 : vector<2x64xf32>
    %cst_165 = arith.constant 1.000000e+00 : f32
    %421 = vector.broadcast %cst_165 : f32 to vector<2x64xf32>
    %422 = arith.addf %421, %420 : vector<2x64xf32>
    %423 = arith.divf %421, %422 : vector<2x64xf32>
    %424 = vector.extract_strided_slice %404 {offsets = [0, 128], sizes = [2, 64], strides = [1, 1]} : vector<2x192xf32> to vector<2x64xf32>
    %425 = vector.extract_strided_slice %407 {offsets = [0, 128], sizes = [2, 64], strides = [1, 1]} : vector<2x192xf32> to vector<2x64xf32>
    %426 = arith.mulf %415, %425 : vector<2x64xf32>
    %427 = arith.addf %424, %426 : vector<2x64xf32>
    %428 = math.tanh %427 : vector<2x64xf32>
    %cst_166 = arith.constant 1.000000e+00 : f32
    %429 = vector.broadcast %cst_166 : f32 to vector<2x64xf32>
    %430 = arith.subf %429, %423 : vector<2x64xf32>
    %431 = arith.mulf %430, %428 : vector<2x64xf32>
    %432 = arith.mulf %423, %397 : vector<2x64xf32>
    %433 = arith.addf %431, %432 : vector<2x64xf32>
    %434 = vector.extract_strided_slice %433 {offsets = [0, 0], sizes = [2, 32], strides = [1, 1]} : vector<2x64xf32> to vector<2x32xf32>
    %c4_167 = arith.constant 4 : index
    %c0_168 = arith.constant 0 : index
    %435 = vector.load %arg22[%c4_167, %c0_168] : memref<16x32xf32, #tpu.memory_space<vmem>>, vector<2x32xf32>
    tpu.vector_store %arg22[%c4_167, %c0_168], %434 {strides = array<i32>} : memref<16x32xf32, #tpu.memory_space<vmem>>, vector<2x32xf32>,
    %436 = vector.extract_strided_slice %433 {offsets = [0, 32], sizes = [2, 32], strides = [1, 1]} : vector<2x64xf32> to vector<2x32xf32>
    %c10_169 = arith.constant 10 : index
    %c0_170 = arith.constant 0 : index
    %437 = vector.load %arg23[%c10_169, %c0_170] : memref<16x32xf32, #tpu.memory_space<vmem>>, vector<2x32xf32>
    tpu.vector_store %arg23[%c10_169, %c0_170], %436 {strides = array<i32>} : memref<16x32xf32, #tpu.memory_space<vmem>>, vector<2x32xf32>,
    %c6_171 = arith.constant 6 : index
    %c0_172 = arith.constant 0 : index
    %438 = vector.load %arg18[%c6_171, %c0_172] : memref<16x192xf32, #tpu.memory_space<vmem>>, vector<2x192xf32>
    %c8_173 = arith.constant 8 : index
    %c0_174 = arith.constant 0 : index
    %439 = vector.load %arg19[%c8_173, %c0_174] : memref<16x192xf32, #tpu.memory_space<vmem>>, vector<2x192xf32>
    %440 = arith.addf %438, %439 : vector<2x192xf32>
    %cst_175 = arith.constant dense<0.000000e+00> : vector<2x192xf32>
    %441 = tpu.matmul %433, %327, %cst_175 {dimension_numbers = #tpu.dot_dimension_numbers<[1], [0], [0], [1], [0, 0, 1, 1], [], []>} : vector<2x64xf32>, vector<64x192xf32>, vector<2x192xf32> -> vector<2x192xf32>
    %442 = vector.broadcast %328 : vector<1x192xf32> to vector<2x192xf32>
    %443 = arith.addf %441, %442 : vector<2x192xf32>
    %444 = vector.extract_strided_slice %440 {offsets = [0, 0], sizes = [2, 64], strides = [1, 1]} : vector<2x192xf32> to vector<2x64xf32>
    %445 = vector.extract_strided_slice %443 {offsets = [0, 0], sizes = [2, 64], strides = [1, 1]} : vector<2x192xf32> to vector<2x64xf32>
    %446 = arith.addf %444, %445 : vector<2x64xf32>
    %447 = arith.negf %446 : vector<2x64xf32>
    %448 = math.exp %447 : vector<2x64xf32>
    %cst_176 = arith.constant 1.000000e+00 : f32
    %449 = vector.broadcast %cst_176 : f32 to vector<2x64xf32>
    %450 = arith.addf %449, %448 : vector<2x64xf32>
    %451 = arith.divf %449, %450 : vector<2x64xf32>
    %452 = vector.extract_strided_slice %440 {offsets = [0, 64], sizes = [2, 64], strides = [1, 1]} : vector<2x192xf32> to vector<2x64xf32>
    %453 = vector.extract_strided_slice %443 {offsets = [0, 64], sizes = [2, 64], strides = [1, 1]} : vector<2x192xf32> to vector<2x64xf32>
    %454 = arith.addf %452, %453 : vector<2x64xf32>
    %455 = arith.negf %454 : vector<2x64xf32>
    %456 = math.exp %455 : vector<2x64xf32>
    %cst_177 = arith.constant 1.000000e+00 : f32
    %457 = vector.broadcast %cst_177 : f32 to vector<2x64xf32>
    %458 = arith.addf %457, %456 : vector<2x64xf32>
    %459 = arith.divf %457, %458 : vector<2x64xf32>
    %460 = vector.extract_strided_slice %440 {offsets = [0, 128], sizes = [2, 64], strides = [1, 1]} : vector<2x192xf32> to vector<2x64xf32>
    %461 = vector.extract_strided_slice %443 {offsets = [0, 128], sizes = [2, 64], strides = [1, 1]} : vector<2x192xf32> to vector<2x64xf32>
    %462 = arith.mulf %451, %461 : vector<2x64xf32>
    %463 = arith.addf %460, %462 : vector<2x64xf32>
    %464 = math.tanh %463 : vector<2x64xf32>
    %cst_178 = arith.constant 1.000000e+00 : f32
    %465 = vector.broadcast %cst_178 : f32 to vector<2x64xf32>
    %466 = arith.subf %465, %459 : vector<2x64xf32>
    %467 = arith.mulf %466, %464 : vector<2x64xf32>
    %468 = arith.mulf %459, %433 : vector<2x64xf32>
    %469 = arith.addf %467, %468 : vector<2x64xf32>
    %470 = vector.extract_strided_slice %469 {offsets = [0, 0], sizes = [2, 32], strides = [1, 1]} : vector<2x64xf32> to vector<2x32xf32>
    %c6_179 = arith.constant 6 : index
    %c0_180 = arith.constant 0 : index
    %471 = vector.load %arg22[%c6_179, %c0_180] : memref<16x32xf32, #tpu.memory_space<vmem>>, vector<2x32xf32>
    tpu.vector_store %arg22[%c6_179, %c0_180], %470 {strides = array<i32>} : memref<16x32xf32, #tpu.memory_space<vmem>>, vector<2x32xf32>,
    %472 = vector.extract_strided_slice %469 {offsets = [0, 32], sizes = [2, 32], strides = [1, 1]} : vector<2x64xf32> to vector<2x32xf32>
    %c8_181 = arith.constant 8 : index
    %c0_182 = arith.constant 0 : index
    %473 = vector.load %arg23[%c8_181, %c0_182] : memref<16x32xf32, #tpu.memory_space<vmem>>, vector<2x32xf32>
    tpu.vector_store %arg23[%c8_181, %c0_182], %472 {strides = array<i32>} : memref<16x32xf32, #tpu.memory_space<vmem>>, vector<2x32xf32>,
    %c8_183 = arith.constant 8 : index
    %c0_184 = arith.constant 0 : index
    %474 = vector.load %arg18[%c8_183, %c0_184] : memref<16x192xf32, #tpu.memory_space<vmem>>, vector<2x192xf32>
    %c6_185 = arith.constant 6 : index
    %c0_186 = arith.constant 0 : index
    %475 = vector.load %arg19[%c6_185, %c0_186] : memref<16x192xf32, #tpu.memory_space<vmem>>, vector<2x192xf32>
    %476 = arith.addf %474, %475 : vector<2x192xf32>
    %cst_187 = arith.constant dense<0.000000e+00> : vector<2x192xf32>
    %477 = tpu.matmul %469, %327, %cst_187 {dimension_numbers = #tpu.dot_dimension_numbers<[1], [0], [0], [1], [0, 0, 1, 1], [], []>} : vector<2x64xf32>, vector<64x192xf32>, vector<2x192xf32> -> vector<2x192xf32>
    %478 = vector.broadcast %328 : vector<1x192xf32> to vector<2x192xf32>
    %479 = arith.addf %477, %478 : vector<2x192xf32>
    %480 = vector.extract_strided_slice %476 {offsets = [0, 0], sizes = [2, 64], strides = [1, 1]} : vector<2x192xf32> to vector<2x64xf32>
    %481 = vector.extract_strided_slice %479 {offsets = [0, 0], sizes = [2, 64], strides = [1, 1]} : vector<2x192xf32> to vector<2x64xf32>
    %482 = arith.addf %480, %481 : vector<2x64xf32>
    %483 = arith.negf %482 : vector<2x64xf32>
    %484 = math.exp %483 : vector<2x64xf32>
    %cst_188 = arith.constant 1.000000e+00 : f32
    %485 = vector.broadcast %cst_188 : f32 to vector<2x64xf32>
    %486 = arith.addf %485, %484 : vector<2x64xf32>
    %487 = arith.divf %485, %486 : vector<2x64xf32>
    %488 = vector.extract_strided_slice %476 {offsets = [0, 64], sizes = [2, 64], strides = [1, 1]} : vector<2x192xf32> to vector<2x64xf32>
    %489 = vector.extract_strided_slice %479 {offsets = [0, 64], sizes = [2, 64], strides = [1, 1]} : vector<2x192xf32> to vector<2x64xf32>
    %490 = arith.addf %488, %489 : vector<2x64xf32>
    %491 = arith.negf %490 : vector<2x64xf32>
    %492 = math.exp %491 : vector<2x64xf32>
    %cst_189 = arith.constant 1.000000e+00 : f32
    %493 = vector.broadcast %cst_189 : f32 to vector<2x64xf32>
    %494 = arith.addf %493, %492 : vector<2x64xf32>
    %495 = arith.divf %493, %494 : vector<2x64xf32>
    %496 = vector.extract_strided_slice %476 {offsets = [0, 128], sizes = [2, 64], strides = [1, 1]} : vector<2x192xf32> to vector<2x64xf32>
    %497 = vector.extract_strided_slice %479 {offsets = [0, 128], sizes = [2, 64], strides = [1, 1]} : vector<2x192xf32> to vector<2x64xf32>
    %498 = arith.mulf %487, %497 : vector<2x64xf32>
    %499 = arith.addf %496, %498 : vector<2x64xf32>
    %500 = math.tanh %499 : vector<2x64xf32>
    %cst_190 = arith.constant 1.000000e+00 : f32
    %501 = vector.broadcast %cst_190 : f32 to vector<2x64xf32>
    %502 = arith.subf %501, %495 : vector<2x64xf32>
    %503 = arith.mulf %502, %500 : vector<2x64xf32>
    %504 = arith.mulf %495, %469 : vector<2x64xf32>
    %505 = arith.addf %503, %504 : vector<2x64xf32>
    %506 = vector.extract_strided_slice %505 {offsets = [0, 0], sizes = [2, 32], strides = [1, 1]} : vector<2x64xf32> to vector<2x32xf32>
    %c8_191 = arith.constant 8 : index
    %c0_192 = arith.constant 0 : index
    %507 = vector.load %arg22[%c8_191, %c0_192] : memref<16x32xf32, #tpu.memory_space<vmem>>, vector<2x32xf32>
    tpu.vector_store %arg22[%c8_191, %c0_192], %506 {strides = array<i32>} : memref<16x32xf32, #tpu.memory_space<vmem>>, vector<2x32xf32>,
    %508 = vector.extract_strided_slice %505 {offsets = [0, 32], sizes = [2, 32], strides = [1, 1]} : vector<2x64xf32> to vector<2x32xf32>
    %c6_193 = arith.constant 6 : index
    %c0_194 = arith.constant 0 : index
    %509 = vector.load %arg23[%c6_193, %c0_194] : memref<16x32xf32, #tpu.memory_space<vmem>>, vector<2x32xf32>
    tpu.vector_store %arg23[%c6_193, %c0_194], %508 {strides = array<i32>} : memref<16x32xf32, #tpu.memory_space<vmem>>, vector<2x32xf32>,
    %c10_195 = arith.constant 10 : index
    %c0_196 = arith.constant 0 : index
    %510 = vector.load %arg18[%c10_195, %c0_196] : memref<16x192xf32, #tpu.memory_space<vmem>>, vector<2x192xf32>
    %c4_197 = arith.constant 4 : index
    %c0_198 = arith.constant 0 : index
    %511 = vector.load %arg19[%c4_197, %c0_198] : memref<16x192xf32, #tpu.memory_space<vmem>>, vector<2x192xf32>
    %512 = arith.addf %510, %511 : vector<2x192xf32>
    %cst_199 = arith.constant dense<0.000000e+00> : vector<2x192xf32>
    %513 = tpu.matmul %505, %327, %cst_199 {dimension_numbers = #tpu.dot_dimension_numbers<[1], [0], [0], [1], [0, 0, 1, 1], [], []>} : vector<2x64xf32>, vector<64x192xf32>, vector<2x192xf32> -> vector<2x192xf32>
    %514 = vector.broadcast %328 : vector<1x192xf32> to vector<2x192xf32>
    %515 = arith.addf %513, %514 : vector<2x192xf32>
    %516 = vector.extract_strided_slice %512 {offsets = [0, 0], sizes = [2, 64], strides = [1, 1]} : vector<2x192xf32> to vector<2x64xf32>
    %517 = vector.extract_strided_slice %515 {offsets = [0, 0], sizes = [2, 64], strides = [1, 1]} : vector<2x192xf32> to vector<2x64xf32>
    %518 = arith.addf %516, %517 : vector<2x64xf32>
    %519 = arith.negf %518 : vector<2x64xf32>
    %520 = math.exp %519 : vector<2x64xf32>
    %cst_200 = arith.constant 1.000000e+00 : f32
    %521 = vector.broadcast %cst_200 : f32 to vector<2x64xf32>
    %522 = arith.addf %521, %520 : vector<2x64xf32>
    %523 = arith.divf %521, %522 : vector<2x64xf32>
    %524 = vector.extract_strided_slice %512 {offsets = [0, 64], sizes = [2, 64], strides = [1, 1]} : vector<2x192xf32> to vector<2x64xf32>
    %525 = vector.extract_strided_slice %515 {offsets = [0, 64], sizes = [2, 64], strides = [1, 1]} : vector<2x192xf32> to vector<2x64xf32>
    %526 = arith.addf %524, %525 : vector<2x64xf32>
    %527 = arith.negf %526 : vector<2x64xf32>
    %528 = math.exp %527 : vector<2x64xf32>
    %cst_201 = arith.constant 1.000000e+00 : f32
    %529 = vector.broadcast %cst_201 : f32 to vector<2x64xf32>
    %530 = arith.addf %529, %528 : vector<2x64xf32>
    %531 = arith.divf %529, %530 : vector<2x64xf32>
    %532 = vector.extract_strided_slice %512 {offsets = [0, 128], sizes = [2, 64], strides = [1, 1]} : vector<2x192xf32> to vector<2x64xf32>
    %533 = vector.extract_strided_slice %515 {offsets = [0, 128], sizes = [2, 64], strides = [1, 1]} : vector<2x192xf32> to vector<2x64xf32>
    %534 = arith.mulf %523, %533 : vector<2x64xf32>
    %535 = arith.addf %532, %534 : vector<2x64xf32>
    %536 = math.tanh %535 : vector<2x64xf32>
    %cst_202 = arith.constant 1.000000e+00 : f32
    %537 = vector.broadcast %cst_202 : f32 to vector<2x64xf32>
    %538 = arith.subf %537, %531 : vector<2x64xf32>
    %539 = arith.mulf %538, %536 : vector<2x64xf32>
    %540 = arith.mulf %531, %505 : vector<2x64xf32>
    %541 = arith.addf %539, %540 : vector<2x64xf32>
    %542 = vector.extract_strided_slice %541 {offsets = [0, 0], sizes = [2, 32], strides = [1, 1]} : vector<2x64xf32> to vector<2x32xf32>
    %c10_203 = arith.constant 10 : index
    %c0_204 = arith.constant 0 : index
    %543 = vector.load %arg22[%c10_203, %c0_204] : memref<16x32xf32, #tpu.memory_space<vmem>>, vector<2x32xf32>
    tpu.vector_store %arg22[%c10_203, %c0_204], %542 {strides = array<i32>} : memref<16x32xf32, #tpu.memory_space<vmem>>, vector<2x32xf32>,
    %544 = vector.extract_strided_slice %541 {offsets = [0, 32], sizes = [2, 32], strides = [1, 1]} : vector<2x64xf32> to vector<2x32xf32>
    %c4_205 = arith.constant 4 : index
    %c0_206 = arith.constant 0 : index
    %545 = vector.load %arg23[%c4_205, %c0_206] : memref<16x32xf32, #tpu.memory_space<vmem>>, vector<2x32xf32>
    tpu.vector_store %arg23[%c4_205, %c0_206], %544 {strides = array<i32>} : memref<16x32xf32, #tpu.memory_space<vmem>>, vector<2x32xf32>,
    %c12_207 = arith.constant 12 : index
    %c0_208 = arith.constant 0 : index
    %546 = vector.load %arg18[%c12_207, %c0_208] : memref<16x192xf32, #tpu.memory_space<vmem>>, vector<2x192xf32>
    %c2_209 = arith.constant 2 : index
    %c0_210 = arith.constant 0 : index
    %547 = vector.load %arg19[%c2_209, %c0_210] : memref<16x192xf32, #tpu.memory_space<vmem>>, vector<2x192xf32>
    %548 = arith.addf %546, %547 : vector<2x192xf32>
    %cst_211 = arith.constant dense<0.000000e+00> : vector<2x192xf32>
    %549 = tpu.matmul %541, %327, %cst_211 {dimension_numbers = #tpu.dot_dimension_numbers<[1], [0], [0], [1], [0, 0, 1, 1], [], []>} : vector<2x64xf32>, vector<64x192xf32>, vector<2x192xf32> -> vector<2x192xf32>
    %550 = vector.broadcast %328 : vector<1x192xf32> to vector<2x192xf32>
    %551 = arith.addf %549, %550 : vector<2x192xf32>
    %552 = vector.extract_strided_slice %548 {offsets = [0, 0], sizes = [2, 64], strides = [1, 1]} : vector<2x192xf32> to vector<2x64xf32>
    %553 = vector.extract_strided_slice %551 {offsets = [0, 0], sizes = [2, 64], strides = [1, 1]} : vector<2x192xf32> to vector<2x64xf32>
    %554 = arith.addf %552, %553 : vector<2x64xf32>
    %555 = arith.negf %554 : vector<2x64xf32>
    %556 = math.exp %555 : vector<2x64xf32>
    %cst_212 = arith.constant 1.000000e+00 : f32
    %557 = vector.broadcast %cst_212 : f32 to vector<2x64xf32>
    %558 = arith.addf %557, %556 : vector<2x64xf32>
    %559 = arith.divf %557, %558 : vector<2x64xf32>
    %560 = vector.extract_strided_slice %548 {offsets = [0, 64], sizes = [2, 64], strides = [1, 1]} : vector<2x192xf32> to vector<2x64xf32>
    %561 = vector.extract_strided_slice %551 {offsets = [0, 64], sizes = [2, 64], strides = [1, 1]} : vector<2x192xf32> to vector<2x64xf32>
    %562 = arith.addf %560, %561 : vector<2x64xf32>
    %563 = arith.negf %562 : vector<2x64xf32>
    %564 = math.exp %563 : vector<2x64xf32>
    %cst_213 = arith.constant 1.000000e+00 : f32
    %565 = vector.broadcast %cst_213 : f32 to vector<2x64xf32>
    %566 = arith.addf %565, %564 : vector<2x64xf32>
    %567 = arith.divf %565, %566 : vector<2x64xf32>
    %568 = vector.extract_strided_slice %548 {offsets = [0, 128], sizes = [2, 64], strides = [1, 1]} : vector<2x192xf32> to vector<2x64xf32>
    %569 = vector.extract_strided_slice %551 {offsets = [0, 128], sizes = [2, 64], strides = [1, 1]} : vector<2x192xf32> to vector<2x64xf32>
    %570 = arith.mulf %559, %569 : vector<2x64xf32>
    %571 = arith.addf %568, %570 : vector<2x64xf32>
    %572 = math.tanh %571 : vector<2x64xf32>
    %cst_214 = arith.constant 1.000000e+00 : f32
    %573 = vector.broadcast %cst_214 : f32 to vector<2x64xf32>
    %574 = arith.subf %573, %567 : vector<2x64xf32>
    %575 = arith.mulf %574, %572 : vector<2x64xf32>
    %576 = arith.mulf %567, %541 : vector<2x64xf32>
    %577 = arith.addf %575, %576 : vector<2x64xf32>
    %578 = vector.extract_strided_slice %577 {offsets = [0, 0], sizes = [2, 32], strides = [1, 1]} : vector<2x64xf32> to vector<2x32xf32>
    %c12_215 = arith.constant 12 : index
    %c0_216 = arith.constant 0 : index
    %579 = vector.load %arg22[%c12_215, %c0_216] : memref<16x32xf32, #tpu.memory_space<vmem>>, vector<2x32xf32>
    tpu.vector_store %arg22[%c12_215, %c0_216], %578 {strides = array<i32>} : memref<16x32xf32, #tpu.memory_space<vmem>>, vector<2x32xf32>,
    %580 = vector.extract_strided_slice %577 {offsets = [0, 32], sizes = [2, 32], strides = [1, 1]} : vector<2x64xf32> to vector<2x32xf32>
    %c2_217 = arith.constant 2 : index
    %c0_218 = arith.constant 0 : index
    %581 = vector.load %arg23[%c2_217, %c0_218] : memref<16x32xf32, #tpu.memory_space<vmem>>, vector<2x32xf32>
    tpu.vector_store %arg23[%c2_217, %c0_218], %580 {strides = array<i32>} : memref<16x32xf32, #tpu.memory_space<vmem>>, vector<2x32xf32>,
    %c14_219 = arith.constant 14 : index
    %c0_220 = arith.constant 0 : index
    %582 = vector.load %arg18[%c14_219, %c0_220] : memref<16x192xf32, #tpu.memory_space<vmem>>, vector<2x192xf32>
    %c0_221 = arith.constant 0 : index
    %c0_222 = arith.constant 0 : index
    %583 = vector.load %arg19[%c0_221, %c0_222] : memref<16x192xf32, #tpu.memory_space<vmem>>, vector<2x192xf32>
    %584 = arith.addf %582, %583 : vector<2x192xf32>
    %cst_223 = arith.constant dense<0.000000e+00> : vector<2x192xf32>
    %585 = tpu.matmul %577, %327, %cst_223 {dimension_numbers = #tpu.dot_dimension_numbers<[1], [0], [0], [1], [0, 0, 1, 1], [], []>} : vector<2x64xf32>, vector<64x192xf32>, vector<2x192xf32> -> vector<2x192xf32>
    %586 = vector.broadcast %328 : vector<1x192xf32> to vector<2x192xf32>
    %587 = arith.addf %585, %586 : vector<2x192xf32>
    %588 = vector.extract_strided_slice %584 {offsets = [0, 0], sizes = [2, 64], strides = [1, 1]} : vector<2x192xf32> to vector<2x64xf32>
    %589 = vector.extract_strided_slice %587 {offsets = [0, 0], sizes = [2, 64], strides = [1, 1]} : vector<2x192xf32> to vector<2x64xf32>
    %590 = arith.addf %588, %589 : vector<2x64xf32>
    %591 = arith.negf %590 : vector<2x64xf32>
    %592 = math.exp %591 : vector<2x64xf32>
    %cst_224 = arith.constant 1.000000e+00 : f32
    %593 = vector.broadcast %cst_224 : f32 to vector<2x64xf32>
    %594 = arith.addf %593, %592 : vector<2x64xf32>
    %595 = arith.divf %593, %594 : vector<2x64xf32>
    %596 = vector.extract_strided_slice %584 {offsets = [0, 64], sizes = [2, 64], strides = [1, 1]} : vector<2x192xf32> to vector<2x64xf32>
    %597 = vector.extract_strided_slice %587 {offsets = [0, 64], sizes = [2, 64], strides = [1, 1]} : vector<2x192xf32> to vector<2x64xf32>
    %598 = arith.addf %596, %597 : vector<2x64xf32>
    %599 = arith.negf %598 : vector<2x64xf32>
    %600 = math.exp %599 : vector<2x64xf32>
    %cst_225 = arith.constant 1.000000e+00 : f32
    %601 = vector.broadcast %cst_225 : f32 to vector<2x64xf32>
    %602 = arith.addf %601, %600 : vector<2x64xf32>
    %603 = arith.divf %601, %602 : vector<2x64xf32>
    %604 = vector.extract_strided_slice %584 {offsets = [0, 128], sizes = [2, 64], strides = [1, 1]} : vector<2x192xf32> to vector<2x64xf32>
    %605 = vector.extract_strided_slice %587 {offsets = [0, 128], sizes = [2, 64], strides = [1, 1]} : vector<2x192xf32> to vector<2x64xf32>
    %606 = arith.mulf %595, %605 : vector<2x64xf32>
    %607 = arith.addf %604, %606 : vector<2x64xf32>
    %608 = math.tanh %607 : vector<2x64xf32>
    %cst_226 = arith.constant 1.000000e+00 : f32
    %609 = vector.broadcast %cst_226 : f32 to vector<2x64xf32>
    %610 = arith.subf %609, %603 : vector<2x64xf32>
    %611 = arith.mulf %610, %608 : vector<2x64xf32>
    %612 = arith.mulf %603, %577 : vector<2x64xf32>
    %613 = arith.addf %611, %612 : vector<2x64xf32>
    %614 = vector.extract_strided_slice %613 {offsets = [0, 0], sizes = [2, 32], strides = [1, 1]} : vector<2x64xf32> to vector<2x32xf32>
    %c14_227 = arith.constant 14 : index
    %c0_228 = arith.constant 0 : index
    %615 = vector.load %arg22[%c14_227, %c0_228] : memref<16x32xf32, #tpu.memory_space<vmem>>, vector<2x32xf32>
    tpu.vector_store %arg22[%c14_227, %c0_228], %614 {strides = array<i32>} : memref<16x32xf32, #tpu.memory_space<vmem>>, vector<2x32xf32>,
    %616 = vector.extract_strided_slice %613 {offsets = [0, 32], sizes = [2, 32], strides = [1, 1]} : vector<2x64xf32> to vector<2x32xf32>
    %c0_229 = arith.constant 0 : index
    %c0_230 = arith.constant 0 : index
    %617 = vector.load %arg23[%c0_229, %c0_230] : memref<16x32xf32, #tpu.memory_space<vmem>>, vector<2x32xf32>
    tpu.vector_store %arg23[%c0_229, %c0_230], %616 {strides = array<i32>} : memref<16x32xf32, #tpu.memory_space<vmem>>, vector<2x32xf32>,
    %c0_231 = arith.constant 0 : index
    %c0_232 = arith.constant 0 : index
    %618 = vector.load %arg22[%c0_231, %c0_232] : memref<16x32xf32, #tpu.memory_space<vmem>>, vector<16x32xf32>
    %c0_233 = arith.constant 0 : index
    %c0_234 = arith.constant 0 : index
    %619 = vector.load %arg23[%c0_233, %c0_234] : memref<16x32xf32, #tpu.memory_space<vmem>>, vector<16x32xf32>
    %c0_235 = arith.constant 0 : index
    %c0_236 = arith.constant 0 : index
    %620 = vector.load %arg14[%c0_235, %c0_236] : memref<32x8xf32, #tpu.memory_space<vmem>>, vector<32x8xf32>
    %cst_237 = arith.constant dense<0.000000e+00> : vector<16x8xf32>
    %621 = tpu.matmul %618, %620, %cst_237 {dimension_numbers = #tpu.dot_dimension_numbers<[1], [0], [0], [1], [0, 0, 1, 1], [], []>} : vector<16x32xf32>, vector<32x8xf32>, vector<16x8xf32> -> vector<16x8xf32>
    %c0_238 = arith.constant 0 : index
    %c0_239 = arith.constant 0 : index
    %622 = vector.load %arg15[%c0_238, %c0_239] : memref<32x8xf32, #tpu.memory_space<vmem>>, vector<32x8xf32>
    %cst_240 = arith.constant dense<0.000000e+00> : vector<16x8xf32>
    %623 = tpu.matmul %619, %622, %cst_240 {dimension_numbers = #tpu.dot_dimension_numbers<[1], [0], [0], [1], [0, 0, 1, 1], [], []>} : vector<16x32xf32>, vector<32x8xf32>, vector<16x8xf32> -> vector<16x8xf32>
    %624 = arith.addf %621, %623 : vector<16x8xf32>
    %c0_241 = arith.constant 0 : index
    %c0_242 = arith.constant 0 : index
    %625 = vector.load %arg16[%c0_241, %c0_242] : memref<1x8xf32, #tpu.memory_space<vmem>>, vector<1x8xf32>
    %626 = vector.broadcast %625 : vector<1x8xf32> to vector<16x8xf32>
    %627 = arith.addf %624, %626 : vector<16x8xf32>
    %c0_243 = arith.constant 0 : index
    %c0_244 = arith.constant 0 : index
    %628 = vector.load %arg17[%c0_243, %c0_244] : memref<16x8xf32, #tpu.memory_space<vmem>>, vector<16x8xf32>
    tpu.vector_store %arg17[%c0_243, %c0_244], %627 {strides = array<i32>} : memref<16x8xf32, #tpu.memory_space<vmem>>, vector<16x8xf32>,
    return
  }
}

</mosaic_0001>

<bundles_post_ra>
// kernel: bigru_forward.1
= control target key start
LH: loop header
LB: loop body
LE: loop exit
PB: predicated region body
PF: predicated region fallthrough
CT: control target
= control target key end

     0   :  { %s4394_s0 = inlined_call_operand.vmem [shape: f32[16,16], index: 0, kind: input, shape index: {}]   ;;  %s4395_s1 = inlined_call_operand.vmem [shape: f32[2,192], index: 1, kind: input, shape index: {}]   ;;  %s4396_s2 = inlined_call_operand.hbm [shape: f32[16,192], index: 2, kind: input, shape index: {}]   ;;  %s4397_s3 = inlined_call_operand.hbm [shape: f32[16,192], index: 3, kind: input, shape index: {}]   ;;  %s4398_s4 = inlined_call_operand.vmem [shape: f32[64,192], index: 4, kind: input, shape index: {}]   ;;  %s4399_s5 = inlined_call_operand.vmem [shape: f32[1,192], index: 5, kind: input, shape index: {}]   ;;  %s4400_s6 = inlined_call_operand.vmem [shape: f32[32,192], index: 6, kind: input, shape index: {}]   ;;  %s4401_s7 = inlined_call_operand.hbm [shape: f32[32,192], index: 7, kind: input, shape index: {}]   ;;  %s4402_s8 = inlined_call_operand.vmem [shape: f32[1,192], index: 8, kind: input, shape index: {}]   ;;  %s4403_s9 = inlined_call_operand.hbm [shape: f32[32,192], index: 9, kind: input, shape index: {}]   ;;  %s4404_s10 = inlined_call_operand.hbm [shape: f32[32,192], index: 10, kind: input, shape index: {}]   ;;  %s4405_s11 = inlined_call_operand.vmem [shape: f32[1,192], index: 11, kind: input, shape index: {}]   ;;  %s4406_s12 = inlined_call_operand.hbm [shape: f32[64,192], index: 12, kind: input, shape index: {}]   ;;  %s4407_s13 = inlined_call_operand.vmem [shape: f32[1,192], index: 13, kind: input, shape index: {}]   ;;  %s4408_s14 = inlined_call_operand.vmem [shape: f32[32,8], index: 14, kind: input, shape index: {}]   ;;  %s4409_s15 = inlined_call_operand.vmem [shape: f32[32,8], index: 15, kind: input, shape index: {}]   ;;  %s4410_s16 = inlined_call_operand.vmem [shape: f32[1,8], index: 16, kind: input, shape index: {}]   ;;  %s4411_s17 = inlined_call_operand.vmem [shape: f32[16,8], index: 17, kind: output, shape index: {}]  }
   0x1   :  { %4413 = sst [smem:[#allocation22_spill]] %s4394_s0 }
   0x2   :  { %4414 = sst [smem:[#allocation23_spill]] %s4395_s1 }
   0x3   :  { %22 = vsyncpa [#allocation9], 0 }
   0x4   :  { %23 = vsyncpa [#allocation11], 0 }
   0x5   :  { %24 = vsyncpa [#allocation14], 0 }
   0x6   :  { %25 = vsyncpa [#allocation17], 0  ;;  %s3583_s24 = smov [#allocation10]   ;;  %s3584_s26 = smov [#allocation13]  }
   0x7   :  { %s47_s25 = sshll.u32 %s3583_s24, 4  ;;  %s79_s27 = sshll.u32 %s3584_s26, 4  ;;  %s48_s25 = int_to_ptr.vmem [resolvable:$true] %s47_s25  ;;  %s3685_s27 = int_to_ptr.vmem [resolvable:$true] %s79_s27 }
   0x8   :  { %s3443_s0 = scalar_lea.hbm %s4397_s3, 512 }
   0x9   :  { %p3444_p0 = scmp.ne.s32.totalorder %s4397_s3, %s3443_s0  ;;  %p3447_p1 = scmp.lt.u32.totalorder %s3443_s0, %s4397_s3 }
   0xb   :  { %p3449_p2 = pnand %p3447_p1, %p3444_p0 }
   0xd   :  { %3452 = shalt.err (!%p3449_p2)
}
   0xe   :  { %s3453_s20 = scalar_lea.vmem %s48_s25, 512  ;;  %p3458_p4 = scmp.lt.s32.totalorder %s48_s25, %s48_s25 }
   0xf   :  { %p3454_p3 = scmp.ne.s32.totalorder %s48_s25, %s3453_s20  ;;  %p3459_p5 = scmp.lt.s32.totalorder %s3453_s20, %s3453_s20 }
  0x11   :  { %p3460_p6 = por %p3459_p5, %p3458_p4 }
  0x13   :  { %p3461_p7 = pnand %p3460_p6, %p3454_p3 }
  0x15   :  { %3464 = shalt.err (!%p3461_p7)
}
  0x16   :  { %s3585_s21 = smov 256   ;;  %s3586_s22 = smov 16  }
  0x17   :  { %53 = dma.hbm_to_vmem [thread:$0]  %s4397_s3, 512, %s48_s25, [#allocation11], %s3585_s21, %s3585_s21, %s3586_s22  }
  0x18   :  { %s3465_s29 = scalar_lea.hbm %s4403_s9, 1024 }
  0x19   :  { %p3466_p8 = scmp.ne.s32.totalorder %s4403_s9, %s3465_s29  ;;  %p3469_p9 = scmp.lt.u32.totalorder %s3465_s29, %s4403_s9 }
  0x1b   :  { %p3471_p10 = pnand %p3469_p9, %p3466_p8 }
  0x1d   :  { %3474 = shalt.err (!%p3471_p10)
}
  0x1e   :  { %s3475_s1 = scalar_lea.vmem %s3685_s27, 1024  ;;  %p3480_p12 = scmp.lt.s32.totalorder %s3685_s27, %s3685_s27 }
  0x1f   :  { %p3476_p11 = scmp.ne.s32.totalorder %s3685_s27, %s3475_s1  ;;  %p3481_p13 = scmp.lt.s32.totalorder %s3475_s1, %s3475_s1 }
  0x21   :  { %p3482_p0 = por %p3481_p13, %p3480_p12 }
  0x23   :  { %p3483_p1 = pnand %p3482_p0, %p3476_p11 }
  0x25   :  { %3486 = shalt.err (!%p3483_p1)
}
  0x26   :  { %85 = dma.hbm_to_vmem [thread:$0]  %s4403_s9, 1024, %s3685_s27, [#allocation14], %s3585_s21, %s3585_s21, %s3586_s22  }
  0x27   :  { %s3587_s20 = smov [#allocation8]   ;;  %s3588_s24 = smov [#allocation12]  }
  0x28   :  { %s35_s23 = sshll.u32 %s3587_s20, 4  ;;  %s65_s26 = sshll.u32 %s3588_s24, 4  ;;  %s36_s23 = int_to_ptr.vmem [resolvable:$true] %s35_s23  ;;  %s3722_s26 = int_to_ptr.vmem [resolvable:$true] %s65_s26 }
  0x29   :  { %s3487_s0 = scalar_lea.hbm %s4396_s2, 512 }
  0x2a   :  { %p3488_p2 = scmp.ne.s32.totalorder %s4396_s2, %s3487_s0  ;;  %p3491_p3 = scmp.lt.u32.totalorder %s3487_s0, %s4396_s2 }
  0x2c   :  { %p3493_p4 = pnand %p3491_p3, %p3488_p2 }
  0x2e   :  { %3496 = shalt.err (!%p3493_p4)
}
  0x2f   :  { %s3497_s9 = scalar_lea.vmem %s36_s23, 512  ;;  %p3502_p6 = scmp.lt.s32.totalorder %s36_s23, %s36_s23 }
  0x30   :  { %p3498_p5 = scmp.ne.s32.totalorder %s36_s23, %s3497_s9  ;;  %p3503_p7 = scmp.lt.s32.totalorder %s3497_s9, %s3497_s9 }
  0x32   :  { %p3504_p8 = por %p3503_p7, %p3502_p6 }
  0x34   :  { %p3505_p9 = pnand %p3504_p8, %p3498_p5 }
  0x36   :  { %3508 = shalt.err (!%p3505_p9)
}
  0x37   :  { %41 = dma.hbm_to_vmem [thread:$0]  %s4396_s2, 512, %s36_s23, [#allocation9], %s3585_s21, %s3585_s21, %s3586_s22  }
  0x38   :  { %s3509_s24 = scalar_lea.hbm %s4401_s7, 1024 }
  0x39   :  { %p3510_p10 = scmp.ne.s32.totalorder %s4401_s7, %s3509_s24  ;;  %p3513_p11 = scmp.lt.u32.totalorder %s3509_s24, %s4401_s7 }
  0x3b   :  { %p3515_p12 = pnand %p3513_p11, %p3510_p10 }
  0x3d   :  { %3518 = shalt.err (!%p3515_p12)
}
  0x3e   :  { %s3519_s18 = scalar_lea.vmem %s3722_s26, 1024  ;;  %p3524_p0 = scmp.lt.s32.totalorder %s3722_s26, %s3722_s26 }
  0x3f   :  { %p3520_p13 = scmp.ne.s32.totalorder %s3722_s26, %s3519_s18  ;;  %p3525_p1 = scmp.lt.s32.totalorder %s3519_s18, %s3519_s18 }
  0x41   :  { %p3526_p2 = por %p3525_p1, %p3524_p0 }
  0x43   :  { %p3527_p3 = pnand %p3526_p2, %p3520_p13 }
  0x45   :  { %3530 = shalt.err (!%p3527_p3)
}
  0x46   :  { %71 = dma.hbm_to_vmem [thread:$0]  %s4401_s7, 1024, %s3722_s26, [#allocation11], %s3585_s21, %s3585_s21, %s3586_s22  }
  0x47   :  { %s3589_s19 = smov [#allocation15]   ;;  %s3590_s9 = smov [#allocation16]  }
  0x48   :  { %s91_s1 = sshll.u32 %s3589_s19, 4  ;;  %s105_s27 = sshll.u32 %s3590_s9, 4  ;;  %s92_s1 = int_to_ptr.vmem [resolvable:$true] %s91_s1  ;;  %s3759_s27 = int_to_ptr.vmem [resolvable:$true] %s105_s27 }
  0x49   :  { %s3531_s20 = scalar_lea.hbm %s4404_s10, 1024 }
  0x4a   :  { %p3532_p4 = scmp.ne.s32.totalorder %s4404_s10, %s3531_s20  ;;  %p3535_p5 = scmp.lt.u32.totalorder %s3531_s20, %s4404_s10 }
  0x4c   :  { %p3537_p6 = pnand %p3535_p5, %p3532_p4 }
  0x4e   :  { %3540 = shalt.err (!%p3537_p6)
}
  0x4f   :  { %s3541_s7 = scalar_lea.vmem %s92_s1, 1024  ;;  %p3546_p8 = scmp.lt.s32.totalorder %s92_s1, %s92_s1 }
  0x50   :  { %p3542_p7 = scmp.ne.s32.totalorder %s92_s1, %s3541_s7  ;;  %p3547_p9 = scmp.lt.s32.totalorder %s3541_s7, %s3541_s7 }
  0x52   :  { %p3548_p10 = por %p3547_p9, %p3546_p8 }
  0x54   :  { %p3549_p11 = pnand %p3548_p10, %p3542_p7 }
  0x56   :  { %3552 = shalt.err (!%p3549_p11)
}
  0x57   :  { %97 = dma.hbm_to_vmem [thread:$0]  %s4404_s10, 1024, %s92_s1, [#allocation14], %s3585_s21, %s3585_s21, %s3586_s22  }
  0x58   :  { %s3553_s23 = scalar_lea.hbm %s4406_s12, 2048 }
  0x59   :  { %p3554_p12 = scmp.ne.s32.totalorder %s4406_s12, %s3553_s23  ;;  %p3557_p13 = scmp.lt.u32.totalorder %s3553_s23, %s4406_s12 }
  0x5b   :  { %p3559_p0 = pnand %p3557_p13, %p3554_p12 }
  0x5d   :  { %3562 = shalt.err (!%p3559_p0)
}
  0x5e   :  { %s3563_s20 = scalar_lea.vmem %s3759_s27, 2048  ;;  %p3568_p2 = scmp.lt.s32.totalorder %s3759_s27, %s3759_s27 }
  0x5f   :  { %p3564_p1 = scmp.ne.s32.totalorder %s3759_s27, %s3563_s20  ;;  %p3569_p3 = scmp.lt.s32.totalorder %s3563_s20, %s3563_s20 }
  0x61   :  { %p3570_p4 = por %p3569_p3, %p3568_p2 }
  0x63   :  { %p3571_p5 = pnand %p3570_p4, %p3564_p1 }
  0x65   :  { %3574 = shalt.err (!%p3571_p5)
}
  0x66   :  { %111 = dma.hbm_to_vmem [thread:$0]  %s4406_s12, 2048, %s3759_s27, [#allocation17], %s3585_s21, %s3585_s21, %s3586_s22  }
  0x67   :  { %3575 = dma.done.wait [#allocation9], 512  }
  0x68   :  { %3576 = vsyncadd [#allocation9], 4294966784 }
  0x69   :  { %3577 = dma.done.wait [#allocation11], 1536  }
  0x6a   :  { %3578 = vsyncadd [#allocation11], 4294965760 }
  0x6b   :  { %3579 = dma.done.wait [#allocation14], 2048  }
  0x6c   :  { %3580 = vsyncadd [#allocation14], 4294965248 }
  0x6d   :  { %3581 = dma.done.wait [#allocation17], 2048  }
  0x6e   :  { %3582 = vsyncadd [#allocation17], 4294965248  ;;  %v3591_v0 = vmov 0.0   ;;  %v141_v1 = vld [vmem:[#allocation8 + $0x8] sm:$0xff]  ;;  %v143_v2 = vld [vmem:[#allocation8 + $0x18] sm:$0xff]  ;;  %s4415_s7 = sld [smem:[#allocation22_spill]]  ;;  %v352_v41 = vlaneseq }
  0x6f   :  { %215 = vmatprep.mubr.f32.mxu0 %v3591_v0  ;;  %301 = vmatprep.mubr.f32.mxu1 %v3591_v0  ;;  %v234_v3 = vld [vmem:[#allocation10 + $0x8] sm:$0xff]  ;;  %v3012_v4 = vpack.c.bf16 %v143_v2, %v141_v1  ;;  %v236_v5 = vld [vmem:[#allocation10 + $0x18] sm:$0xff]  ;;  %v140_v6 = vld [vmem:[#allocation8] sm:$0xff]  ;;  %vm144_vm0 = vcmask 130048   ;;  %v3592_v39 = vmov 1983009808  }
  0x70   :  { %v142_v7 = vld [vmem:[#allocation8 + $0x10] sm:$0xff]  ;;  %v3016_v8 = vpack.c.bf16 %v236_v5, %v234_v3  ;;  %v233_v10 = vld [vmem:[#allocation10] sm:$0xff]  ;;  %v319_v13 = vld [vmem:[%s4398_s4 + $0x8] sm:$0xff]  ;;  %v350_v40 = vunpack.c.l.s4 %v3592_v39  ;;  %s4416_s25 = sld [smem:[#allocation23_spill]]  ;;  %v353_v44 = vshrl.u32 %v352_v41, 7  ;;  %vm229_vm1 = vcmask 523264  }
  0x71   :  { %v3014_v9 = vpack.c.bf16 %v142_v7, %v140_v6  ;;  %v235_v11 = vld [vmem:[#allocation10 + $0x10] sm:$0xff]  ;;  %3013 = vmatprep.subr.bf16.mxu0 %v3012_v4  ;;  %v321_v14 = vld [vmem:[%s4398_s4 + $0x18] sm:$0xff]  ;;  %v318_v15 = vld [vmem:[%s4398_s4] sm:$0xff]  ;;  %vm468_vm2 = vcmask 254976   ;;  %s3594_s1 = smov 32   ;;  %vm730_vm3 = vcmask 259076  }
  0x72   :  { %v3018_v12 = vpack.c.bf16 %v235_v11, %v233_v10  ;;  %3017 = vmatprep.subr.bf16.mxu1 %v3016_v8  ;;  %v3810_v17 = vpack.c.bf16 %v321_v14, %v319_v13  ;;  %v320_v18 = vld [vmem:[%s4398_s4 + $0x10] sm:$0xff]  ;;  %v323_v19 = vld [vmem:[%s4398_s4 + $0x28] sm:$0xff]  ;;  %v325_v21 = vld [vmem:[%s4398_s4 + $0x38] sm:$0xff]  ;;  %v351_v43 = vunpack.c.0.s8 %v350_v40  ;;  %v3913_v56 = vsub.s32 0, %v353_v44 }
  0x73   :  { %3015 = vmatpush1.bf16.msra.mxu0 %v3014_v9  ;;  %v3818_v20 = vpack.c.bf16 %v320_v18, %v318_v15  ;;  %v322_v22 = vld [vmem:[%s4398_s4 + $0x20] sm:$0xff]  ;;  %v324_v23 = vld [vmem:[%s4398_s4 + $0x30] sm:$0xff]  ;;  %v3830_v24 = vpack.c.bf16 %v325_v21, %v323_v19  ;;  %v327_v25 = vld [vmem:[%s4398_s4 + $0x48] sm:$0xff]  ;;  %v3925_v10 = vsub.s32 1, %v353_v44  ;;  %vm602_vm4 = vcmask 257026  }
  0x74   :  { %v138_v16 = vld [vmem:[%s4415_s7] sm:$0xff]  ;;  %3019 = vmatpush1.bf16.msra.mxu1 %v3018_v12  ;;  %3021 = vmatprep.subr.bf16.mxu0 %v3810_v17  ;;  %v329_v26 = vld [vmem:[%s4398_s4 + $0x58] sm:$0xff]  ;;  %v139_v27 = vld [vmem:[%s4415_s7 + $0x8] sm:$0xff]  ;;  %v3845_v28 = vpack.c.bf16 %v324_v23, %v322_v22  ;;  %v354_v45 = vsub.s32 %v351_v43, %v353_v44  ;;  %vm858_vm5 = vcmask 261126   ;;  %vm1374_vm6 = vcmask 261120  }
  0x75   :  { %3037 = vmatprep.subr.bf16.mxu1 %v3810_v17  ;;  %v3849_v29 = vpack.c.bf16 %v329_v26, %v327_v25  ;;  %v326_v30 = vld [vmem:[%s4398_s4 + $0x40] sm:$0xff]  ;;  %v328_v31 = vld [vmem:[%s4398_s4 + $0x50] sm:$0xff]  ;;  %v331_v32 = vld [vmem:[%s4398_s4 + $0x68] sm:$0xff]  ;;  %vm2920_vm7 = vcmask 64512  }
  0x76   :  { %2931 = vmatmul.mubr.msk.f32.vlgmr.msra.gmra.mrb[0].mxu0 %vm144_vm0, %v138_v16  ;;  %v333_v33 = vld [vmem:[%s4398_s4 + $0x78] sm:$0xff]  ;;  %v3869_v34 = vpack.c.bf16 %v328_v31, %v326_v30  ;;  %v330_v36 = vld [vmem:[%s4398_s4 + $0x60] sm:$0xff]  ;;  %v332_v37 = vld [vmem:[%s4398_s4 + $0x70] sm:$0xff] }
  0x77   :  { %2933 = vmatmul.mubr.msk.f32.vlgmr.msra.gmra.mrb[0].mxu1 %vm144_vm0, %v138_v16  ;;  %3023 = vmatpush1.bf16.msra.mxu0 %v3818_v20  ;;  %v3872_v35 = vpack.c.bf16 %v333_v33, %v331_v32  ;;  %v3885_v38 = vpack.c.bf16 %v332_v37, %v330_v36  ;;  %v335_v42 = vld [vmem:[%s4416_s25] sm:$0xf] }
  0x78   :  { %221 = vmatprep.mubr.f32.mxu0 %v3591_v0  ;;  %307 = vmatprep.mubr.f32.mxu1 %v3591_v0  ;;  %v486_v46 = vcombine.low %v335_v42, %v335_v42  ;;  %v334_v57 = vld [vmem:[%s4399_s5] sm:$0x3]  ;;  %v3921_v63 = vrot.slane %v335_v42, %v354_v45  ;;  %s3593_s5 = smov 64  }
  0x79   :  { %3025 = vmatprep.subr.bf16.mxu0 %v3830_v24  ;;  %3039 = vmatpush1.bf16.msra.mxu1 %v3818_v20  ;;  %v3919_v59 = vrot.slane %v334_v57, %v3913_v56  ;;  %v3928_v12 = vrot.slane %v334_v57, %v3925_v10 }
  0x7a   :  { %2932 = vmatmul.mubr.msk.f32.gmra.mrb[2].mxu0 %vm144_vm0, %v139_v27  ;;  %3041 = vmatprep.subr.bf16.mxu1 %v3830_v24  ;;  %v3907_v47 = vrot.slane %v486_v46, %v354_v45  ;;  %v3932_v15 = vcombine.high %v3921_v63, %v3921_v63 }
  0x7b   :  { %2934 = vmatmul.mubr.msk.f32.gmra.mrb[2].mxu1 %vm144_vm0, %v139_v27  ;;  %3027 = vmatpush1.bf16.msra.mxu0 %v3845_v28 }
  0x7c   :  { %3029 = vmatprep.subr.bf16.mxu0 %v3849_v29  ;;  %439 = vmatprep.mubr.f32.mxu0 %v3591_v0 }
  0x7d   :  { %3043 = vmatpush1.bf16.msra.mxu1 %v3845_v28  ;;  %565 = vmatprep.mubr.f32.mxu1 %v3591_v0 }
  0x7e   :  { %3045 = vmatprep.subr.bf16.mxu1 %v3849_v29 }
  0x7f   :  { %3031 = vmatpush1.bf16.msra.mxu0 %v3869_v34 }
  0x80   :  { %3033 = vmatprep.subr.bf16.mxu0 %v3872_v35 }
  0x81   :  { %3047 = vmatpush1.bf16.msra.mxu1 %v3869_v34 }
  0x82   :  { %3049 = vmatprep.subr.bf16.mxu1 %v3872_v35 }
  0x83   :  { %3035 = vmatpush1.bf16.msra.mxu0 %v3885_v38 }
  0x84   :  { %3053 = vmatprep.subr.bf16.mxu0 %v3810_v17 }
  0x85   :  { %3051 = vmatpush1.bf16.msra.mxu1 %v3885_v38 }
  0x86   :  { %440 = vmatmul.mubr.f32.vlgmr.msra.gmra.mrb[4].mxu0 %v3591_v0  ;;  %3069 = vmatprep.subr.bf16.mxu1 %v3810_v17 }
  0x87   :  { %3055 = vmatpush1.bf16.msra.mxu0 %v3818_v20  ;;  %693 = vmatprep.mubr.f32.mxu0 %v3591_v0 }
  0x88   :  { %3057 = vmatprep.subr.bf16.mxu0 %v3830_v24 }
  0x8b   :  { %3059 = vmatpush1.bf16.msra.mxu0 %v3845_v28 }
  0x8c   :  { %3061 = vmatprep.subr.bf16.mxu0 %v3849_v29 }
  0x8f   :  { %3063 = vmatpush1.bf16.msra.mxu0 %v3869_v34 }
  0x90   :  { %3065 = vmatprep.subr.bf16.mxu0 %v3872_v35 }
  0x93   :  { %3067 = vmatpush1.bf16.msra.mxu0 %v3885_v38 }
  0x94   :  { %3085 = vmatprep.subr.bf16.mxu0 %v3810_v17 }
 0x149   :  { %v217_v48 = vpop.f32.mrb[0].mxu0 }
 0x14a   :  { %228 = vst [vmem:[#allocation2] sm:$0xff] %v217_v48  ;;  %v303_v49 = vpop.f32.mrb[0].mxu1  ;;  %v219_v50 = vpop.f32.mrb[1].mxu0 }
 0x14b   :  { %314 = vst [vmem:[#allocation3] sm:$0xff] %v303_v49  ;;  %230 = vst.msk [vmem:[#allocation2 + $0x8] sm:$0xff] %vm229_vm1, %v219_v50  ;;  %v305_v51 = vpop.f32.mrb[1].mxu1 }
 0x14c   :  { %315 = vst.msk [vmem:[#allocation3 + $0x8] sm:$0xff] %vm229_vm1, %v305_v51 }
 0x14d   :  { %v223_v52 = vpop.f32.mrb[2].mxu0 }
 0x14e   :  { %231 = vst [vmem:[#allocation2 + $0x10] sm:$0xff] %v223_v52  ;;  %v309_v53 = vpop.f32.mrb[2].mxu1  ;;  %v225_v54 = vpop.f32.mrb[3].mxu0 }
 0x14f   :  { %316 = vst [vmem:[#allocation3 + $0x10] sm:$0xff] %v309_v53  ;;  %232 = vst.msk [vmem:[#allocation2 + $0x18] sm:$0xff] %vm229_vm1, %v225_v54  ;;  %v311_v55 = vpop.f32.mrb[3].mxu1 }
 0x150   :  { %317 = vst.msk [vmem:[#allocation3 + $0x18] sm:$0xff] %vm229_vm1, %v311_v55  ;;  %v3957_v55 = vcombine.high %v3907_v47, %v3907_v47 }
 0x151   :  { %v336_v61 = vld [vmem:[#allocation2] sm:$0x3]  ;;  %v474_v37 = vld [vmem:[#allocation2] sm:$0xc] }
 0x152   :  { %v337_v13 = vld [vmem:[#allocation2 + $0x8] sm:$0x3]  ;;  %v475_v53 = vld [vmem:[#allocation2 + $0x8] sm:$0xc] }
 0x156   :  { %v338_v58 = vld [vmem:[#allocation3 + $0x10] sm:$0xc0]  ;;  %v476_v33 = vld [vmem:[#allocation3 + $0x10] sm:$0x30] }
 0x157   :  { %v342_v60 = vrot.slane %v338_v58, 6  ;;  %v339_v9 = vld [vmem:[#allocation3 + $0x18] sm:$0xc0]  ;;  %v480_v36 = vrot.slane %v476_v33, 2  ;;  %v477_v50 = vld [vmem:[#allocation3 + $0x18] sm:$0x30] }
 0x158   :  { %v343_v11 = vrot.slane %v339_v9, 6  ;;  %v481_v51 = vrot.slane %v477_v50, 2  ;;  %v611_v33 = vld [vmem:[#allocation3 + $0x18] sm:$0xc] }
 0x159   :  { %v346_v62 = vadd.f32 %v342_v60, %v336_v61  ;;  %v441_v1 = vpop.f32.mrb[4].mxu0  ;;  %v484_v39 = vadd.f32 %v480_v36, %v474_v37  ;;  %v615_v36 = vrot.slane %v611_v33, 6 }
 0x15a   :  { %v442_v2 = vadd.f32 %v441_v1, %v3919_v59  ;;  %v443_v3 = vpop.f32.mrb[5].mxu0  ;;  %v347_v14 = vadd.f32 %v343_v11, %v337_v13  ;;  %v485_v54 = vadd.f32 %v481_v51, %v475_v53  ;;  %v610_v11 = vld [vmem:[#allocation3 + $0x10] sm:$0xc] }
 0x15b   :  { %v359_v4 = vadd.f32 %v3921_v63, %v346_v62  ;;  %v444_v16 = vadd.f32 %v443_v3, %v3928_v12  ;;  %v497_v43 = vadd.f32 %v3907_v47, %v484_v39  ;;  %v614_v13 = vrot.slane %v610_v11, 6  ;;  %v609_v39 = vld [vmem:[#allocation2 + $0x8] sm:$0x30] }
 0x15c   :  { %v360_v19 = vadd.f32 %v3932_v15, %v347_v14  ;;  %v498_v60 = vadd.f32 %v3957_v55, %v485_v54  ;;  %v608_v14 = vld [vmem:[#allocation2] sm:$0x30] }
 0x15d   :  { %v446_v5 = vadd.f32 %v442_v2, %v359_v4 }
 0x15f   :  { %v2935_v6 = vmul.f32 -1.442695, %v446_v5 }
 0x161   :  { %3347 = vpow2.f32 %v2935_v6 }
 0x16b   :  { %v3348_v7 = vpop.eup %3347 }
 0x16c   :  { %v450_v8 = vadd.f32 1.0, %v3348_v7 }
 0x16e   :  { %3349 = vrcp.f32 %v450_v8 }
 0x178   :  { %v3350_v18 = vpop.eup %3349 }
 0x179   :  { %v453_v21 = vmul.f32 %v3350_v18, %v444_v16  ;;  %v456_v25 = vsub.f32 1.0, %v3350_v18  ;;  %v462_v27 = vmul.f32 0.0, %v3350_v18  ;;  %v618_v16 = vadd.f32 %v614_v13, %v608_v14  ;;  %v739_v13 = vld [vmem:[#allocation3 + $0x18] sm:$0x3] }
 0x17a   :  { %v743_v14 = vrot.slane %v739_v13, 2 }
 0x17b   :  { %v454_v22 = vadd.f32 %v453_v21, %v360_v19  ;;  %v3978_v19 = vcombine.low %v3921_v63, %v3921_v63 }
 0x17d   :  { %3351 = vtanh.f32 %v454_v22 }
 0x187   :  { %v3352_v23 = vpop.eup %3351 }
 0x188   :  { %458 = vrot.lane.b32.xlu0 %v3352_v23, %s3593_s5  ;;  %v622_v23 = vadd.f32 %v3978_v19, %v618_v16 }
 0x1fa   :  { %v459_v26 = vpop.permute.xlu0 %458 }
 0x1fb   :  { %v461_v30 = vmul.f32 %v459_v26, %v456_v25 }
 0x1fd   :  { %v3937_v31 = vadd.f32 %v462_v27, %v461_v30 }
 0x1ff   :  { %465 = vrot.lane.b32.xlu0 %v3937_v31, %s3593_s5  ;;  %v594_v3 = vrot.slane %v3937_v31, 6 }
 0x271   :  { %v466_v32 = vpop.permute.xlu0 %465 }
 0x272   :  { %469 = vst.msk [vmem:[#allocation4] sm:$0x3] %vm468_vm2, %v466_v32  ;;  %2936 = vmatmul.mubr.msk.f32.vlgmr.msra.gmra.mrb[4].mxu1 %vm229_vm1, %v466_v32 }
 0x273   :  { %3071 = vmatpush1.bf16.msra.mxu1 %v3818_v20  ;;  %821 = vmatprep.mubr.f32.mxu1 %v3591_v0 }
 0x274   :  { %3073 = vmatprep.subr.bf16.mxu1 %v3830_v24 }
 0x277   :  { %3075 = vmatpush1.bf16.msra.mxu1 %v3845_v28 }
 0x278   :  { %3077 = vmatprep.subr.bf16.mxu1 %v3849_v29 }
 0x27b   :  { %3079 = vmatpush1.bf16.msra.mxu1 %v3869_v34 }
 0x27c   :  { %3081 = vmatprep.subr.bf16.mxu1 %v3872_v35 }
 0x27f   :  { %3083 = vmatpush1.bf16.msra.mxu1 %v3885_v38 }
 0x280   :  { %3101 = vmatprep.subr.bf16.mxu1 %v3810_v17 }
 0x345   :  { %v567_v40 = vpop.f32.mrb[4].mxu1 }
 0x346   :  { %v568_v41 = vadd.f32 %v567_v40, %v3919_v59  ;;  %v569_v42 = vpop.f32.mrb[5].mxu1  ;;  %v619_v40 = vadd.f32 %v615_v36, %v609_v39 }
 0x347   :  { %v570_v52 = vadd.f32 %v569_v42, %v3928_v12 }
 0x348   :  { %v573_v44 = vrot.slane %v568_v41, 6 }
 0x349   :  { %v583_v57 = vrot.slane %v570_v52, 6 }
 0x34a   :  { %v575_v45 = vadd.f32 %v573_v44, %v497_v43  ;;  %v623_v43 = vadd.f32 %v619_v40, %v3921_v63 }
 0x34c   :  { %v2937_v46 = vmul.f32 -1.442695, %v575_v45 }
 0x34e   :  { %3353 = vpow2.f32 %v2937_v46 }
 0x358   :  { %v3354_v48 = vpop.eup %3353 }
 0x359   :  { %v579_v49 = vadd.f32 1.0, %v3354_v48 }
 0x35b   :  { %3355 = vrcp.f32 %v579_v49 }
 0x365   :  { %v3356_v58 = vpop.eup %3355 }
 0x366   :  { %v585_v61 = vmul.f32 %v3356_v58, %v583_v57  ;;  %v588_v2 = vsub.f32 1.0, %v3356_v58  ;;  %v596_v6 = vmul.f32 %v3356_v58, %v594_v3  ;;  %v738_v58 = vld [vmem:[#allocation3 + $0x10] sm:$0x3] }
 0x368   :  { %v586_v62 = vadd.f32 %v585_v61, %v498_v60  ;;  %v742_v60 = vrot.slane %v738_v58, 2  ;;  %v736_v61 = vld [vmem:[#allocation2] sm:$0xc0] }
 0x36a   :  { %3357 = vtanh.f32 %v586_v62  ;;  %v746_v62 = vadd.f32 %v742_v60, %v736_v61  ;;  %v867_v60 = vld [vmem:[#allocation3 + $0x8] sm:$0xc0]  ;;  %v865_v61 = vld [vmem:[#allocation2 + $0x18] sm:$0x3] }
 0x374   :  { %v3358_v1 = vpop.eup %3357 }
 0x375   :  { %590 = vrot.lane.b32.xlu1 %v3358_v1, %s3593_s5 }
 0x3e7   :  { %v591_v4 = vpop.permute.xlu1 %590 }
 0x3e8   :  { %v593_v5 = vmul.f32 %v591_v4, %v588_v2  ;;  %v4002_v2 = vcombine.low %v3907_v47, %v3907_v47 }
 0x3ea   :  { %v3962_v7 = vadd.f32 %v596_v6, %v593_v5  ;;  %v750_v5 = vadd.f32 %v4002_v2, %v746_v62  ;;  %v871_v62 = vrot.slane %v867_v60, 6 }
 0x3ec   :  { %v624_v8 = vrot.slane %v3962_v7, 2  ;;  %v722_v49 = vrot.slane %v3962_v7, 6 }
 0x3ee   :  { %625 = vrot.lane.b32.xlu1 %v624_v8, %s3593_s5 }
 0x460   :  { %v626_v9 = vpop.permute.xlu1 %625 }
 0x461   :  { %2938 = vmatmul.mubr.msk.f32.vlgmr.msra.gmra.mrb[6].mxu0 %vm229_vm1, %v626_v9 }
 0x462   :  { %3087 = vmatpush1.bf16.msra.mxu0 %v3818_v20  ;;  %947 = vmatprep.mubr.f32.mxu0 %v3591_v0 }
 0x463   :  { %3089 = vmatprep.subr.bf16.mxu0 %v3830_v24 }
 0x466   :  { %3091 = vmatpush1.bf16.msra.mxu0 %v3845_v28 }
 0x467   :  { %3093 = vmatprep.subr.bf16.mxu0 %v3849_v29 }
 0x46a   :  { %3095 = vmatpush1.bf16.msra.mxu0 %v3869_v34 }
 0x46b   :  { %3097 = vmatprep.subr.bf16.mxu0 %v3872_v35 }
 0x46e   :  { %3099 = vmatpush1.bf16.msra.mxu0 %v3885_v38 }
 0x46f   :  { %3117 = vmatprep.subr.bf16.mxu0 %v3810_v17 }
 0x534   :  { %v695_v18 = vpop.f32.mrb[6].mxu0 }
 0x535   :  { %v696_v21 = vadd.f32 %v695_v18, %v3919_v59  ;;  %v697_v22 = vpop.f32.mrb[7].mxu0  ;;  %v737_v18 = vld [vmem:[#allocation2 + $0x8] sm:$0xc0] }
 0x536   :  { %v698_v37 = vadd.f32 %v697_v22, %v3928_v12 }
 0x537   :  { %v701_v25 = vrot.slane %v696_v21, 4  ;;  %v747_v21 = vadd.f32 %v743_v14, %v737_v18 }
 0x538   :  { %v711_v41 = vrot.slane %v698_v37, 4 }
 0x539   :  { %v703_v26 = vadd.f32 %v701_v25, %v622_v23  ;;  %v751_v25 = vadd.f32 %v747_v21, %v3907_v47  ;;  %v982_v21 = vld [vmem:[#allocation2 + $0x10] sm:$0xc] }
 0x53b   :  { %v2939_v27 = vmul.f32 -1.442695, %v703_v26 }
 0x53d   :  { %3359 = vpow2.f32 %v2939_v27 }
 0x547   :  { %v3360_v30 = vpop.eup %3359 }
 0x548   :  { %v707_v32 = vadd.f32 1.0, %v3360_v30 }
 0x54a   :  { %3361 = vrcp.f32 %v707_v32 }
 0x554   :  { %v3362_v42 = vpop.eup %3361 }
 0x555   :  { %v713_v44 = vmul.f32 %v3362_v42, %v711_v41  ;;  %v716_v48 = vsub.f32 1.0, %v3362_v42  ;;  %v724_v51 = vmul.f32 %v3362_v42, %v722_v49 }
 0x557   :  { %v714_v45 = vadd.f32 %v713_v44, %v623_v43  ;;  %v866_v43 = vld [vmem:[#allocation3] sm:$0xc0]  ;;  %v864_v44 = vld [vmem:[#allocation2 + $0x10] sm:$0x3] }
 0x559   :  { %3363 = vtanh.f32 %v714_v45  ;;  %v870_v45 = vrot.slane %v866_v43, 6 }
 0x563   :  { %v3364_v46 = vpop.eup %3363 }
 0x564   :  { %718 = vrot.lane.b32.xlu0 %v3364_v46, %s3593_s5  ;;  %v874_v46 = vadd.f32 %v870_v45, %v864_v44 }
 0x566   :  { %v876_v49 = vadd.f32 %v874_v46, %v3921_v63 }
 0x5d6   :  { %v719_v50 = vpop.permute.xlu0 %718 }
 0x5d7   :  { %v721_v52 = vmul.f32 %v719_v50, %v716_v48 }
 0x5d9   :  { %v3986_v53 = vadd.f32 %v724_v51, %v721_v52 }
 0x5db   :  { %v752_v54 = vrot.slane %v3986_v53, 4  ;;  %v850_v33 = vrot.slane %v3986_v53, 6 }
 0x5dd   :  { %753 = vrot.lane.b32.xlu1 %v752_v54, %s3593_s5 }
 0x64f   :  { %v754_v57 = vpop.permute.xlu1 %753 }
 0x650   :  { %2940 = vmatmul.mubr.msk.f32.vlgmr.msra.gmra.mrb[6].mxu1 %vm229_vm1, %v754_v57 }
 0x651   :  { %3103 = vmatpush1.bf16.msra.mxu1 %v3818_v20  ;;  %1062 = vmatprep.mubr.f32.mxu1 %v3591_v0 }
 0x652   :  { %3105 = vmatprep.subr.bf16.mxu1 %v3830_v24 }
 0x655   :  { %3107 = vmatpush1.bf16.msra.mxu1 %v3845_v28 }
 0x656   :  { %3109 = vmatprep.subr.bf16.mxu1 %v3849_v29 }
 0x659   :  { %3111 = vmatpush1.bf16.msra.mxu1 %v3869_v34 }
 0x65a   :  { %3113 = vmatprep.subr.bf16.mxu1 %v3872_v35 }
 0x65d   :  { %3115 = vmatpush1.bf16.msra.mxu1 %v3885_v38 }
 0x65e   :  { %3133 = vmatprep.subr.bf16.mxu1 %v3810_v17 }
 0x723   :  { %v823_v1 = vpop.f32.mrb[6].mxu1 }
 0x724   :  { %v824_v3 = vadd.f32 %v823_v1, %v3919_v59  ;;  %v825_v4 = vpop.f32.mrb[7].mxu1  ;;  %v875_v1 = vadd.f32 %v871_v62, %v865_v61 }
 0x725   :  { %v826_v16 = vadd.f32 %v825_v4, %v3928_v12 }
 0x726   :  { %v829_v6 = vrot.slane %v824_v3, 2 }
 0x727   :  { %v839_v22 = vrot.slane %v826_v16, 2 }
 0x728   :  { %v831_v8 = vadd.f32 %v829_v6, %v750_v5  ;;  %v877_v5 = vadd.f32 %v875_v1, %v3932_v15  ;;  %v984_v15 = vld [vmem:[#allocation3] sm:$0x30] }
 0x72a   :  { %v2941_v9 = vmul.f32 -1.442695, %v831_v8 }
 0x72c   :  { %3365 = vpow2.f32 %v2941_v9 }
 0x736   :  { %v3366_v11 = vpop.eup %3365 }
 0x737   :  { %v835_v17 = vadd.f32 1.0, %v3366_v11 }
 0x739   :  { %3367 = vrcp.f32 %v835_v17 }
 0x743   :  { %v3368_v23 = vpop.eup %3367 }
 0x744   :  { %v841_v26 = vmul.f32 %v3368_v23, %v839_v22  ;;  %v844_v32 = vsub.f32 1.0, %v3368_v23  ;;  %v852_v37 = vmul.f32 %v3368_v23, %v850_v33  ;;  %v988_v22 = vrot.slane %v984_v15, 2 }
 0x746   :  { %v842_v27 = vadd.f32 %v841_v26, %v751_v25  ;;  %v992_v23 = vadd.f32 %v988_v22, %v982_v21 }
 0x748   :  { %3369 = vtanh.f32 %v842_v27 }
 0x752   :  { %v3370_v30 = vpop.eup %3369 }
 0x753   :  { %846 = vrot.lane.b32.xlu0 %v3370_v30, %s3593_s5 }
 0x7c5   :  { %v847_v36 = vpop.permute.xlu0 %846 }
 0x7c6   :  { %v849_v39 = vmul.f32 %v847_v36, %v844_v32  ;;  %v983_v32 = vld [vmem:[#allocation2 + $0x18] sm:$0xc] }
 0x7c8   :  { %v4010_v40 = vadd.f32 %v852_v37, %v849_v39 }
 0x7ca   :  { %v878_v41 = vrot.slane %v4010_v40, 6 }
 0x7cc   :  { %879 = vrot.lane.b32.xlu1 %v878_v41, %s3593_s5 }
 0x83e   :  { %v880_v42 = vpop.permute.xlu1 %879 }
 0x83f   :  { %2942 = vmatmul.mubr.msk.f32.vlgmr.msra.gmra.mrb[8].mxu0 %vm229_vm1, %v880_v42 }
 0x840   :  { %3119 = vmatpush1.bf16.msra.mxu0 %v3818_v20  ;;  %1187 = vmatprep.mubr.f32.mxu0 %v3591_v0 }
 0x841   :  { %3121 = vmatprep.subr.bf16.mxu0 %v3830_v24 }
 0x844   :  { %3123 = vmatpush1.bf16.msra.mxu0 %v3845_v28 }
 0x845   :  { %3125 = vmatprep.subr.bf16.mxu0 %v3849_v29 }
 0x848   :  { %3127 = vmatpush1.bf16.msra.mxu0 %v3869_v34 }
 0x849   :  { %3129 = vmatprep.subr.bf16.mxu0 %v3872_v35 }
 0x84c   :  { %3131 = vmatpush1.bf16.msra.mxu0 %v3885_v38 }
 0x912   :  { %v949_v48 = vpop.f32.mrb[8].mxu0 }
 0x913   :  { %v950_v50 = vadd.f32 %v949_v48, %v3919_v59  ;;  %v951_v51 = vpop.f32.mrb[9].mxu0 }
 0x914   :  { %v952_v3 = vadd.f32 %v951_v51, %v3928_v12 }
 0x915   :  { %v954_v52 = vadd.f32 %v950_v50, %v876_v49 }
 0x917   :  { %v2943_v54 = vmul.f32 -1.442695, %v954_v52 }
 0x919   :  { %3371 = vpow2.f32 %v2943_v54 }
 0x923   :  { %v3372_v57 = vpop.eup %3371 }
 0x924   :  { %v958_v58 = vadd.f32 1.0, %v3372_v57  ;;  %v1104_v57 = vld [vmem:[#allocation2 + $0x10] sm:$0x30] }
 0x926   :  { %3373 = vrcp.f32 %v958_v58 }
 0x930   :  { %v3374_v4 = vpop.eup %3373 }
 0x931   :  { %v961_v6 = vmul.f32 %v3374_v4, %v952_v3  ;;  %v964_v11 = vsub.f32 1.0, %v3374_v4  ;;  %v971_v13 = vmul.f32 %v3374_v4, %v878_v41 }
 0x933   :  { %v962_v8 = vadd.f32 %v961_v6, %v877_v5 }
 0x935   :  { %3375 = vtanh.f32 %v962_v8 }
 0x93f   :  { %v3376_v9 = vpop.eup %3375 }
 0x940   :  { %966 = vrot.lane.b32.xlu0 %v3376_v9, %s3593_s5 }
 0x9b2   :  { %v967_v17 = vpop.permute.xlu0 %966 }
 0x9b3   :  { %v969_v14 = vmul.f32 %v967_v17, %v964_v11  ;;  %v1107_v11 = vld [vmem:[#allocation3 + $0x8] sm:$0xc]  ;;  %v1105_v17 = vld [vmem:[#allocation2 + $0x18] sm:$0x30] }
 0x9b5   :  { %v4028_v16 = vadd.f32 %v971_v13, %v969_v14  ;;  %v1111_v13 = vrot.slane %v1107_v11, 6  ;;  %v1368_v11 = vld [vmem:[#allocation12 + $0x10] sm:$0xff] }
 0x9b7   :  { %974 = vrot.lane.b32.xlu1 %v4028_v16, %s3593_s5  ;;  %v1091_v46 = vrot.slane %v4028_v16, 6 }
 0xa29   :  { %v975_v18 = vpop.permute.xlu1 %974 }
 0xa2a   :  { %977 = vst.msk [vmem:[#allocation4 + $0x8] sm:$0x3] %vm468_vm2, %v975_v18  ;;  %2944 = vmatmul.mubr.msk.f32.vlgmr.msra.gmra.mrb[8].mxu1 %vm229_vm1, %v975_v18  ;;  %v1115_v18 = vadd.f32 %v1111_v13, %v1105_v17  ;;  %v1373_v13 = vld [vmem:[#allocation12 + $0x38] sm:$0xff] }
 0xa2b   :  { %3135 = vmatpush1.bf16.msra.mxu1 %v3818_v20  ;;  %1312 = vmatprep.mubr.f32.mxu1 %v3591_v0 }
 0xa2c   :  { %3137 = vmatprep.subr.bf16.mxu1 %v3830_v24  ;;  %v994_v24 = vadd.f32 %v992_v23, %v3907_v47  ;;  %v1117_v22 = vadd.f32 %v1115_v18, %v3921_v63  ;;  %v1370_v18 = vld [vmem:[#allocation12 + $0x20] sm:$0xff] }
 0xa2f   :  { %3139 = vmatpush1.bf16.msra.mxu1 %v3845_v28 }
 0xa30   :  { %3141 = vmatprep.subr.bf16.mxu1 %v3849_v29 }
 0xa33   :  { %3143 = vmatpush1.bf16.msra.mxu1 %v3869_v34 }
 0xa34   :  { %3145 = vmatprep.subr.bf16.mxu1 %v3872_v35  ;;  %v985_v35 = vld [vmem:[#allocation3 + $0x8] sm:$0x30] }
 0xa37   :  { %3147 = vmatpush1.bf16.msra.mxu1 %v3885_v38  ;;  %v989_v38 = vrot.slane %v985_v35, 2 }
 0xa39   :  { %v993_v36 = vadd.f32 %v989_v38, %v983_v32 }
 0xa3b   :  { %v995_v41 = vadd.f32 %v993_v36, %v3957_v55  ;;  %v1106_v55 = vld [vmem:[#allocation3] sm:$0xc]  ;;  %v1231_v36 = vld [vmem:[#allocation3] sm:$0x3] }
 0xa3c   :  { %v1110_v58 = vrot.slane %v1106_v55, 6  ;;  %v1230_v55 = vld [vmem:[#allocation2 + $0x18] sm:$0xc0] }
 0xa3e   :  { %v1114_v60 = vadd.f32 %v1110_v58, %v1104_v57 }
 0xa40   :  { %v1116_v3 = vadd.f32 %v1114_v60, %v3978_v19 }
 0xafd   :  { %v1064_v25 = vpop.f32.mrb[8].mxu1 }
 0xafe   :  { %v1065_v20 = vadd.f32 %v1064_v25, %v3919_v59  ;;  %v1066_v26 = vpop.f32.mrb[9].mxu1 }
 0xaff   :  { %v1067_v33 = vadd.f32 %v1066_v26, %v3928_v12 }
 0xb00   :  { %v1070_v27 = vrot.slane %v1065_v20, 6 }
 0xb01   :  { %v1080_v37 = vrot.slane %v1067_v33, 6 }
 0xb02   :  { %v1072_v28 = vadd.f32 %v1070_v27, %v994_v24 }
 0xb04   :  { %v2945_v30 = vmul.f32 -1.442695, %v1072_v28 }
 0xb06   :  { %3377 = vpow2.f32 %v2945_v30 }
 0xb10   :  { %v3378_v29 = vpop.eup %3377 }
 0xb11   :  { %v1076_v34 = vadd.f32 1.0, %v3378_v29 }
 0xb13   :  { %3379 = vrcp.f32 %v1076_v34 }
 0xb1d   :  { %v3380_v39 = vpop.eup %3379 }
 0xb1e   :  { %v1082_v42 = vmul.f32 %v3380_v39, %v1080_v37  ;;  %v1085_v45 = vsub.f32 1.0, %v3380_v39  ;;  %v1093_v50 = vmul.f32 %v3380_v39, %v1091_v46  ;;  %v1229_v37 = vld [vmem:[#allocation2 + $0x10] sm:$0xc0]  ;;  %v1235_v39 = vrot.slane %v1231_v36, 2 }
 0xb20   :  { %v1083_v43 = vadd.f32 %v1082_v42, %v995_v41  ;;  %v1239_v41 = vadd.f32 %v1235_v39, %v1229_v37  ;;  %v1752_v37 = vld [vmem:[#allocation16 + $0x8] sm:$0xff]  ;;  %v1754_v39 = vld [vmem:[#allocation16 + $0x18] sm:$0xff] }
 0xb22   :  { %3381 = vtanh.f32 %v1083_v43 }
 0xb2c   :  { %v3382_v44 = vpop.eup %3381 }
 0xb2d   :  { %1087 = vrot.lane.b32.xlu0 %v3382_v44, %s3593_s5 }
 0xb9f   :  { %v1088_v48 = vpop.permute.xlu0 %1087 }
 0xba0   :  { %v1090_v49 = vmul.f32 %v1088_v48, %v1085_v45  ;;  %v1241_v45 = vadd.f32 %v1239_v41, %v4002_v2  ;;  %v4122_v41 = vpack.c.bf16 %v1754_v39, %v1752_v37 }
 0xba2   :  { %v4048_v51 = vadd.f32 %v1093_v50, %v1090_v49 }
 0xba4   :  { %v1118_v52 = vrot.slane %v4048_v51, 2  ;;  %v1216_v26 = vrot.slane %v4048_v51, 6 }
 0xba6   :  { %1119 = vrot.lane.b32.xlu1 %v1118_v52, %s3593_s5 }
 0xc18   :  { %v1120_v54 = vpop.permute.xlu1 %1119 }
 0xc19   :  { %2946 = vmatmul.mubr.msk.f32.vlgmr.msra.gmra.mrb[10].mxu0 %vm229_vm1, %v1120_v54  ;;  %v1232_v54 = vld [vmem:[#allocation3 + $0x8] sm:$0x3] }
 0xc1a   :  { %1528 = vmatprep.mubr.f32.mxu0 %v3591_v0  ;;  %v1236_v57 = vrot.slane %v1232_v54, 2 }
 0xc1c   :  { %v1240_v60 = vadd.f32 %v1236_v57, %v1230_v55  ;;  %v1564_v55 = vld [vmem:[#allocation13 + $0x18] sm:$0xff] }
 0xcec   :  { %v1189_v61 = vpop.f32.mrb[10].mxu0 }
 0xced   :  { %v1190_v62 = vadd.f32 %v1189_v61, %v3919_v59  ;;  %v1191_v1 = vpop.f32.mrb[11].mxu0 }
 0xcee   :  { %v1192_v14 = vadd.f32 %v1191_v1, %v3928_v12 }
 0xcef   :  { %v1195_v4 = vrot.slane %v1190_v62, 4 }
 0xcf0   :  { %v1205_v15 = vrot.slane %v1192_v14, 4 }
 0xcf1   :  { %v1197_v5 = vadd.f32 %v1195_v4, %v1116_v3 }
 0xcf3   :  { %v2947_v6 = vmul.f32 -1.442695, %v1197_v5 }
 0xcf5   :  { %3383 = vpow2.f32 %v2947_v6  ;;  %v1367_v6 = vld [vmem:[#allocation12 + $0x8] sm:$0xff] }
 0xcff   :  { %v3384_v8 = vpop.eup %3383 }
 0xd00   :  { %v1201_v9 = vadd.f32 1.0, %v3384_v8  ;;  %v1369_v8 = vld [vmem:[#allocation12 + $0x18] sm:$0xff] }
 0xd02   :  { %3385 = vrcp.f32 %v1201_v9  ;;  %v1366_v9 = vld [vmem:[#allocation12] sm:$0xff] }
 0xd03   :  { %v3150_v17 = vpack.c.bf16 %v1368_v11, %v1366_v9  ;;  %v1565_v9 = vld [vmem:[#allocation13 + $0x20] sm:$0xff]  ;;  %v1567_v11 = vld [vmem:[#allocation13 + $0x30] sm:$0xff] }
 0xd0c   :  { %v3386_v21 = vpop.eup %3385 }
 0xd0d   :  { %v1207_v23 = vmul.f32 %v3386_v21, %v1205_v15  ;;  %v1210_v20 = vsub.f32 1.0, %v3386_v21  ;;  %v1218_v27 = vmul.f32 %v3386_v21, %v1216_v26  ;;  %v1372_v15 = vld [vmem:[#allocation12 + $0x30] sm:$0xff]  ;;  %v1570_v21 = vld [vmem:[#allocation15 + $0x8] sm:$0xff]  ;;  %v1361_v26 = vld [vmem:[%s4400_s6 + $0x18] sm:$0xff] }
 0xd0f   :  { %v1208_v25 = vadd.f32 %v1207_v23, %v1117_v22  ;;  %v3154_v22 = vpack.c.bf16 %v1372_v15, %v1370_v18  ;;  %v1572_v23 = vld [vmem:[#allocation15 + $0x18] sm:$0xff]  ;;  %v1755_v18 = vld [vmem:[#allocation16 + $0x20] sm:$0xff]  ;;  %v1757_v15 = vld [vmem:[#allocation16 + $0x30] sm:$0xff] }
 0xd11   :  { %3387 = vtanh.f32 %v1208_v25  ;;  %v3164_v25 = vpack.c.bf16 %v1572_v23, %v1570_v21  ;;  %v3178_v21 = vpack.c.bf16 %v1567_v11, %v1565_v9  ;;  %v1762_v23 = vld [vmem:[#allocation16 + $0x58] sm:$0xff] }
 0xd1b   :  { %v3388_v19 = vpop.eup %3387 }
 0xd1c   :  { %1212 = vrot.lane.b32.xlu0 %v3388_v19, %s3593_s5 }
 0xd8e   :  { %v1213_v24 = vpop.permute.xlu0 %1212 }
 0xd8f   :  { %v1215_v28 = vmul.f32 %v1213_v24, %v1210_v20 }
 0xd91   :  { %v1219_v30 = vadd.f32 %v1218_v27, %v1215_v28  ;;  %v1358_v28 = vld [vmem:[%s4400_s6] sm:$0xff] }
 0xd93   :  { %v1243_v29 = vrot.slane %v1219_v30, 4  ;;  %v1341_v62 = vrot.slane %v1219_v30, 6 }
 0xd95   :  { %1244 = vrot.lane.b32.xlu1 %v1243_v29, %s3593_s5 }
 0xd99   :  { %978 = vrot.lane.b32.xlu1 %v4028_v16, %s3594_s1 }
 0xd9d   :  { %1225 = vrot.lane.b32.xlu1 %v1219_v30, %s3594_s1 }
 0xda1   :  { %470 = vrot.lane.b32.xlu1 %v3937_v31, %s3594_s1 }
 0xda5   :  { %732 = vrot.lane.b32.xlu1 %v3986_v53, %s3594_s1 }
 0xda9   :  { %599 = vrot.lane.b32.xlu1 %v3962_v7, %s3593_s5 }
 0xdad   :  { %855 = vrot.lane.b32.xlu1 %v4010_v40, %s3593_s5 }
 0xdb1   :  { %1221 = vrot.lane.b32.xlu1 %v1219_v30, %s3593_s5  ;;  %v1360_v30 = vld [vmem:[%s4400_s6 + $0x10] sm:$0xff] }
 0xdb2   :  { %v3158_v29 = vpack.c.bf16 %v1360_v30, %v1358_v28 }
 0xe07   :  { %v1245_v63 = vpop.permute.xlu1 %1244 }
 0xe08   :  { %2948 = vmatmul.mubr.msk.f32.vlgmr.msra.gmra.mrb[10].mxu1 %vm229_vm1, %v1245_v63 }
 0xe09   :  { %1445 = vmatprep.mubr.f32.mxu1 %v3591_v0 }
 0xe0b   :  { %v979_v16 = vpop.permute.xlu1 %978 }
 0xe0c   :  { %981 = vst.msk [vmem:[#allocation5 + $0x6] sm:$0x3] %vm468_vm2, %v979_v16 }
 0xe0f   :  { %v1226_v31 = vpop.permute.xlu1 %1225 }
 0xe10   :  { %1228 = vst.msk [vmem:[#allocation5 - $0x2] sm:$0x30] %vm730_vm3, %v1226_v31  ;;  %v1363_v31 = vld [vmem:[%s4400_s6 + $0x28] sm:$0xff] }
 0xe13   :  { %v471_v34 = vpop.permute.xlu1 %470 }
 0xe14   :  { %473 = vst.msk [vmem:[#allocation5 + $0xe] sm:$0x3] %vm468_vm2, %v471_v34  ;;  %v1365_v34 = vld [vmem:[%s4400_s6 + $0x38] sm:$0xff] }
 0xe17   :  { %v733_v35 = vpop.permute.xlu1 %732 }
 0xe18   :  { %735 = vst.msk [vmem:[#allocation5 + $0x6] sm:$0x30] %vm730_vm3, %v733_v35  ;;  %v3160_v35 = vpack.c.bf16 %v1365_v34, %v1363_v31 }
 0xe1b   :  { %v600_v32 = vpop.permute.xlu1 %599 }
 0xe1c   :  { %603 = vst.msk [vmem:[#allocation4] sm:$0xc] %vm602_vm4, %v600_v32  ;;  %v1362_v32 = vld [vmem:[%s4400_s6 + $0x20] sm:$0xff] }
 0xe1f   :  { %v856_v38 = vpop.permute.xlu1 %855 }
 0xe20   :  { %859 = vst.msk [vmem:[#allocation4] sm:$0xc0] %vm858_vm5, %v856_v38  ;;  %v1364_v38 = vld [vmem:[%s4400_s6 + $0x30] sm:$0xff] }
 0xe23   :  { %v1222_v33 = vpop.permute.xlu1 %1221 }
 0xe24   :  { %1224 = vst.msk [vmem:[#allocation4 + $0x8] sm:$0x30] %vm730_vm3, %v1222_v33  ;;  %v3162_v33 = vpack.c.bf16 %v1364_v38, %v1362_v32  ;;  %v1541_v32 = vld [vmem:[%s4402_s8] sm:$0x3] }
 0xe25   :  { %v1550_v37 = vrot.slane %v1541_v32, %v3925_v10 }
 0xedb   :  { %v1314_v42 = vpop.f32.mrb[10].mxu1 }
 0xedc   :  { %v1315_v43 = vadd.f32 %v1314_v42, %v3919_v59  ;;  %v1316_v44 = vpop.f32.mrb[11].mxu1  ;;  %v1242_v59 = vadd.f32 %v1240_v60, %v3907_v47  ;;  %v1371_v47 = vld [vmem:[#allocation12 + $0x28] sm:$0xff]  ;;  %v1561_v60 = vld [vmem:[#allocation13] sm:$0xff] }
 0xedd   :  { %v1317_v58 = vadd.f32 %v1316_v44, %v3928_v12  ;;  %v3148_v12 = vpack.c.bf16 %v1369_v8, %v1367_v6  ;;  %v3152_v14 = vpack.c.bf16 %v1373_v13, %v1371_v47  ;;  %v1756_v6 = vld [vmem:[#allocation16 + $0x28] sm:$0xff]  ;;  %v1758_v8 = vld [vmem:[#allocation16 + $0x38] sm:$0xff] }
 0xede   :  { %v1320_v46 = vrot.slane %v1315_v43, 2  ;;  %v1569_v43 = vld [vmem:[#allocation15] sm:$0xff] }
 0xedf   :  { %v1330_v61 = vrot.slane %v1317_v58, 2  ;;  %3149 = vmatprep.subr.bf16.mxu1 %v3148_v12 }
 0xee0   :  { %v1322_v48 = vadd.f32 %v1320_v46, %v1241_v45  ;;  %3151 = vmatpush1.bf16.msra.mxu1 %v3150_v17  ;;  %v1574_v45 = vld [vmem:[#allocation15 + $0x28] sm:$0xff]  ;;  %v1576_v46 = vld [vmem:[#allocation15 + $0x38] sm:$0xff] }
 0xee1   :  { %3153 = vmatprep.subr.bf16.mxu1 %v3152_v14  ;;  %v4141_v14 = vpack.c.bf16 %v1758_v8, %v1756_v6 }
 0xee2   :  { %v2949_v49 = vmul.f32 -1.442695, %v1322_v48  ;;  %v3168_v48 = vpack.c.bf16 %v1576_v46, %v1574_v45 }
 0xee4   :  { %3389 = vpow2.f32 %v2949_v49  ;;  %3155 = vmatpush1.bf16.msra.mxu1 %v3154_v22  ;;  %v1573_v49 = vld [vmem:[#allocation15 + $0x20] sm:$0xff]  ;;  %v1760_v22 = vld [vmem:[#allocation16 + $0x48] sm:$0xff] }
 0xee5   :  { %3165 = vmatprep.subr.bf16.mxu1 %v3164_v25  ;;  %v4146_v25 = vpack.c.bf16 %v1757_v15, %v1755_v18 }
 0xeee   :  { %v3390_v50 = vpop.eup %3389 }
 0xeef   :  { %v1326_v52 = vadd.f32 1.0, %v3390_v50  ;;  %v1575_v50 = vld [vmem:[#allocation15 + $0x30] sm:$0xff] }
 0xef0   :  { %v3170_v57 = vpack.c.bf16 %v1575_v50, %v1573_v49 }
 0xef1   :  { %3391 = vrcp.f32 %v1326_v52 }
 0xefb   :  { %v3392_v1 = vpop.eup %3391 }
 0xefc   :  { %v1332_v3 = vmul.f32 %v3392_v1, %v1330_v61  ;;  %v1343_v2 = vmul.f32 %v3392_v1, %v1341_v62  ;;  %v1335_v19 = vsub.f32 1.0, %v3392_v1  ;;  %v1563_v61 = vld [vmem:[#allocation13 + $0x10] sm:$0xff] }
 0xefe   :  { %v1333_v4 = vadd.f32 %v1332_v3, %v1242_v59  ;;  %v1566_v59 = vld [vmem:[#allocation13 + $0x28] sm:$0xff]  ;;  %v1568_v3 = vld [vmem:[#allocation13 + $0x38] sm:$0xff] }
 0xeff   :  { %v3176_v12 = vpack.c.bf16 %v1568_v3, %v1566_v59  ;;  %v1767_v3 = vld [vmem:[%s4407_s13] sm:$0x3] }
 0xf00   :  { %3393 = vtanh.f32 %v1333_v4  ;;  %v1753_v4 = vld [vmem:[#allocation16 + $0x10] sm:$0xff] }
 0xf0a   :  { %v3394_v5 = vpop.eup %3393 }
 0xf0b   :  { %1337 = vrot.lane.b32.xlu0 %v3394_v5, %s3593_s5  ;;  %v3174_v5 = vpack.c.bf16 %v1563_v61, %v1561_v60 }
 0xf0f   :  { %1100 = vrot.lane.b32.xlu0 %v4048_v51, %s3594_s1 }
 0xf13   :  { %604 = vrot.lane.b32.xlu0 %v3962_v7, %s3594_s1  ;;  %v1359_v7 = vld [vmem:[%s4400_s6 + $0x8] sm:$0xff] }
 0xf14   :  { %v3156_v27 = vpack.c.bf16 %v1361_v26, %v1359_v7  ;;  %v4151_v7 = vpack.c.bf16 %v1762_v23, %v1760_v22  ;;  %v1764_v26 = vld [vmem:[#allocation16 + $0x68] sm:$0xff]  ;;  %v4212_v22 = vrot.slane %v1767_v3, %v3925_v10 }
 0xf16   :  { %3157 = vmatprep.subr.bf16.mxu0 %v3156_v27 }
 0xf17   :  { %3159 = vmatpush1.bf16.msra.mxu0 %v3158_v29  ;;  %v1763_v29 = vld [vmem:[#allocation16 + $0x60] sm:$0xff] }
 0xf18   :  { %3161 = vmatprep.subr.bf16.mxu0 %v3160_v35 }
 0xf1b   :  { %3163 = vmatpush1.bf16.msra.mxu0 %v3162_v33  ;;  %v1546_v33 = vrot.slane %v1541_v32, %v3913_v56 }
 0xf1c   :  { %3181 = vmatprep.subr.bf16.mxu0 %v4122_v41 }
 0xf7d   :  { %v1338_v20 = vpop.permute.xlu0 %1337 }
 0xf7e   :  { %v1340_v24 = vmul.f32 %v1338_v20, %v1335_v19  ;;  %v1759_v19 = vld [vmem:[#allocation16 + $0x40] sm:$0xff]  ;;  %v1761_v20 = vld [vmem:[#allocation16 + $0x50] sm:$0xff] }
 0xf7f   :  { %v4155_v28 = vpack.c.bf16 %v1761_v20, %v1759_v19 }
 0xf80   :  { %v1344_v63 = vadd.f32 %v1343_v2, %v1340_v24  ;;  %v1751_v2 = vld [vmem:[#allocation16] sm:$0xff]  ;;  %v1766_v24 = vld [vmem:[#allocation16 + $0x78] sm:$0xff] }
 0xf81   :  { %v1101_v16 = vpop.permute.xlu0 %1100  ;;  %v4136_v13 = vpack.c.bf16 %v1753_v4, %v1751_v2  ;;  %v4159_v30 = vpack.c.bf16 %v1766_v24, %v1764_v26  ;;  %v4208_v4 = vrot.slane %v1767_v3, %v3913_v56 }
 0xf82   :  { %1103 = vst.msk [vmem:[#allocation5 + $0x2] sm:$0xc] %vm602_vm4, %v1101_v16  ;;  %1350 = vrot.lane.b32.xlu0 %v1344_v63, %s3594_s1 }
 0xf85   :  { %v605_v36 = vpop.permute.xlu0 %604 }
 0xf86   :  { %607 = vst.msk [vmem:[#allocation5 + $0xa] sm:$0xc] %vm602_vm4, %v605_v36  ;;  %860 = vrot.lane.b32.xlu0 %v4010_v40, %s3594_s1  ;;  %v1571_v40 = vld [vmem:[#allocation15 + $0x10] sm:$0xff] }
 0xf8a   :  { %727 = vrot.lane.b32.xlu0 %v3986_v53, %s3593_s5  ;;  %v3166_v53 = vpack.c.bf16 %v1571_v40, %v1569_v43  ;;  %v1731_v40 = vld [vmem:[%s4405_s11] sm:$0x3] }
 0xf8b   :  { %v1736_v46 = vrot.slane %v1731_v40, %v3913_v56 }
 0xf8e   :  { %1096 = vrot.lane.b32.xlu0 %v4048_v51, %s3593_s5  ;;  %v1562_v51 = vld [vmem:[#allocation13 + $0x8] sm:$0xff] }
 0xf8f   :  { %v3172_v58 = vpack.c.bf16 %v1564_v55, %v1562_v51 }
 0xf92   :  { %1346 = vrot.lane.b32.xlu0 %v1344_v63, %s3593_s5  ;;  %v1765_v63 = vld [vmem:[#allocation16 + $0x70] sm:$0xff] }
 0xf93   :  { %v4166_v16 = vpack.c.bf16 %v1765_v63, %v1763_v29 }
 0xff4   :  { %v1351_v42 = vpop.permute.xlu0 %1350 }
 0xff5   :  { %1353 = vst.msk [vmem:[#allocation5 - $0x6] sm:$0xc0] %vm858_vm5, %v1351_v42 }
 0xff8   :  { %v861_v44 = vpop.permute.xlu0 %860 }
 0xff9   :  { %863 = vst.msk [vmem:[#allocation5 + $0x2] sm:$0xc0] %vm858_vm5, %v861_v44 }
 0xffc   :  { %v728_v52 = vpop.permute.xlu0 %727  ;;  %v1356_v54 = vld [vmem:[#allocation5] sm:$0xff] }
 0xffd   :  { %731 = vst.msk [vmem:[#allocation4] sm:$0x30] %vm730_vm3, %v728_v52  ;;  %2950 = vmatmul.mubr.msk.f32.vlgmr.msra.gmra.mrb[12].mxu1 %vm1374_vm6, %v1356_v54 }
 0xffe   :  { %3167 = vmatpush1.bf16.msra.mxu1 %v3166_v53  ;;  %1451 = vmatprep.mubr.f32.mxu1 %v3591_v0  ;;  %v1740_v53 = vrot.slane %v1731_v40, %v3925_v10 }
 0xfff   :  { %3169 = vmatprep.subr.bf16.mxu1 %v3168_v48 }
0x1000   :  { %v1097_v62 = vpop.permute.xlu0 %1096  ;;  %v1357_v1 = vld [vmem:[#allocation5 + $0x8] sm:$0xff] }
0x1001   :  { %1099 = vst.msk [vmem:[#allocation4 + $0x8] sm:$0xc] %vm602_vm4, %v1097_v62  ;;  %2951 = vmatmul.mubr.msk.f32.gmra.mrb[14].mxu1 %vm1374_vm6, %v1357_v1 }
0x1002   :  { %3171 = vmatpush1.bf16.msra.mxu1 %v3170_v57  ;;  %1641 = vmatprep.mubr.f32.mxu1 %v3591_v0 }
0x1003   :  { %3173 = vmatprep.subr.bf16.mxu1 %v3172_v58 }
0x1004   :  { %v1347_v47 = vpop.permute.xlu0 %1346  ;;  %v1354_v17 = vld [vmem:[#allocation4] sm:$0xff] }
0x1005   :  { %1349 = vst.msk [vmem:[#allocation4 + $0x8] sm:$0xc0] %vm858_vm5, %v1347_v47  ;;  %2952 = vmatmul.mubr.msk.f32.vlgmr.msra.gmra.mrb[12].mxu0 %vm1374_vm6, %v1354_v17  ;;  %2954 = vmatmul.mubr.msk.f32.vlgmr.msra.gmra.mrb[16].mxu1 %vm1374_vm6, %v1356_v54 }
0x1006   :  { %3175 = vmatpush1.bf16.msra.mxu1 %v3174_v5  ;;  %1647 = vmatprep.mubr.f32.mxu1 %v3591_v0 }
0x1007   :  { %3177 = vmatprep.subr.bf16.mxu1 %v3176_v12  ;;  %1534 = vmatprep.mubr.f32.mxu0 %v3591_v0 }
0x1008   :  { %3183 = vmatpush1.bf16.msra.mxu0 %v4136_v13 }
0x1009   :  { %2955 = vmatmul.mubr.msk.f32.gmra.mrb[18].mxu1 %vm1374_vm6, %v1357_v1  ;;  %3185 = vmatprep.subr.bf16.mxu0 %v4141_v14 }
0x100a   :  { %3179 = vmatpush1.bf16.msra.mxu1 %v3178_v21  ;;  %1718 = vmatprep.mubr.f32.mxu1 %v3591_v0 }
0x100b   :  { %3197 = vmatprep.subr.bf16.mxu1 %v4122_v41 }
0x100c   :  { %v1355_v27 = vld [vmem:[#allocation4 + $0x8] sm:$0xff]  ;;  %3187 = vmatpush1.bf16.msra.mxu0 %v4146_v25 }
0x100d   :  { %2953 = vmatmul.mubr.msk.f32.gmra.mrb[14].mxu0 %vm1374_vm6, %v1355_v27  ;;  %2956 = vmatmul.mubr.msk.f32.vlgmr.msra.gmra.mrb[16].mxu1 %vm1374_vm6, %v1354_v17 }
0x100e   :  { %1724 = vmatprep.mubr.f32.mxu1 %v3591_v0  ;;  %3189 = vmatprep.subr.bf16.mxu0 %v4151_v7 }
0x100f   :  { %1855 = vmatprep.mubr.f32.mxu0 %v3591_v0  ;;  %3199 = vmatpush1.bf16.msra.mxu1 %v4136_v13 }
0x1010   :  { %3191 = vmatpush1.bf16.msra.mxu0 %v4155_v28  ;;  %3201 = vmatprep.subr.bf16.mxu1 %v4141_v14 }
0x1011   :  { %2957 = vmatmul.mubr.msk.f32.gmra.mrb[18].mxu1 %vm1374_vm6, %v1355_v27  ;;  %3193 = vmatprep.subr.bf16.mxu0 %v4159_v30 }
0x1012   :  { %1967 = vmatprep.mubr.f32.mxu1 %v3591_v0 }
0x1013   :  { %3203 = vmatpush1.bf16.msra.mxu1 %v4146_v25 }
0x1014   :  { %3195 = vmatpush1.bf16.msra.mxu0 %v4166_v16  ;;  %3205 = vmatprep.subr.bf16.mxu1 %v4151_v7 }
0x1015   :  { %3213 = vmatprep.subr.bf16.mxu0 %v4122_v41 }
0x1017   :  { %1856 = vmatmul.mubr.f32.vlgmr.msra.gmra.mrb[16].mxu0 %v3591_v0  ;;  %3207 = vmatpush1.bf16.msra.mxu1 %v4155_v28 }
0x1018   :  { %3209 = vmatprep.subr.bf16.mxu1 %v4159_v30  ;;  %3215 = vmatpush1.bf16.msra.mxu0 %v4136_v13 }
0x1019   :  { %3217 = vmatprep.subr.bf16.mxu0 %v4141_v14  ;;  %2090 = vmatprep.mubr.f32.mxu0 %v3591_v0 }
0x101b   :  { %3211 = vmatpush1.bf16.msra.mxu1 %v4166_v16 }
0x101c   :  { %3219 = vmatpush1.bf16.msra.mxu0 %v4146_v25  ;;  %3229 = vmatprep.subr.bf16.mxu1 %v4122_v41 }
0x101d   :  { %3221 = vmatprep.subr.bf16.mxu0 %v4151_v7 }
0x1020   :  { %3223 = vmatpush1.bf16.msra.mxu0 %v4155_v28 }
0x1021   :  { %3225 = vmatprep.subr.bf16.mxu0 %v4159_v30 }
0x1024   :  { %3227 = vmatpush1.bf16.msra.mxu0 %v4166_v16 }
0x1025   :  { %3245 = vmatprep.subr.bf16.mxu0 %v4122_v41 }
0x10d0   :  { %v1447_v31 = vpop.f32.mrb[12].mxu1 }
0x10d1   :  { %v1449_v34 = vpop.f32.mrb[13].mxu1 }
0x10d4   :  { %v1453_v35 = vpop.f32.mrb[14].mxu1 }
0x10d5   :  { %v1455_v38 = vpop.f32.mrb[15].mxu1 }
0x10d8   :  { %v1530_v36 = vpop.f32.mrb[12].mxu0 }
0x10d9   :  { %v1531_v39 = vadd.f32 %v1530_v36, %v1447_v31  ;;  %v1532_v42 = vpop.f32.mrb[13].mxu0 }
0x10da   :  { %v1533_v43 = vadd.f32 %v1532_v42, %v1449_v34 }
0x10db   :  { %v1553_v44 = vadd.f32 %v1546_v33, %v1531_v39 }
0x10dc   :  { %v1554_v45 = vadd.f32 %v1550_v37, %v1533_v43 }
0x10dd   :  { %1557 = vst [vmem:[#allocation2] sm:$0xff] %v1553_v44 }
0x10de   :  { %1558 = vst.msk [vmem:[#allocation2 + $0x8] sm:$0xff] %vm229_vm1, %v1554_v45 }
0x10e0   :  { %v1536_v48 = vpop.f32.mrb[14].mxu0  ;;  %v1720_v49 = vpop.f32.mrb[16].mxu1 }
0x10e1   :  { %v1537_v50 = vadd.f32 %v1536_v48, %v1453_v35  ;;  %v1743_v52 = vadd.f32 %v1736_v46, %v1720_v49  ;;  %v1538_v54 = vpop.f32.mrb[15].mxu0  ;;  %v1722_v51 = vpop.f32.mrb[17].mxu1 }
0x10e2   :  { %v1539_v55 = vadd.f32 %v1538_v54, %v1455_v38  ;;  %v1744_v57 = vadd.f32 %v1740_v53, %v1722_v51 }
0x10e3   :  { %v1555_v58 = vadd.f32 %v1546_v33, %v1537_v50  ;;  %1747 = vst [vmem:[#allocation3] sm:$0xff] %v1743_v52 }
0x10e4   :  { %v1556_v60 = vadd.f32 %v1550_v37, %v1539_v55  ;;  %1748 = vst.msk [vmem:[#allocation3 + $0x8] sm:$0xff] %vm229_vm1, %v1744_v57  ;;  %v1726_v61 = vpop.f32.mrb[18].mxu1  ;;  %v1768_v9 = vld [vmem:[#allocation2] sm:$0x3]  ;;  %v1889_v42 = vld [vmem:[#allocation2] sm:$0xc] }
0x10e5   :  { %1559 = vst [vmem:[#allocation2 + $0x10] sm:$0xff] %v1555_v58  ;;  %v1745_v62 = vadd.f32 %v1736_v46, %v1726_v61  ;;  %v1728_v1 = vpop.f32.mrb[19].mxu1  ;;  %v1769_v20 = vld [vmem:[#allocation2 + $0x8] sm:$0x3]  ;;  %v1890_v51 = vld [vmem:[#allocation2 + $0x8] sm:$0xc] }
0x10e6   :  { %1560 = vst.msk [vmem:[#allocation2 + $0x18] sm:$0xff] %vm229_vm1, %v1556_v60  ;;  %v1746_v59 = vadd.f32 %v1740_v53, %v1728_v1 }
0x10e7   :  { %1749 = vst [vmem:[#allocation3 + $0x10] sm:$0xff] %v1745_v62 }
0x10e8   :  { %1750 = vst.msk [vmem:[#allocation3 + $0x18] sm:$0xff] %vm229_vm1, %v1746_v59 }
0x10ea   :  { %v1857_v2 = vpop.f32.mrb[16].mxu0 }
0x10eb   :  { %v1859_v5 = vpop.f32.mrb[17].mxu0  ;;  %v1858_v12 = vadd.f32 %v1857_v2, %v4208_v4 }
0x10ec   :  { %v1860_v56 = vadd.f32 %v1859_v5, %v4212_v22 }
0x10ee   :  { %v1770_v6 = vld [vmem:[#allocation3 + $0x10] sm:$0xc0]  ;;  %v1891_v38 = vld [vmem:[#allocation3 + $0x10] sm:$0x30] }
0x10ef   :  { %v1774_v8 = vrot.slane %v1770_v6, 6  ;;  %v1771_v21 = vld [vmem:[#allocation3 + $0x18] sm:$0xc0]  ;;  %v1895_v33 = vrot.slane %v1891_v38, 2  ;;  %v1892_v48 = vld [vmem:[#allocation3 + $0x18] sm:$0x30] }
0x10f0   :  { %v1775_v23 = vrot.slane %v1771_v21, 6  ;;  %v1896_v50 = vrot.slane %v1892_v48, 2 }
0x10f1   :  { %v1778_v11 = vadd.f32 %v1774_v8, %v1768_v9  ;;  %v1899_v43 = vadd.f32 %v1895_v33, %v1889_v42  ;;  %v2011_v8 = vld [vmem:[#allocation3 + $0x10] sm:$0xc] }
0x10f2   :  { %v1779_v26 = vadd.f32 %v1775_v23, %v1769_v20  ;;  %v1900_v55 = vadd.f32 %v1896_v50, %v1890_v51  ;;  %v2012_v20 = vld [vmem:[#allocation3 + $0x18] sm:$0xc] }
0x10f3   :  { %v1862_v47 = vadd.f32 %v1858_v12, %v1778_v11  ;;  %v2015_v12 = vrot.slane %v2011_v8, 6 }
0x10f5   :  { %v2958_v17 = vmul.f32 -1.442695, %v1862_v47 }
0x10f7   :  { %3395 = vpow2.f32 %v2958_v17  ;;  %v2009_v17 = vld [vmem:[#allocation2] sm:$0x30] }
0x1101   :  { %v3396_v18 = vpop.eup %3395 }
0x1102   :  { %v1866_v15 = vadd.f32 1.0, %v3396_v18  ;;  %v2019_v18 = vadd.f32 %v2015_v12, %v2009_v17 }
0x1104   :  { %3397 = vrcp.f32 %v1866_v15 }
0x110e   :  { %v3398_v19 = vpop.eup %3397 }
0x110f   :  { %v1869_v24 = vmul.f32 %v3398_v19, %v1860_v56  ;;  %v1872_v63 = vsub.f32 1.0, %v3398_v19  ;;  %v1878_v34 = vmul.f32 0.0, %v3398_v19 }
0x1111   :  { %v1870_v27 = vadd.f32 %v1869_v24, %v1779_v26  ;;  %v2016_v24 = vrot.slane %v2012_v20, 6 }
0x1113   :  { %3399 = vtanh.f32 %v1870_v27 }
0x111d   :  { %v3400_v29 = vpop.eup %3399 }
0x111e   :  { %1874 = vrot.lane.b32.xlu1 %v3400_v29, %s3593_s5 }
0x1190   :  { %v1875_v31 = vpop.permute.xlu1 %1874 }
0x1191   :  { %v1877_v35 = vmul.f32 %v1875_v31, %v1872_v63  ;;  %v2010_v63 = vld [vmem:[#allocation2 + $0x8] sm:$0x30] }
0x1192   :  { %v2020_v31 = vadd.f32 %v2016_v24, %v2010_v63 }
0x1193   :  { %v4216_v32 = vadd.f32 %v1878_v34, %v1877_v35 }
0x1195   :  { %1881 = vrot.lane.b32.xlu0 %v4216_v32, %s3593_s5  ;;  %v1996_v62 = vrot.slane %v4216_v32, 6 }
0x1207   :  { %v1882_v10 = vpop.permute.xlu0 %1881 }
0x1208   :  { %1884 = vst.msk [vmem:[#allocation6] sm:$0x3] %vm468_vm2, %v1882_v10  ;;  %2959 = vmatmul.mubr.msk.f32.vlgmr.msra.gmra.mrb[20].mxu1 %vm229_vm1, %v1882_v10 }
0x1209   :  { %3231 = vmatpush1.bf16.msra.mxu1 %v4136_v13  ;;  %2213 = vmatprep.mubr.f32.mxu1 %v3591_v0 }
0x120a   :  { %3233 = vmatprep.subr.bf16.mxu1 %v4141_v14 }
0x120d   :  { %3235 = vmatpush1.bf16.msra.mxu1 %v4146_v25 }
0x120e   :  { %3237 = vmatprep.subr.bf16.mxu1 %v4151_v7 }
0x1211   :  { %3239 = vmatpush1.bf16.msra.mxu1 %v4155_v28 }
0x1212   :  { %3241 = vmatprep.subr.bf16.mxu1 %v4159_v30 }
0x1215   :  { %3243 = vmatpush1.bf16.msra.mxu1 %v4166_v16 }
0x1216   :  { %3261 = vmatprep.subr.bf16.mxu1 %v4122_v41 }
0x12db   :  { %v1969_v36 = vpop.f32.mrb[20].mxu1 }
0x12dc   :  { %v1970_v37 = vadd.f32 %v1969_v36, %v4208_v4  ;;  %v1971_v39 = vpop.f32.mrb[21].mxu1 }
0x12dd   :  { %v1972_v49 = vadd.f32 %v1971_v39, %v4212_v22 }
0x12de   :  { %v1975_v40 = vrot.slane %v1970_v37, 6 }
0x12df   :  { %v1985_v52 = vrot.slane %v1972_v49, 6  ;;  %v2132_v49 = vld [vmem:[#allocation2] sm:$0xc0] }
0x12e0   :  { %v1977_v44 = vadd.f32 %v1975_v40, %v1899_v43 }
0x12e2   :  { %v2960_v45 = vmul.f32 -1.442695, %v1977_v44  ;;  %v2134_v44 = vld [vmem:[#allocation3 + $0x10] sm:$0x3] }
0x12e4   :  { %3401 = vpow2.f32 %v2960_v45  ;;  %v2138_v45 = vrot.slane %v2134_v44, 2 }
0x12e6   :  { %v2142_v50 = vadd.f32 %v2138_v45, %v2132_v49  ;;  %v2373_v49 = vld [vmem:[#allocation3] sm:$0x30] }
0x12ee   :  { %v3402_v46 = vpop.eup %3401 }
0x12ef   :  { %v1981_v53 = vadd.f32 1.0, %v3402_v46 }
0x12f1   :  { %3403 = vrcp.f32 %v1981_v53 }
0x12fb   :  { %v3404_v54 = vpop.eup %3403 }
0x12fc   :  { %v1987_v57 = vmul.f32 %v3404_v54, %v1985_v52  ;;  %v1990_v61 = vsub.f32 1.0, %v3404_v54  ;;  %v1998_v3 = vmul.f32 %v3404_v54, %v1996_v62 }
0x12fe   :  { %v1988_v58 = vadd.f32 %v1987_v57, %v1900_v55 }
0x1300   :  { %3405 = vtanh.f32 %v1988_v58  ;;  %v2135_v58 = vld [vmem:[#allocation3 + $0x18] sm:$0x3] }
0x130a   :  { %v3406_v60 = vpop.eup %3405 }
0x130b   :  { %1992 = vrot.lane.b32.xlu1 %v3406_v60, %s3593_s5 }
0x137d   :  { %v1993_v1 = vpop.permute.xlu1 %1992 }
0x137e   :  { %v1995_v59 = vmul.f32 %v1993_v1, %v1990_v61  ;;  %v2139_v61 = vrot.slane %v2135_v58, 2  ;;  %v2133_v1 = vld [vmem:[#allocation2 + $0x8] sm:$0xc0] }
0x1380   :  { %v4235_v2 = vadd.f32 %v1998_v3, %v1995_v59  ;;  %v2143_v59 = vadd.f32 %v2139_v61, %v2133_v1 }
0x1382   :  { %v2021_v5 = vrot.slane %v4235_v2, 2  ;;  %v2119_v33 = vrot.slane %v4235_v2, 6 }
0x1384   :  { %2022 = vrot.lane.b32.xlu0 %v2021_v5, %s3593_s5 }
0x13f6   :  { %v2023_v6 = vpop.permute.xlu0 %2022 }
0x13f7   :  { %2961 = vmatmul.mubr.msk.f32.vlgmr.msra.gmra.mrb[18].mxu0 %vm229_vm1, %v2023_v6 }
0x13f8   :  { %3247 = vmatpush1.bf16.msra.mxu0 %v4136_v13  ;;  %2336 = vmatprep.mubr.f32.mxu0 %v3591_v0 }
0x13f9   :  { %3249 = vmatprep.subr.bf16.mxu0 %v4141_v14 }
0x13fc   :  { %3251 = vmatpush1.bf16.msra.mxu0 %v4146_v25 }
0x13fd   :  { %3253 = vmatprep.subr.bf16.mxu0 %v4151_v7 }
0x1400   :  { %3255 = vmatpush1.bf16.msra.mxu0 %v4155_v28 }
0x1401   :  { %3257 = vmatprep.subr.bf16.mxu0 %v4159_v30 }
0x1404   :  { %3259 = vmatpush1.bf16.msra.mxu0 %v4166_v16 }
0x1405   :  { %3277 = vmatprep.subr.bf16.mxu0 %v4122_v41 }
0x14ca   :  { %v2092_v9 = vpop.f32.mrb[18].mxu0 }
0x14cb   :  { %v2093_v11 = vadd.f32 %v2092_v9, %v4208_v4  ;;  %v2094_v47 = vpop.f32.mrb[19].mxu0 }
0x14cc   :  { %v2095_v26 = vadd.f32 %v2094_v47, %v4212_v22 }
0x14cd   :  { %v2098_v15 = vrot.slane %v2093_v11, 4 }
0x14ce   :  { %v2108_v27 = vrot.slane %v2095_v26, 4 }
0x14cf   :  { %v2100_v21 = vadd.f32 %v2098_v15, %v2019_v18 }
0x14d1   :  { %v2962_v23 = vmul.f32 -1.442695, %v2100_v21  ;;  %v2257_v21 = vld [vmem:[#allocation3] sm:$0xc0] }
0x14d3   :  { %3407 = vpow2.f32 %v2962_v23  ;;  %v2261_v23 = vrot.slane %v2257_v21, 6  ;;  %v2491_v21 = vld [vmem:[#allocation2 + $0x10] sm:$0x30] }
0x14dd   :  { %v3408_v56 = vpop.eup %3407 }
0x14de   :  { %v2104_v19 = vadd.f32 1.0, %v3408_v56  ;;  %v2255_v56 = vld [vmem:[#allocation2 + $0x10] sm:$0x3] }
0x14df   :  { %v2265_v20 = vadd.f32 %v2261_v23, %v2255_v56 }
0x14e0   :  { %3409 = vrcp.f32 %v2104_v19 }
0x14ea   :  { %v3410_v29 = vpop.eup %3409 }
0x14eb   :  { %v2110_v34 = vmul.f32 %v3410_v29, %v2108_v27  ;;  %v2113_v38 = vsub.f32 1.0, %v3410_v29  ;;  %v2121_v37 = vmul.f32 %v3410_v29, %v2119_v33 }
0x14ed   :  { %v2111_v35 = vadd.f32 %v2110_v34, %v2020_v31  ;;  %v2258_v34 = vld [vmem:[#allocation3 + $0x8] sm:$0xc0] }
0x14ef   :  { %3411 = vtanh.f32 %v2111_v35  ;;  %v2262_v35 = vrot.slane %v2258_v34, 6 }
0x14f9   :  { %v3412_v10 = vpop.eup %3411 }
0x14fa   :  { %2115 = vrot.lane.b32.xlu1 %v3412_v10, %s3593_s5  ;;  %v2256_v10 = vld [vmem:[#allocation2 + $0x18] sm:$0x3] }
0x156c   :  { %v2116_v36 = vpop.permute.xlu1 %2115 }
0x156d   :  { %v2118_v39 = vmul.f32 %v2116_v36, %v2113_v38  ;;  %v2266_v36 = vadd.f32 %v2262_v35, %v2256_v10  ;;  %v2492_v10 = vld [vmem:[#allocation2 + $0x18] sm:$0x30] }
0x156f   :  { %v4253_v42 = vadd.f32 %v2121_v37, %v2118_v39 }
0x1571   :  { %v2144_v43 = vrot.slane %v4253_v42, 4  ;;  %v2242_v12 = vrot.slane %v4253_v42, 6 }
0x1573   :  { %2145 = vrot.lane.b32.xlu0 %v2144_v43, %s3593_s5 }
0x15e5   :  { %v2146_v40 = vpop.permute.xlu0 %2145 }
0x15e6   :  { %2963 = vmatmul.mubr.msk.f32.vlgmr.msra.gmra.mrb[22].mxu1 %vm229_vm1, %v2146_v40 }
0x15e7   :  { %3263 = vmatpush1.bf16.msra.mxu1 %v4136_v13  ;;  %2449 = vmatprep.mubr.f32.mxu1 %v3591_v0 }
0x15e8   :  { %3265 = vmatprep.subr.bf16.mxu1 %v4141_v14 }
0x15eb   :  { %3267 = vmatpush1.bf16.msra.mxu1 %v4146_v25 }
0x15ec   :  { %3269 = vmatprep.subr.bf16.mxu1 %v4151_v7 }
0x15ef   :  { %3271 = vmatpush1.bf16.msra.mxu1 %v4155_v28 }
0x15f0   :  { %3273 = vmatprep.subr.bf16.mxu1 %v4159_v30 }
0x15f3   :  { %3275 = vmatpush1.bf16.msra.mxu1 %v4166_v16 }
0x15f4   :  { %3293 = vmatprep.subr.bf16.mxu1 %v4122_v41 }
0x16b9   :  { %v2215_v46 = vpop.f32.mrb[22].mxu1 }
0x16ba   :  { %v2216_v53 = vadd.f32 %v2215_v46, %v4208_v4  ;;  %v2217_v48 = vpop.f32.mrb[23].mxu1 }
0x16bb   :  { %v2218_v60 = vadd.f32 %v2217_v48, %v4212_v22 }
0x16bc   :  { %v2221_v52 = vrot.slane %v2216_v53, 2 }
0x16bd   :  { %v2231_v41 = vrot.slane %v2218_v60, 2 }
0x16be   :  { %v2223_v54 = vadd.f32 %v2221_v52, %v2142_v50  ;;  %v2377_v50 = vrot.slane %v2373_v49, 2  ;;  %v2371_v52 = vld [vmem:[#allocation2 + $0x10] sm:$0xc] }
0x16c0   :  { %v2964_v51 = vmul.f32 -1.442695, %v2223_v54 }
0x16c2   :  { %3413 = vpow2.f32 %v2964_v51 }
0x16cc   :  { %v3414_v55 = vpop.eup %3413 }
0x16cd   :  { %v2227_v57 = vadd.f32 1.0, %v3414_v55 }
0x16cf   :  { %3415 = vrcp.f32 %v2227_v57 }
0x16d9   :  { %v3416_v62 = vpop.eup %3415 }
0x16da   :  { %v2233_v3 = vmul.f32 %v3416_v62, %v2231_v41  ;;  %v2236_v8 = vsub.f32 1.0, %v3416_v62  ;;  %v2244_v11 = vmul.f32 %v3416_v62, %v2242_v12 }
0x16dc   :  { %v2234_v5 = vadd.f32 %v2233_v3, %v2143_v59 }
0x16de   :  { %3417 = vtanh.f32 %v2234_v5 }
0x16e8   :  { %v3418_v6 = vpop.eup %3417 }
0x16e9   :  { %2238 = vrot.lane.b32.xlu1 %v3418_v6, %s3593_s5 }
0x175b   :  { %v2239_v9 = vpop.permute.xlu1 %2238 }
0x175c   :  { %v2241_v47 = vmul.f32 %v2239_v9, %v2236_v8 }
0x175e   :  { %v4271_v17 = vadd.f32 %v2244_v11, %v2241_v47 }
0x1760   :  { %v2267_v18 = vrot.slane %v4271_v17, 6 }
0x1762   :  { %2268 = vrot.lane.b32.xlu0 %v2267_v18, %s3593_s5 }
0x17d4   :  { %v2269_v15 = vpop.permute.xlu0 %2268 }
0x17d5   :  { %2965 = vmatmul.mubr.msk.f32.vlgmr.msra.gmra.mrb[20].mxu0 %vm229_vm1, %v2269_v15 }
0x17d6   :  { %3279 = vmatpush1.bf16.msra.mxu0 %v4136_v13  ;;  %2572 = vmatprep.mubr.f32.mxu0 %v3591_v0 }
0x17d7   :  { %3281 = vmatprep.subr.bf16.mxu0 %v4141_v14 }
0x17da   :  { %3283 = vmatpush1.bf16.msra.mxu0 %v4146_v25 }
0x17db   :  { %3285 = vmatprep.subr.bf16.mxu0 %v4151_v7 }
0x17de   :  { %3287 = vmatpush1.bf16.msra.mxu0 %v4155_v28 }
0x17df   :  { %3289 = vmatprep.subr.bf16.mxu0 %v4159_v30 }
0x17e2   :  { %3291 = vmatpush1.bf16.msra.mxu0 %v4166_v16 }
0x18a8   :  { %v2338_v19 = vpop.f32.mrb[20].mxu0 }
0x18a9   :  { %v2339_v26 = vadd.f32 %v2338_v19, %v4208_v4  ;;  %v2340_v24 = vpop.f32.mrb[21].mxu0 }
0x18aa   :  { %v2341_v38 = vadd.f32 %v2340_v24, %v4212_v22 }
0x18ab   :  { %v2343_v27 = vadd.f32 %v2339_v26, %v2265_v20 }
0x18ad   :  { %v2966_v29 = vmul.f32 -1.442695, %v2343_v27 }
0x18af   :  { %3419 = vpow2.f32 %v2966_v29 }
0x18b9   :  { %v3420_v63 = vpop.eup %3419 }
0x18ba   :  { %v2347_v31 = vadd.f32 1.0, %v3420_v63 }
0x18bc   :  { %3421 = vrcp.f32 %v2347_v31  ;;  %v2494_v31 = vld [vmem:[#allocation3 + $0x8] sm:$0xc] }
0x18bd   :  { %v2498_v35 = vrot.slane %v2494_v31, 6 }
0x18c6   :  { %v3422_v33 = vpop.eup %3421 }
0x18c7   :  { %v2350_v37 = vmul.f32 %v3422_v33, %v2341_v38  ;;  %v2353_v40 = vsub.f32 1.0, %v3422_v33  ;;  %v2360_v45 = vmul.f32 %v3422_v33, %v2267_v18  ;;  %v2493_v18 = vld [vmem:[#allocation3] sm:$0xc] }
0x18c8   :  { %v2497_v15 = vrot.slane %v2493_v18, 6 }
0x18c9   :  { %v2351_v39 = vadd.f32 %v2350_v37, %v2266_v36  ;;  %v2502_v36 = vadd.f32 %v2498_v35, %v2492_v10 }
0x18ca   :  { %v2501_v20 = vadd.f32 %v2497_v15, %v2491_v21  ;;  %v2746_v21 = vld [vmem:[%s4409_s15 + $0x8] sm:$0xff] }
0x18cb   :  { %3423 = vtanh.f32 %v2351_v39 }
0x18d5   :  { %v3424_v43 = vpop.eup %3423 }
0x18d6   :  { %2355 = vrot.lane.b32.xlu1 %v3424_v43, %s3593_s5 }
0x1948   :  { %v2356_v44 = vpop.permute.xlu1 %2355 }
0x1949   :  { %v2358_v46 = vmul.f32 %v2356_v44, %v2353_v40 }
0x194b   :  { %v4287_v53 = vadd.f32 %v2360_v45, %v2358_v46 }
0x194d   :  { %2363 = vrot.lane.b32.xlu0 %v4287_v53, %s3593_s5  ;;  %v2478_v5 = vrot.slane %v4287_v53, 6 }
0x19bf   :  { %v2364_v48 = vpop.permute.xlu0 %2363 }
0x19c0   :  { %2366 = vst.msk [vmem:[#allocation6 + $0x8] sm:$0x3] %vm468_vm2, %v2364_v48  ;;  %2967 = vmatmul.mubr.msk.f32.vlgmr.msra.gmra.mrb[24].mxu1 %vm229_vm1, %v2364_v48 }
0x19c1   :  { %3295 = vmatpush1.bf16.msra.mxu1 %v4136_v13  ;;  %2695 = vmatprep.mubr.f32.mxu1 %v3591_v0  ;;  %v2381_v0 = vadd.f32 %v2377_v50, %v2371_v52 }
0x19c2   :  { %3297 = vmatprep.subr.bf16.mxu1 %v4141_v14 }
0x19c5   :  { %3299 = vmatpush1.bf16.msra.mxu1 %v4146_v25 }
0x19c6   :  { %3301 = vmatprep.subr.bf16.mxu1 %v4151_v7 }
0x19c9   :  { %3303 = vmatpush1.bf16.msra.mxu1 %v4155_v28  ;;  %v2374_v28 = vld [vmem:[#allocation3 + $0x8] sm:$0x30] }
0x19ca   :  { %3305 = vmatprep.subr.bf16.mxu1 %v4159_v30  ;;  %v2378_v58 = vrot.slane %v2374_v28, 2 }
0x19cd   :  { %3307 = vmatpush1.bf16.msra.mxu1 %v4166_v16  ;;  %v2372_v16 = vld [vmem:[#allocation2 + $0x18] sm:$0xc] }
0x19ce   :  { %v2382_v41 = vadd.f32 %v2378_v58, %v2372_v16 }
0x1a93   :  { %v2451_v54 = vpop.f32.mrb[24].mxu1 }
0x1a94   :  { %v2452_v13 = vadd.f32 %v2451_v54, %v4208_v4  ;;  %v2453_v51 = vpop.f32.mrb[25].mxu1 }
0x1a95   :  { %v2454_v30 = vadd.f32 %v2453_v51, %v4212_v22 }
0x1a96   :  { %v2457_v55 = vrot.slane %v2452_v13, 6 }
0x1a97   :  { %v2467_v60 = vrot.slane %v2454_v30, 6 }
0x1a98   :  { %v2459_v14 = vadd.f32 %v2457_v55, %v2381_v0 }
0x1a9a   :  { %v2968_v57 = vmul.f32 -1.442695, %v2459_v14  ;;  %v2616_v14 = vld [vmem:[#allocation3] sm:$0x3] }
0x1a9c   :  { %3425 = vpow2.f32 %v2968_v57  ;;  %v2620_v57 = vrot.slane %v2616_v14, 2 }
0x1aa6   :  { %v3426_v25 = vpop.eup %3425 }
0x1aa7   :  { %v2463_v7 = vadd.f32 1.0, %v3426_v25  ;;  %v2614_v25 = vld [vmem:[#allocation2 + $0x10] sm:$0xc0] }
0x1aa8   :  { %v2624_v58 = vadd.f32 %v2620_v57, %v2614_v25 }
0x1aa9   :  { %3427 = vrcp.f32 %v2463_v7 }
0x1ab3   :  { %v3428_v61 = vpop.eup %3427 }
0x1ab4   :  { %v2469_v62 = vmul.f32 %v3428_v61, %v2467_v60  ;;  %v2472_v3 = vsub.f32 1.0, %v3428_v61  ;;  %v2480_v12 = vmul.f32 %v3428_v61, %v2478_v5  ;;  %v2615_v5 = vld [vmem:[#allocation2 + $0x18] sm:$0xc0] }
0x1ab6   :  { %v2470_v1 = vadd.f32 %v2469_v62, %v2382_v41 }
0x1ab8   :  { %3429 = vtanh.f32 %v2470_v1  ;;  %v2617_v1 = vld [vmem:[#allocation3 + $0x8] sm:$0x3] }
0x1ac2   :  { %v3430_v59 = vpop.eup %3429 }
0x1ac3   :  { %2474 = vrot.lane.b32.xlu1 %v3430_v59, %s3593_s5 }
0x1b35   :  { %v2475_v6 = vpop.permute.xlu1 %2474 }
0x1b36   :  { %v2477_v8 = vmul.f32 %v2475_v6, %v2472_v3  ;;  %v2621_v3 = vrot.slane %v2617_v1, 2 }
0x1b38   :  { %v4305_v9 = vadd.f32 %v2480_v12, %v2477_v8 }
0x1b3a   :  { %v2503_v11 = vrot.slane %v4305_v9, 2  ;;  %v2601_v44 = vrot.slane %v4305_v9, 6 }
0x1b3c   :  { %2504 = vrot.lane.b32.xlu0 %v2503_v11, %s3593_s5  ;;  %v2625_v11 = vadd.f32 %v2621_v3, %v2615_v5 }
0x1bae   :  { %v2505_v47 = vpop.permute.xlu0 %2504 }
0x1baf   :  { %2969 = vmatmul.mubr.msk.f32.vlgmr.msra.gmra.mrb[22].mxu0 %vm229_vm1, %v2505_v47 }
0x1c82   :  { %v2574_v23 = vpop.f32.mrb[22].mxu0 }
0x1c83   :  { %v2575_v56 = vadd.f32 %v2574_v23, %v4208_v4  ;;  %v2576_v19 = vpop.f32.mrb[23].mxu0 }
0x1c84   :  { %v2577_v34 = vadd.f32 %v2576_v19, %v4212_v22 }
0x1c85   :  { %v2580_v26 = vrot.slane %v2575_v56, 4  ;;  %v2747_v56 = vld [vmem:[%s4409_s15 + $0x10] sm:$0xff] }
0x1c86   :  { %v2590_v38 = vrot.slane %v2577_v34, 4 }
0x1c87   :  { %v2582_v24 = vadd.f32 %v2580_v26, %v2501_v20 }
0x1c89   :  { %v2970_v27 = vmul.f32 -1.442695, %v2582_v24  ;;  %v2741_v24 = vld [vmem:[%s4408_s14] sm:$0xff] }
0x1c8b   :  { %3431 = vpow2.f32 %v2970_v27  ;;  %v2742_v27 = vld [vmem:[%s4408_s14 + $0x8] sm:$0xff] }
0x1c95   :  { %v3432_v29 = vpop.eup %3431 }
0x1c96   :  { %v2586_v63 = vadd.f32 1.0, %v3432_v29  ;;  %v3316_v29 = vpack.c.bf16 %v2742_v27, %v2741_v24 }
0x1c98   :  { %3433 = vrcp.f32 %v2586_v63 }
0x1ca2   :  { %v3434_v33 = vpop.eup %3433 }
0x1ca3   :  { %v2592_v37 = vmul.f32 %v3434_v33, %v2590_v38  ;;  %v2595_v40 = vsub.f32 1.0, %v3434_v33  ;;  %v2603_v46 = vmul.f32 %v3434_v33, %v2601_v44  ;;  %v2743_v33 = vld [vmem:[%s4408_s14 + $0x10] sm:$0xff] }
0x1ca5   :  { %v2593_v39 = vadd.f32 %v2592_v37, %v2502_v36 }
0x1ca7   :  { %3435 = vtanh.f32 %v2593_v39 }
0x1cb1   :  { %v3436_v43 = vpop.eup %3435 }
0x1cb2   :  { %2597 = vrot.lane.b32.xlu1 %v3436_v43, %s3593_s5 }
0x1d24   :  { %v2598_v45 = vpop.permute.xlu1 %2597 }
0x1d25   :  { %v2600_v48 = vmul.f32 %v2598_v45, %v2595_v40  ;;  %v2977_v45 = vld [vmem:[%s4410_s16] ss:$0 sm:$0xff] }
0x1d27   :  { %v2604_v49 = vadd.f32 %v2603_v46, %v2600_v48 }
0x1d29   :  { %v2626_v50 = vrot.slane %v2604_v49, 4  ;;  %v2724_v8 = vrot.slane %v2604_v49, 6 }
0x1d2b   :  { %2627 = vrot.lane.b32.xlu0 %v2626_v50, %s3593_s5 }
0x1d2f   :  { %2367 = vrot.lane.b32.xlu0 %v4287_v53, %s3594_s1 }
0x1d33   :  { %2610 = vrot.lane.b32.xlu0 %v2604_v49, %s3594_s1 }
0x1d37   :  { %1885 = vrot.lane.b32.xlu0 %v4216_v32, %s3594_s1 }
0x1d3b   :  { %2128 = vrot.lane.b32.xlu0 %v4253_v42, %s3594_s1 }
0x1d3f   :  { %2001 = vrot.lane.b32.xlu0 %v4235_v2, %s3593_s5 }
0x1d43   :  { %2247 = vrot.lane.b32.xlu0 %v4271_v17, %s3593_s5 }
0x1d47   :  { %2606 = vrot.lane.b32.xlu0 %v2604_v49, %s3593_s5 }
0x1d9d   :  { %v2628_v52 = vpop.permute.xlu0 %2627 }
0x1d9e   :  { %2971 = vmatmul.mubr.msk.f32.vlgmr.msra.gmra.mrb[26].mxu1 %vm229_vm1, %v2628_v52 }
0x1da1   :  { %v2368_v53 = vpop.permute.xlu0 %2367 }
0x1da2   :  { %2370 = vst.msk [vmem:[#allocation7 + $0x6] sm:$0x3] %vm468_vm2, %v2368_v53 }
0x1da5   :  { %v2611_v54 = vpop.permute.xlu0 %2610 }
0x1da6   :  { %2613 = vst.msk [vmem:[#allocation7 - $0x2] sm:$0x30] %vm730_vm3, %v2611_v54 }
0x1da9   :  { %v1886_v32 = vpop.permute.xlu0 %1885 }
0x1daa   :  { %1888 = vst.msk [vmem:[#allocation7 + $0xe] sm:$0x3] %vm468_vm2, %v1886_v32 }
0x1dad   :  { %v2129_v13 = vpop.permute.xlu0 %2128 }
0x1dae   :  { %2131 = vst.msk [vmem:[#allocation7 + $0x6] sm:$0x30] %vm730_vm3, %v2129_v13 }
0x1db1   :  { %v2002_v51 = vpop.permute.xlu0 %2001 }
0x1db2   :  { %2004 = vst.msk [vmem:[#allocation6] sm:$0xc] %vm602_vm4, %v2002_v51 }
0x1db5   :  { %v2248_v0 = vpop.permute.xlu0 %2247 }
0x1db6   :  { %2250 = vst.msk [vmem:[#allocation6] sm:$0xc0] %vm858_vm5, %v2248_v0 }
0x1db9   :  { %v2607_v55 = vpop.permute.xlu0 %2606 }
0x1dba   :  { %2609 = vst.msk [vmem:[#allocation6 + $0x8] sm:$0x30] %vm730_vm3, %v2607_v55 }
0x1e71   :  { %v2697_v7 = vpop.f32.mrb[26].mxu1 }
0x1e72   :  { %v2698_v28 = vadd.f32 %v2697_v7, %v4208_v4  ;;  %v2699_v30 = vpop.f32.mrb[27].mxu1 }
0x1e73   :  { %v2700_v59 = vadd.f32 %v2699_v30, %v4212_v22  ;;  %v2745_v22 = vld [vmem:[%s4409_s15] sm:$0xff] }
0x1e74   :  { %v2703_v16 = vrot.slane %v2698_v28, 2  ;;  %v3308_v23 = vpack.c.bf16 %v2746_v21, %v2745_v22 }
0x1e75   :  { %v2713_v6 = vrot.slane %v2700_v59, 2 }
0x1e76   :  { %v2705_v60 = vadd.f32 %v2703_v16, %v2624_v58  ;;  %3309 = vmatprep.subr.bf16.mxu0 %v3308_v23 }
0x1e77   :  { %3311 = vmatpush3.bf16.msra.mxu0 %v3308_v23 }
0x1e78   :  { %v2972_v61 = vmul.f32 -1.442695, %v2705_v60 }
0x1e7a   :  { %3437 = vpow2.f32 %v2972_v61 }
0x1e84   :  { %v3438_v41 = vpop.eup %3437 }
0x1e85   :  { %v2709_v62 = vadd.f32 1.0, %v3438_v41 }
0x1e87   :  { %3439 = vrcp.f32 %v2709_v62 }
0x1e91   :  { %v3440_v12 = vpop.eup %3439 }
0x1e92   :  { %v2715_v47 = vmul.f32 %v3440_v12, %v2713_v6  ;;  %v2726_v4 = vmul.f32 %v3440_v12, %v2724_v8  ;;  %v2718_v19 = vsub.f32 1.0, %v3440_v12 }
0x1e94   :  { %v2716_v18 = vadd.f32 %v2715_v47, %v2625_v11 }
0x1e96   :  { %3441 = vtanh.f32 %v2716_v18 }
0x1ea0   :  { %v3442_v15 = vpop.eup %3441 }
0x1ea1   :  { %2720 = vrot.lane.b32.xlu1 %v3442_v15, %s3593_s5 }
0x1ea5   :  { %2487 = vrot.lane.b32.xlu1 %v4305_v9, %s3594_s1 }
0x1ea9   :  { %2005 = vrot.lane.b32.xlu1 %v4235_v2, %s3594_s1  ;;  %v2748_v2 = vld [vmem:[%s4409_s15 + $0x18] sm:$0xff] }
0x1ead   :  { %2251 = vrot.lane.b32.xlu1 %v4271_v17, %s3594_s1  ;;  %v3312_v17 = vpack.c.bf16 %v2748_v2, %v2747_v56 }
0x1eaf   :  { %3313 = vmatprep.subr.bf16.mxu0 %v3312_v17 }
0x1eb0   :  { %3315 = vmatpush3.bf16.msra.mxu0 %v3312_v17 }
0x1eb1   :  { %3317 = vmatprep.subr.bf16.mxu0 %v3316_v29 }
0x1f13   :  { %v2721_v20 = vpop.permute.xlu1 %2720 }
0x1f14   :  { %v2723_v26 = vmul.f32 %v2721_v20, %v2718_v19 }
0x1f16   :  { %v2727_v63 = vadd.f32 %v2726_v4, %v2723_v26 }
0x1f17   :  { %v2488_v31 = vpop.permute.xlu1 %2487 }
0x1f18   :  { %2490 = vst.msk [vmem:[#allocation7 + $0x2] sm:$0xc] %vm602_vm4, %v2488_v31  ;;  %2733 = vrot.lane.b32.xlu1 %v2727_v63, %s3594_s1 }
0x1f1b   :  { %v2006_v34 = vpop.permute.xlu1 %2005 }
0x1f1c   :  { %2008 = vst.msk [vmem:[#allocation7 + $0xa] sm:$0xc] %vm602_vm4, %v2006_v34  ;;  %2124 = vrot.lane.b32.xlu1 %v4253_v42, %s3593_s5  ;;  %v2744_v42 = vld [vmem:[%s4408_s14 + $0x18] sm:$0xff] }
0x1f1d   :  { %v3320_v39 = vpack.c.bf16 %v2744_v42, %v2743_v33 }
0x1f1f   :  { %v2252_v35 = vpop.permute.xlu1 %2251 }
0x1f20   :  { %2254 = vst.msk [vmem:[#allocation7 + $0x2] sm:$0xc0] %vm858_vm5, %v2252_v35  ;;  %2483 = vrot.lane.b32.xlu1 %v4305_v9, %s3593_s5 }
0x1f24   :  { %2729 = vrot.lane.b32.xlu1 %v2727_v63, %s3593_s5 }
0x1f27   :  { %v2740_v9 = vld [vmem:[#allocation7 + $0x8] sm:$0xff] }
0x1f8a   :  { %v2734_v10 = vpop.permute.xlu1 %2733 }
0x1f8b   :  { %2736 = vst.msk [vmem:[#allocation7 - $0x6] sm:$0xc0] %vm858_vm5, %v2734_v10 }
0x1f8e   :  { %v2125_v38 = vpop.permute.xlu1 %2124 }
0x1f8f   :  { %2127 = vst.msk [vmem:[#allocation6] sm:$0x30] %vm730_vm3, %v2125_v38 }
0x1f92   :  { %v2484_v36 = vpop.permute.xlu1 %2483  ;;  %v2739_v37 = vld [vmem:[#allocation7] sm:$0xff] }
0x1f93   :  { %2486 = vst.msk [vmem:[#allocation6 + $0x8] sm:$0xc] %vm602_vm4, %v2484_v36  ;;  %2998 = vmatprep.mubr.msk.f32.mxu0 %vm1374_vm6, %v2739_v37 }
0x1f94   :  { %2999 = vmatmul.mubr.msk.f32.vlgmr.msra.gmra.mrb[24].mxu0 %vm1374_vm6, %v2740_v9 }
0x1f95   :  { %3319 = vmatpush3.bf16.msra.mxu0 %v3316_v29 }
0x1f96   :  { %v2730_v43 = vpop.permute.xlu1 %2729  ;;  %v2737_v40 = vld [vmem:[#allocation6] sm:$0xff]  ;;  %3321 = vmatprep.subr.bf16.mxu0 %v3320_v39 }
0x1f97   :  { %2732 = vst.msk [vmem:[#allocation6 + $0x8] sm:$0xc0] %vm858_vm5, %v2730_v43  ;;  %3009 = vmatprep.mubr.msk.f32.mxu0 %vm1374_vm6, %v2737_v40 }
0x1f99   :  { %3323 = vmatpush3.bf16.msra.mxu0 %v3320_v39 }
0x1f9e   :  { %v2738_v44 = vld [vmem:[#allocation6 + $0x8] sm:$0xff] }
0x1f9f   :  { %3010 = vmatmul.mubr.msk.f32.vlgmr.msra.gmra.mrb[24].mxu0 %vm1374_vm6, %v2738_v44 }
0x2072   :  { %v3011_v46 = vpop.f32.mrb[24].mxu0 }
0x2073   :  { %v2919_v48 = vadd.f32 %v3011_v46, %v2977_v45  ;;  %v2902_v49 = vpop.f32.mrb[25].mxu0 }
0x2074   :  { %v2918_v50 = vadd.f32 %v2977_v45, %v2902_v49 }
0x2075   :  { %2922 = vst.msk [vmem:[%s4411_s17 + $0x8] sm:$0xff] %vm2920_vm7, %v2919_v48 }
0x2076   :  { %2921 = vst.msk [vmem:[%s4411_s17] sm:$0xff] %vm2920_vm7, %v2918_v50 }
0x2077   :  { %2927 = vsyncpa [#allocation9], 1 }
0x2078   :  { %2928 = vsyncpa [#allocation11], 1 }
0x2079   :  { %2929 = vsyncpa [#allocation14], 1 }
0x207a   :  { %2930 = vsyncpa [#allocation17], 1 }

</bundles_post_ra>
